<compile_context>
chip_gen: v5e
topology: v5e:2x2
jax: 0.10.0
libtpu: 0.0.40
codegen_flags: <defaults>
</compile_context>

<pallas_src>
import jax
import jax.numpy as jnp
from jax.experimental import pallas as pl
from jax.experimental.pallas import tpu as pltpu


def _round_up(x: int, m: int) -> int:
    return (x + m - 1) // m * m


# ---------------------------------------------------------------------------
# Kernel 1: conv1 (1 -> C1, k3, s1) + DoubleSwish, pure VPU (no MXU, no im2col)
# ---------------------------------------------------------------------------
def _conv1_dswish_kernel(x_ref, w_ref, b_ref, o_ref):
    """x_ref: (1, T, F) f32 VMEM.   w_ref: (9, C1) f32 SMEM (row = kh*3+kw).
    b_ref: (C1,) f32 SMEM.          o_ref: (1, C1, T1, F1) bf16 VMEM.
    DoubleSwish(y) = y * sigmoid(y - 1)."""
    C1, T1, F1 = o_ref.shape[1], o_ref.shape[2], o_ref.shape[3]
    x = x_ref[0]                                          # (T, F), lane axis = F
    # 9 shifted (T1, F1) windows of the input plane (static slices, hoisted).
    wins = [x[kh:kh + T1, kw:kw + F1] for kh in range(3) for kw in range(3)]
    for c in range(C1):                                   # static unroll, C1 = 8
        acc = wins[0] * w_ref[0, c]
        for t in range(1, 9):
            acc = acc + wins[t] * w_ref[t, c]             # scalar (SMEM) x plane FMA
        y = acc + b_ref[c]
        o_ref[0, c, :, :] = (y * jax.nn.sigmoid(y - 1.0)).astype(o_ref.dtype)


def conv1_dswish(x, w1_taps, b1):
    """x: (N, T, F) -> (N, C1, T-2, F-2) bf16 (channel-plane layout)."""
    N, T, F = x.shape
    C1 = w1_taps.shape[1]
    T1, F1 = T - 2, F - 2
    return pl.pallas_call(
        _conv1_dswish_kernel,
        out_shape=jax.ShapeDtypeStruct((N, C1, T1, F1), jnp.bfloat16),
        grid=(N,),
        in_specs=[
            pl.BlockSpec((1, T, F), lambda n: (n, 0, 0)),
            pl.BlockSpec(memory_space=pltpu.MemorySpace.SMEM),   # 9 x C1 tap table
            pl.BlockSpec(memory_space=pltpu.MemorySpace.SMEM),   # bias
        ],
        out_specs=pl.BlockSpec((1, C1, T1, F1), lambda n: (n, 0, 0, 0)),
        compiler_params=pltpu.CompilerParams(
            dimension_semantics=("parallel",)),
    )(x.astype(jnp.float32), w1_taps.astype(jnp.float32), b1.astype(jnp.float32))


# ---------------------------------------------------------------------------
# Kernel 2/3: M-tiled matmul with fused bias + DoubleSwish / BasicNorm epilogue
# ---------------------------------------------------------------------------
def _mm_bias_dswish_kernel(a_ref, w_ref, b_ref, o_ref):
    """o = DoubleSwish(a @ w + b); a/w bf16 on the MXU, epilogue in f32."""
    y = jnp.dot(a_ref[...], w_ref[...], preferred_element_type=jnp.float32)
    y = y + b_ref[...]                                   # (TM, Cout) + (1, Cout)
    o_ref[...] = (y * jax.nn.sigmoid(y - 1.0)).astype(o_ref.dtype)


def _mm_bias_basicnorm_kernel(a_ref, w_ref, b_ref, o_ref):
    """o = BasicNorm(a @ w + b), eps = 0.25 (learn_eps=False); full odim in block."""
    y = jnp.dot(a_ref[...], w_ref[...], preferred_element_type=jnp.float32)
    y = y + b_ref[...]
    scales = jax.lax.rsqrt(jnp.mean(y * y, axis=-1, keepdims=True) + 0.25)
    o_ref[...] = (y * scales).astype(o_ref.dtype)


def _pallas_mm(kernel, a, w, b, out_dtype, max_tm=512):
    """Row-tiled pallas_call: A streams in TM-row tiles, W/bias stay resident.

    M (rows) is the only tiled axis; Nc stays whole so the BasicNorm reduction is
    exact.  Ragged M is zero-padded up to the tile size and sliced off afterwards.
    """
    M, K = a.shape
    Kw, Nc = w.shape
    assert K == Kw
    TM = min(max_tm, _round_up(M, 16))        # multiple of 16 (bf16 sublane packing)
    Mp = _round_up(M, TM)
    a = a.astype(jnp.bfloat16)
    if Mp != M:
        a = jnp.pad(a, ((0, Mp - M), (0, 0)))
    w = w.astype(jnp.bfloat16)
    b2 = b.reshape(1, Nc).astype(jnp.float32)

    cost = pl.CostEstimate(
        flops=2 * Mp * K * Nc,
        transcendentals=Mp * Nc,
        bytes_accessed=(Mp * K + K * Nc) * 2 + 4 * Nc
        + Mp * Nc * jnp.dtype(out_dtype).itemsize,
    )
    out = pl.pallas_call(
        kernel,
        out_shape=jax.ShapeDtypeStruct((Mp, Nc), out_dtype),
        grid=(Mp // TM,),
        in_specs=[
            pl.BlockSpec((TM, K), lambda i: (i, 0)),     # streamed row tiles
            pl.BlockSpec((K, Nc), lambda i: (0, 0)),     # resident weight
            pl.BlockSpec((1, Nc), lambda i: (0, 0)),     # resident bias
        ],
        out_specs=pl.BlockSpec((TM, Nc), lambda i: (i, 0)),
        compiler_params=pltpu.CompilerParams(
            dimension_semantics=("parallel",)),          # megacore split on v7x
        cost_estimate=cost,
    )(a, w, b2)
    return out[:M] if Mp != M else out


# ---------------------------------------------------------------------------
# Glue: im2col (strided slicing / reshape only), conv-as-matmul layer
# ---------------------------------------------------------------------------
def _im2col(x, k, stride):
    """x: (N, H, W, C) -> (N, OH, OW, k*k*C); feature order (kh, kw, c)."""
    N, H, W, C = x.shape
    OH = (H - k) // stride + 1
    OW = (W - k) // stride + 1
    cols = []
    for kh in range(k):
        for kw in range(k):
            patch = jax.lax.slice(
                x,
                (0, kh, kw, 0),
                (N, kh + stride * (OH - 1) + 1, kw + stride * (OW - 1) + 1, C),
                (1, stride, stride, 1),
            )
            cols.append(patch)
    return jnp.concatenate(cols, axis=-1), OH, OW


def _conv_layer_mm(h_nhwc, w_mat, b, stride, out_dtype=jnp.bfloat16):
    """h_nhwc: (N, H, W, Cin); w_mat: (9*Cin, Cout), rows ordered (kh, kw, cin)."""
    N = h_nhwc.shape[0]
    Cout = w_mat.shape[1]
    cols, OH, OW = _im2col(h_nhwc, 3, stride)
    a = cols.reshape(N * OH * OW, -1)
    y = _pallas_mm(_mm_bias_dswish_kernel, a, w_mat, b, out_dtype)
    return y.reshape(N, OH, OW, Cout)


# ---------------------------------------------------------------------------
# Parameters
# ---------------------------------------------------------------------------
def init_params(key, in_channels, out_channels,
                layer1_channels=8, layer2_channels=32, layer3_channels=128):
    """Synthetic parameters in the PyTorch module's native layouts
    (ScaledConv2d / ScaledLinear scales assumed folded in)."""
    assert in_channels >= 9
    f3 = ((in_channels - 3) // 2 - 1) // 2
    lin_in = layer3_channels * f3
    ks = jax.random.split(key, 8)
    s = 0.1
    return {
        "w1": s * jax.random.normal(ks[0], (layer1_channels, 1, 3, 3), jnp.float32),
        "b1": s * jax.random.normal(ks[1], (layer1_channels,), jnp.float32),
        "w2": s * jax.random.normal(ks[2], (layer2_channels, layer1_channels, 3, 3), jnp.float32),
        "b2": s * jax.random.normal(ks[3], (layer2_channels,), jnp.float32),
        "w3": s * jax.random.normal(ks[4], (layer3_channels, layer2_channels, 3, 3), jnp.float32),
        "b3": s * jax.random.normal(ks[5], (layer3_channels,), jnp.float32),
        # (lin_in, odim) with rows in PyTorch channel-major order (row = c*F3 + f),
        # i.e. matching x.transpose(1,2).view(b, t, c*f) @ W.T.
        "w_out": s * jax.random.normal(ks[6], (lin_in, out_channels), jnp.float32),
        "b_out": s * jax.random.normal(ks[7], (out_channels,), jnp.float32),
    }


def prepare_params(params, layer3_channels=128):
    """One-time re-layout of the PyTorch-style weights for the TPU kernels:
      * conv2/conv3 -> (9*Cin, Cout) matmul layout, rows ordered (kh, kw, cin), bf16
      * conv1 -> (9, C1) tap table (read as SMEM scalars by the VPU kernel), f32
      * w_out rows permuted channel-major (c*F3+f) -> f-major (f*C3+c) so the
        runtime needs NO transpose of the conv3 activation before the linear.
    """
    w1, w2, w3, w_out = params["w1"], params["w2"], params["w3"], params["w_out"]
    C1 = w1.shape[0]
    C3 = layer3_channels
    lin_in, odim = w_out.shape
    F3 = lin_in // C3
    w1_taps = jnp.transpose(w1[:, 0, :, :], (1, 2, 0)).reshape(9, C1).astype(jnp.float32)
    w2_mat = jnp.transpose(w2, (2, 3, 1, 0)).reshape(-1, w2.shape[0]).astype(jnp.bfloat16)
    w3_mat = jnp.transpose(w3, (2, 3, 1, 0)).reshape(-1, w3.shape[0]).astype(jnp.bfloat16)
    w_out_fmajor = (w_out.reshape(C3, F3, odim).transpose(1, 0, 2)
                    .reshape(lin_in, odim).astype(jnp.bfloat16))
    return {
        "w1_taps": w1_taps, "b1": params["b1"].astype(jnp.float32),
        "w2_mat": w2_mat, "b2": params["b2"].astype(jnp.float32),
        "w3_mat": w3_mat, "b3": params["b3"].astype(jnp.float32),
        "w_out": w_out_fmajor, "b_out": params["b_out"].astype(jnp.float32),
    }


# ---------------------------------------------------------------------------
# Module forward
# ---------------------------------------------------------------------------
def conv2d_subsampling_forward(prep, x):
    """x: (N, T, idim) -> (N, ((T-3)//2-1)//2, odim)."""
    # conv1 + DoubleSwish on the VPU (no MXU, no im2col of the raw input).
    h = conv1_dswish(x, prep["w1_taps"], prep["b1"])          # (N, C1, T1, F1) bf16
    h = jnp.transpose(h, (0, 2, 3, 1))                        # small NHWC re-layout
    # conv2 (8->32, k3, s2) + DoubleSwish: im2col + fused M-tiled Pallas matmul.
    h = _conv_layer_mm(h, prep["w2_mat"], prep["b2"], stride=2)
    # conv3 (32->128, k3, s2) + DoubleSwish.
    h = _conv_layer_mm(h, prep["w3_mat"], prep["b3"], stride=2)
    # Linear + BasicNorm.  NHWC flatten is already (f, c)-ordered and w_out rows
    # were permuted once at prep time, so no runtime activation transpose.
    N_, T3, F3, C3 = h.shape
    a = h.reshape(N_ * T3, F3 * C3)
    y = _pallas_mm(_mm_bias_basicnorm_kernel, a, prep["w_out"], prep["b_out"],
                   jnp.float32)
    # out_balancer (ActivationBalancer) is identity in the forward pass.
    return y.reshape(N_, T3, -1)


if __name__ == "__main__":
    key = jax.random.PRNGKey(0)
    k_param, k_x = jax.random.split(key)

    N, T, idim, odim = 2, 16, 16, 32
    params = init_params(k_param, in_channels=idim, out_channels=odim)
    prep = prepare_params(params)
    x = jax.random.normal(k_x, (N, T, idim), jnp.float32)

    fwd = jax.jit(conv2d_subsampling_forward)
    out = jax.block_until_ready(fwd(prep, x))

    expected_t = ((T - 3) // 2 - 1) // 2
    assert out.shape == (N, expected_t, odim), out.shape
    assert bool(jnp.all(jnp.isfinite(out)))
    print("KERNEL_OK")
</pallas_src>

<mosaic_0001>
module attributes {stable_mosaic.version = 11 : i64} {
  func.func @_conv1_dswish_kernel(%arg0: i32, %arg1: memref<1x16x16xf32, #tpu.memory_space<vmem>>, %arg2: memref<9x8xf32, #tpu.memory_space<smem>>, %arg3: memref<8xf32, #tpu.memory_space<smem>>, %arg4: memref<1x8x14x14xbf16, #tpu.memory_space<vmem>>) attributes {dimension_semantics = [#tpu.dimension_semantics<parallel>], iteration_bounds = array<i64: 2>, scalar_prefetch = 0 : i64, scratch_operands = 0 : i64, tpu.core_type = #tpu.core_type<tc>, window_params = [{transform_indices = @transform_0, window_bounds = array<i64: 1, 16, 16>}, {transform_indices = @transform_1, window_bounds = array<i64: 9, 8>}, {transform_indices = @transform_2, window_bounds = array<i64: 8>}, {transform_indices = @transform_3, window_bounds = array<i64: 1, 8, 14, 14>}]} {
    %c0 = arith.constant 0 : index
    %c0_0 = arith.constant 0 : index
    %c0_1 = arith.constant 0 : index
    %0 = vector.load %arg1[%c0, %c0_0, %c0_1] : memref<1x16x16xf32, #tpu.memory_space<vmem>>, vector<1x16x16xf32>
    %1 = vector.shape_cast %0 : vector<1x16x16xf32> to vector<16x16xf32>
    %2 = vector.extract_strided_slice %1 {offsets = [0, 0], sizes = [14, 14], strides = [1, 1]} : vector<16x16xf32> to vector<14x14xf32>
    %3 = vector.extract_strided_slice %1 {offsets = [0, 1], sizes = [14, 14], strides = [1, 1]} : vector<16x16xf32> to vector<14x14xf32>
    %4 = vector.extract_strided_slice %1 {offsets = [0, 2], sizes = [14, 14], strides = [1, 1]} : vector<16x16xf32> to vector<14x14xf32>
    %5 = vector.extract_strided_slice %1 {offsets = [1, 0], sizes = [14, 14], strides = [1, 1]} : vector<16x16xf32> to vector<14x14xf32>
    %6 = vector.extract_strided_slice %1 {offsets = [1, 1], sizes = [14, 14], strides = [1, 1]} : vector<16x16xf32> to vector<14x14xf32>
    %7 = vector.extract_strided_slice %1 {offsets = [1, 2], sizes = [14, 14], strides = [1, 1]} : vector<16x16xf32> to vector<14x14xf32>
    %8 = vector.extract_strided_slice %1 {offsets = [2, 0], sizes = [14, 14], strides = [1, 1]} : vector<16x16xf32> to vector<14x14xf32>
    %9 = vector.extract_strided_slice %1 {offsets = [2, 1], sizes = [14, 14], strides = [1, 1]} : vector<16x16xf32> to vector<14x14xf32>
    %10 = vector.extract_strided_slice %1 {offsets = [2, 2], sizes = [14, 14], strides = [1, 1]} : vector<16x16xf32> to vector<14x14xf32>
    %c0_2 = arith.constant 0 : index
    %c0_3 = arith.constant 0 : index
    %11 = memref.load %arg2[%c0_2, %c0_3] : memref<9x8xf32, #tpu.memory_space<smem>>
    %12 = vector.broadcast %11 : f32 to vector<14x14xf32>
    %13 = arith.mulf %2, %12 : vector<14x14xf32>
    %c1 = arith.constant 1 : index
    %c0_4 = arith.constant 0 : index
    %14 = memref.load %arg2[%c1, %c0_4] : memref<9x8xf32, #tpu.memory_space<smem>>
    %15 = vector.broadcast %14 : f32 to vector<14x14xf32>
    %16 = arith.mulf %3, %15 : vector<14x14xf32>
    %17 = arith.addf %13, %16 : vector<14x14xf32>
    %c2 = arith.constant 2 : index
    %c0_5 = arith.constant 0 : index
    %18 = memref.load %arg2[%c2, %c0_5] : memref<9x8xf32, #tpu.memory_space<smem>>
    %19 = vector.broadcast %18 : f32 to vector<14x14xf32>
    %20 = arith.mulf %4, %19 : vector<14x14xf32>
    %21 = arith.addf %17, %20 : vector<14x14xf32>
    %c3 = arith.constant 3 : index
    %c0_6 = arith.constant 0 : index
    %22 = memref.load %arg2[%c3, %c0_6] : memref<9x8xf32, #tpu.memory_space<smem>>
    %23 = vector.broadcast %22 : f32 to vector<14x14xf32>
    %24 = arith.mulf %5, %23 : vector<14x14xf32>
    %25 = arith.addf %21, %24 : vector<14x14xf32>
    %c4 = arith.constant 4 : index
    %c0_7 = arith.constant 0 : index
    %26 = memref.load %arg2[%c4, %c0_7] : memref<9x8xf32, #tpu.memory_space<smem>>
    %27 = vector.broadcast %26 : f32 to vector<14x14xf32>
    %28 = arith.mulf %6, %27 : vector<14x14xf32>
    %29 = arith.addf %25, %28 : vector<14x14xf32>
    %c5 = arith.constant 5 : index
    %c0_8 = arith.constant 0 : index
    %30 = memref.load %arg2[%c5, %c0_8] : memref<9x8xf32, #tpu.memory_space<smem>>
    %31 = vector.broadcast %30 : f32 to vector<14x14xf32>
    %32 = arith.mulf %7, %31 : vector<14x14xf32>
    %33 = arith.addf %29, %32 : vector<14x14xf32>
    %c6 = arith.constant 6 : index
    %c0_9 = arith.constant 0 : index
    %34 = memref.load %arg2[%c6, %c0_9] : memref<9x8xf32, #tpu.memory_space<smem>>
    %35 = vector.broadcast %34 : f32 to vector<14x14xf32>
    %36 = arith.mulf %8, %35 : vector<14x14xf32>
    %37 = arith.addf %33, %36 : vector<14x14xf32>
    %c7 = arith.constant 7 : index
    %c0_10 = arith.constant 0 : index
    %38 = memref.load %arg2[%c7, %c0_10] : memref<9x8xf32, #tpu.memory_space<smem>>
    %39 = vector.broadcast %38 : f32 to vector<14x14xf32>
    %40 = arith.mulf %9, %39 : vector<14x14xf32>
    %41 = arith.addf %37, %40 : vector<14x14xf32>
    %c8 = arith.constant 8 : index
    %c0_11 = arith.constant 0 : index
    %42 = memref.load %arg2[%c8, %c0_11] : memref<9x8xf32, #tpu.memory_space<smem>>
    %43 = vector.broadcast %42 : f32 to vector<14x14xf32>
    %44 = arith.mulf %10, %43 : vector<14x14xf32>
    %45 = arith.addf %41, %44 : vector<14x14xf32>
    %c0_12 = arith.constant 0 : index
    %46 = memref.load %arg3[%c0_12] : memref<8xf32, #tpu.memory_space<smem>>
    %47 = vector.broadcast %46 : f32 to vector<14x14xf32>
    %48 = arith.addf %45, %47 : vector<14x14xf32>
    %cst = arith.constant 1.000000e+00 : f32
    %49 = vector.broadcast %cst : f32 to vector<14x14xf32>
    %50 = arith.subf %48, %49 : vector<14x14xf32>
    %51 = arith.negf %50 : vector<14x14xf32>
    %52 = math.exp %51 : vector<14x14xf32>
    %cst_13 = arith.constant 1.000000e+00 : f32
    %53 = vector.broadcast %cst_13 : f32 to vector<14x14xf32>
    %54 = arith.addf %53, %52 : vector<14x14xf32>
    %55 = arith.divf %53, %54 : vector<14x14xf32>
    %56 = arith.mulf %48, %55 : vector<14x14xf32>
    %57 = arith.truncf %56 : vector<14x14xf32> to vector<14x14xbf16>
    %c0_14 = arith.constant 0 : index
    %c0_15 = arith.constant 0 : index
    %c0_16 = arith.constant 0 : index
    %c0_17 = arith.constant 0 : index
    %58 = vector.load %arg4[%c0_14, %c0_15, %c0_16, %c0_17] : memref<1x8x14x14xbf16, #tpu.memory_space<vmem>>, vector<1x1x14x14xbf16>
    %59 = vector.shape_cast %58 : vector<1x1x14x14xbf16> to vector<14x14xbf16>
    %60 = vector.shape_cast %57 : vector<14x14xbf16> to vector<1x1x14x14xbf16>
    tpu.vector_store %arg4[%c0_14, %c0_15, %c0_16, %c0_17], %60 {strides = array<i32>} : memref<1x8x14x14xbf16, #tpu.memory_space<vmem>>, vector<1x1x14x14xbf16>,
    %c0_18 = arith.constant 0 : index
    %c1_19 = arith.constant 1 : index
    %61 = memref.load %arg2[%c0_18, %c1_19] : memref<9x8xf32, #tpu.memory_space<smem>>
    %62 = vector.broadcast %61 : f32 to vector<14x14xf32>
    %63 = arith.mulf %2, %62 : vector<14x14xf32>
    %c1_20 = arith.constant 1 : index
    %c1_21 = arith.constant 1 : index
    %64 = memref.load %arg2[%c1_20, %c1_21] : memref<9x8xf32, #tpu.memory_space<smem>>
    %65 = vector.broadcast %64 : f32 to vector<14x14xf32>
    %66 = arith.mulf %3, %65 : vector<14x14xf32>
    %67 = arith.addf %63, %66 : vector<14x14xf32>
    %c2_22 = arith.constant 2 : index
    %c1_23 = arith.constant 1 : index
    %68 = memref.load %arg2[%c2_22, %c1_23] : memref<9x8xf32, #tpu.memory_space<smem>>
    %69 = vector.broadcast %68 : f32 to vector<14x14xf32>
    %70 = arith.mulf %4, %69 : vector<14x14xf32>
    %71 = arith.addf %67, %70 : vector<14x14xf32>
    %c3_24 = arith.constant 3 : index
    %c1_25 = arith.constant 1 : index
    %72 = memref.load %arg2[%c3_24, %c1_25] : memref<9x8xf32, #tpu.memory_space<smem>>
    %73 = vector.broadcast %72 : f32 to vector<14x14xf32>
    %74 = arith.mulf %5, %73 : vector<14x14xf32>
    %75 = arith.addf %71, %74 : vector<14x14xf32>
    %c4_26 = arith.constant 4 : index
    %c1_27 = arith.constant 1 : index
    %76 = memref.load %arg2[%c4_26, %c1_27] : memref<9x8xf32, #tpu.memory_space<smem>>
    %77 = vector.broadcast %76 : f32 to vector<14x14xf32>
    %78 = arith.mulf %6, %77 : vector<14x14xf32>
    %79 = arith.addf %75, %78 : vector<14x14xf32>
    %c5_28 = arith.constant 5 : index
    %c1_29 = arith.constant 1 : index
    %80 = memref.load %arg2[%c5_28, %c1_29] : memref<9x8xf32, #tpu.memory_space<smem>>
    %81 = vector.broadcast %80 : f32 to vector<14x14xf32>
    %82 = arith.mulf %7, %81 : vector<14x14xf32>
    %83 = arith.addf %79, %82 : vector<14x14xf32>
    %c6_30 = arith.constant 6 : index
    %c1_31 = arith.constant 1 : index
    %84 = memref.load %arg2[%c6_30, %c1_31] : memref<9x8xf32, #tpu.memory_space<smem>>
    %85 = vector.broadcast %84 : f32 to vector<14x14xf32>
    %86 = arith.mulf %8, %85 : vector<14x14xf32>
    %87 = arith.addf %83, %86 : vector<14x14xf32>
    %c7_32 = arith.constant 7 : index
    %c1_33 = arith.constant 1 : index
    %88 = memref.load %arg2[%c7_32, %c1_33] : memref<9x8xf32, #tpu.memory_space<smem>>
    %89 = vector.broadcast %88 : f32 to vector<14x14xf32>
    %90 = arith.mulf %9, %89 : vector<14x14xf32>
    %91 = arith.addf %87, %90 : vector<14x14xf32>
    %c8_34 = arith.constant 8 : index
    %c1_35 = arith.constant 1 : index
    %92 = memref.load %arg2[%c8_34, %c1_35] : memref<9x8xf32, #tpu.memory_space<smem>>
    %93 = vector.broadcast %92 : f32 to vector<14x14xf32>
    %94 = arith.mulf %10, %93 : vector<14x14xf32>
    %95 = arith.addf %91, %94 : vector<14x14xf32>
    %c1_36 = arith.constant 1 : index
    %96 = memref.load %arg3[%c1_36] : memref<8xf32, #tpu.memory_space<smem>>
    %97 = vector.broadcast %96 : f32 to vector<14x14xf32>
    %98 = arith.addf %95, %97 : vector<14x14xf32>
    %cst_37 = arith.constant 1.000000e+00 : f32
    %99 = vector.broadcast %cst_37 : f32 to vector<14x14xf32>
    %100 = arith.subf %98, %99 : vector<14x14xf32>
    %101 = arith.negf %100 : vector<14x14xf32>
    %102 = math.exp %101 : vector<14x14xf32>
    %cst_38 = arith.constant 1.000000e+00 : f32
    %103 = vector.broadcast %cst_38 : f32 to vector<14x14xf32>
    %104 = arith.addf %103, %102 : vector<14x14xf32>
    %105 = arith.divf %103, %104 : vector<14x14xf32>
    %106 = arith.mulf %98, %105 : vector<14x14xf32>
    %107 = arith.truncf %106 : vector<14x14xf32> to vector<14x14xbf16>
    %c0_39 = arith.constant 0 : index
    %c1_40 = arith.constant 1 : index
    %c0_41 = arith.constant 0 : index
    %c0_42 = arith.constant 0 : index
    %108 = vector.load %arg4[%c0_39, %c1_40, %c0_41, %c0_42] : memref<1x8x14x14xbf16, #tpu.memory_space<vmem>>, vector<1x1x14x14xbf16>
    %109 = vector.shape_cast %108 : vector<1x1x14x14xbf16> to vector<14x14xbf16>
    %110 = vector.shape_cast %107 : vector<14x14xbf16> to vector<1x1x14x14xbf16>
    tpu.vector_store %arg4[%c0_39, %c1_40, %c0_41, %c0_42], %110 {strides = array<i32>} : memref<1x8x14x14xbf16, #tpu.memory_space<vmem>>, vector<1x1x14x14xbf16>,
    %c0_43 = arith.constant 0 : index
    %c2_44 = arith.constant 2 : index
    %111 = memref.load %arg2[%c0_43, %c2_44] : memref<9x8xf32, #tpu.memory_space<smem>>
    %112 = vector.broadcast %111 : f32 to vector<14x14xf32>
    %113 = arith.mulf %2, %112 : vector<14x14xf32>
    %c1_45 = arith.constant 1 : index
    %c2_46 = arith.constant 2 : index
    %114 = memref.load %arg2[%c1_45, %c2_46] : memref<9x8xf32, #tpu.memory_space<smem>>
    %115 = vector.broadcast %114 : f32 to vector<14x14xf32>
    %116 = arith.mulf %3, %115 : vector<14x14xf32>
    %117 = arith.addf %113, %116 : vector<14x14xf32>
    %c2_47 = arith.constant 2 : index
    %c2_48 = arith.constant 2 : index
    %118 = memref.load %arg2[%c2_47, %c2_48] : memref<9x8xf32, #tpu.memory_space<smem>>
    %119 = vector.broadcast %118 : f32 to vector<14x14xf32>
    %120 = arith.mulf %4, %119 : vector<14x14xf32>
    %121 = arith.addf %117, %120 : vector<14x14xf32>
    %c3_49 = arith.constant 3 : index
    %c2_50 = arith.constant 2 : index
    %122 = memref.load %arg2[%c3_49, %c2_50] : memref<9x8xf32, #tpu.memory_space<smem>>
    %123 = vector.broadcast %122 : f32 to vector<14x14xf32>
    %124 = arith.mulf %5, %123 : vector<14x14xf32>
    %125 = arith.addf %121, %124 : vector<14x14xf32>
    %c4_51 = arith.constant 4 : index
    %c2_52 = arith.constant 2 : index
    %126 = memref.load %arg2[%c4_51, %c2_52] : memref<9x8xf32, #tpu.memory_space<smem>>
    %127 = vector.broadcast %126 : f32 to vector<14x14xf32>
    %128 = arith.mulf %6, %127 : vector<14x14xf32>
    %129 = arith.addf %125, %128 : vector<14x14xf32>
    %c5_53 = arith.constant 5 : index
    %c2_54 = arith.constant 2 : index
    %130 = memref.load %arg2[%c5_53, %c2_54] : memref<9x8xf32, #tpu.memory_space<smem>>
    %131 = vector.broadcast %130 : f32 to vector<14x14xf32>
    %132 = arith.mulf %7, %131 : vector<14x14xf32>
    %133 = arith.addf %129, %132 : vector<14x14xf32>
    %c6_55 = arith.constant 6 : index
    %c2_56 = arith.constant 2 : index
    %134 = memref.load %arg2[%c6_55, %c2_56] : memref<9x8xf32, #tpu.memory_space<smem>>
    %135 = vector.broadcast %134 : f32 to vector<14x14xf32>
    %136 = arith.mulf %8, %135 : vector<14x14xf32>
    %137 = arith.addf %133, %136 : vector<14x14xf32>
    %c7_57 = arith.constant 7 : index
    %c2_58 = arith.constant 2 : index
    %138 = memref.load %arg2[%c7_57, %c2_58] : memref<9x8xf32, #tpu.memory_space<smem>>
    %139 = vector.broadcast %138 : f32 to vector<14x14xf32>
    %140 = arith.mulf %9, %139 : vector<14x14xf32>
    %141 = arith.addf %137, %140 : vector<14x14xf32>
    %c8_59 = arith.constant 8 : index
    %c2_60 = arith.constant 2 : index
    %142 = memref.load %arg2[%c8_59, %c2_60] : memref<9x8xf32, #tpu.memory_space<smem>>
    %143 = vector.broadcast %142 : f32 to vector<14x14xf32>
    %144 = arith.mulf %10, %143 : vector<14x14xf32>
    %145 = arith.addf %141, %144 : vector<14x14xf32>
    %c2_61 = arith.constant 2 : index
    %146 = memref.load %arg3[%c2_61] : memref<8xf32, #tpu.memory_space<smem>>
    %147 = vector.broadcast %146 : f32 to vector<14x14xf32>
    %148 = arith.addf %145, %147 : vector<14x14xf32>
    %cst_62 = arith.constant 1.000000e+00 : f32
    %149 = vector.broadcast %cst_62 : f32 to vector<14x14xf32>
    %150 = arith.subf %148, %149 : vector<14x14xf32>
    %151 = arith.negf %150 : vector<14x14xf32>
    %152 = math.exp %151 : vector<14x14xf32>
    %cst_63 = arith.constant 1.000000e+00 : f32
    %153 = vector.broadcast %cst_63 : f32 to vector<14x14xf32>
    %154 = arith.addf %153, %152 : vector<14x14xf32>
    %155 = arith.divf %153, %154 : vector<14x14xf32>
    %156 = arith.mulf %148, %155 : vector<14x14xf32>
    %157 = arith.truncf %156 : vector<14x14xf32> to vector<14x14xbf16>
    %c0_64 = arith.constant 0 : index
    %c2_65 = arith.constant 2 : index
    %c0_66 = arith.constant 0 : index
    %c0_67 = arith.constant 0 : index
    %158 = vector.load %arg4[%c0_64, %c2_65, %c0_66, %c0_67] : memref<1x8x14x14xbf16, #tpu.memory_space<vmem>>, vector<1x1x14x14xbf16>
    %159 = vector.shape_cast %158 : vector<1x1x14x14xbf16> to vector<14x14xbf16>
    %160 = vector.shape_cast %157 : vector<14x14xbf16> to vector<1x1x14x14xbf16>
    tpu.vector_store %arg4[%c0_64, %c2_65, %c0_66, %c0_67], %160 {strides = array<i32>} : memref<1x8x14x14xbf16, #tpu.memory_space<vmem>>, vector<1x1x14x14xbf16>,
    %c0_68 = arith.constant 0 : index
    %c3_69 = arith.constant 3 : index
    %161 = memref.load %arg2[%c0_68, %c3_69] : memref<9x8xf32, #tpu.memory_space<smem>>
    %162 = vector.broadcast %161 : f32 to vector<14x14xf32>
    %163 = arith.mulf %2, %162 : vector<14x14xf32>
    %c1_70 = arith.constant 1 : index
    %c3_71 = arith.constant 3 : index
    %164 = memref.load %arg2[%c1_70, %c3_71] : memref<9x8xf32, #tpu.memory_space<smem>>
    %165 = vector.broadcast %164 : f32 to vector<14x14xf32>
    %166 = arith.mulf %3, %165 : vector<14x14xf32>
    %167 = arith.addf %163, %166 : vector<14x14xf32>
    %c2_72 = arith.constant 2 : index
    %c3_73 = arith.constant 3 : index
    %168 = memref.load %arg2[%c2_72, %c3_73] : memref<9x8xf32, #tpu.memory_space<smem>>
    %169 = vector.broadcast %168 : f32 to vector<14x14xf32>
    %170 = arith.mulf %4, %169 : vector<14x14xf32>
    %171 = arith.addf %167, %170 : vector<14x14xf32>
    %c3_74 = arith.constant 3 : index
    %c3_75 = arith.constant 3 : index
    %172 = memref.load %arg2[%c3_74, %c3_75] : memref<9x8xf32, #tpu.memory_space<smem>>
    %173 = vector.broadcast %172 : f32 to vector<14x14xf32>
    %174 = arith.mulf %5, %173 : vector<14x14xf32>
    %175 = arith.addf %171, %174 : vector<14x14xf32>
    %c4_76 = arith.constant 4 : index
    %c3_77 = arith.constant 3 : index
    %176 = memref.load %arg2[%c4_76, %c3_77] : memref<9x8xf32, #tpu.memory_space<smem>>
    %177 = vector.broadcast %176 : f32 to vector<14x14xf32>
    %178 = arith.mulf %6, %177 : vector<14x14xf32>
    %179 = arith.addf %175, %178 : vector<14x14xf32>
    %c5_78 = arith.constant 5 : index
    %c3_79 = arith.constant 3 : index
    %180 = memref.load %arg2[%c5_78, %c3_79] : memref<9x8xf32, #tpu.memory_space<smem>>
    %181 = vector.broadcast %180 : f32 to vector<14x14xf32>
    %182 = arith.mulf %7, %181 : vector<14x14xf32>
    %183 = arith.addf %179, %182 : vector<14x14xf32>
    %c6_80 = arith.constant 6 : index
    %c3_81 = arith.constant 3 : index
    %184 = memref.load %arg2[%c6_80, %c3_81] : memref<9x8xf32, #tpu.memory_space<smem>>
    %185 = vector.broadcast %184 : f32 to vector<14x14xf32>
    %186 = arith.mulf %8, %185 : vector<14x14xf32>
    %187 = arith.addf %183, %186 : vector<14x14xf32>
    %c7_82 = arith.constant 7 : index
    %c3_83 = arith.constant 3 : index
    %188 = memref.load %arg2[%c7_82, %c3_83] : memref<9x8xf32, #tpu.memory_space<smem>>
    %189 = vector.broadcast %188 : f32 to vector<14x14xf32>
    %190 = arith.mulf %9, %189 : vector<14x14xf32>
    %191 = arith.addf %187, %190 : vector<14x14xf32>
    %c8_84 = arith.constant 8 : index
    %c3_85 = arith.constant 3 : index
    %192 = memref.load %arg2[%c8_84, %c3_85] : memref<9x8xf32, #tpu.memory_space<smem>>
    %193 = vector.broadcast %192 : f32 to vector<14x14xf32>
    %194 = arith.mulf %10, %193 : vector<14x14xf32>
    %195 = arith.addf %191, %194 : vector<14x14xf32>
    %c3_86 = arith.constant 3 : index
    %196 = memref.load %arg3[%c3_86] : memref<8xf32, #tpu.memory_space<smem>>
    %197 = vector.broadcast %196 : f32 to vector<14x14xf32>
    %198 = arith.addf %195, %197 : vector<14x14xf32>
    %cst_87 = arith.constant 1.000000e+00 : f32
    %199 = vector.broadcast %cst_87 : f32 to vector<14x14xf32>
    %200 = arith.subf %198, %199 : vector<14x14xf32>
    %201 = arith.negf %200 : vector<14x14xf32>
    %202 = math.exp %201 : vector<14x14xf32>
    %cst_88 = arith.constant 1.000000e+00 : f32
    %203 = vector.broadcast %cst_88 : f32 to vector<14x14xf32>
    %204 = arith.addf %203, %202 : vector<14x14xf32>
    %205 = arith.divf %203, %204 : vector<14x14xf32>
    %206 = arith.mulf %198, %205 : vector<14x14xf32>
    %207 = arith.truncf %206 : vector<14x14xf32> to vector<14x14xbf16>
    %c0_89 = arith.constant 0 : index
    %c3_90 = arith.constant 3 : index
    %c0_91 = arith.constant 0 : index
    %c0_92 = arith.constant 0 : index
    %208 = vector.load %arg4[%c0_89, %c3_90, %c0_91, %c0_92] : memref<1x8x14x14xbf16, #tpu.memory_space<vmem>>, vector<1x1x14x14xbf16>
    %209 = vector.shape_cast %208 : vector<1x1x14x14xbf16> to vector<14x14xbf16>
    %210 = vector.shape_cast %207 : vector<14x14xbf16> to vector<1x1x14x14xbf16>
    tpu.vector_store %arg4[%c0_89, %c3_90, %c0_91, %c0_92], %210 {strides = array<i32>} : memref<1x8x14x14xbf16, #tpu.memory_space<vmem>>, vector<1x1x14x14xbf16>,
    %c0_93 = arith.constant 0 : index
    %c4_94 = arith.constant 4 : index
    %211 = memref.load %arg2[%c0_93, %c4_94] : memref<9x8xf32, #tpu.memory_space<smem>>
    %212 = vector.broadcast %211 : f32 to vector<14x14xf32>
    %213 = arith.mulf %2, %212 : vector<14x14xf32>
    %c1_95 = arith.constant 1 : index
    %c4_96 = arith.constant 4 : index
    %214 = memref.load %arg2[%c1_95, %c4_96] : memref<9x8xf32, #tpu.memory_space<smem>>
    %215 = vector.broadcast %214 : f32 to vector<14x14xf32>
    %216 = arith.mulf %3, %215 : vector<14x14xf32>
    %217 = arith.addf %213, %216 : vector<14x14xf32>
    %c2_97 = arith.constant 2 : index
    %c4_98 = arith.constant 4 : index
    %218 = memref.load %arg2[%c2_97, %c4_98] : memref<9x8xf32, #tpu.memory_space<smem>>
    %219 = vector.broadcast %218 : f32 to vector<14x14xf32>
    %220 = arith.mulf %4, %219 : vector<14x14xf32>
    %221 = arith.addf %217, %220 : vector<14x14xf32>
    %c3_99 = arith.constant 3 : index
    %c4_100 = arith.constant 4 : index
    %222 = memref.load %arg2[%c3_99, %c4_100] : memref<9x8xf32, #tpu.memory_space<smem>>
    %223 = vector.broadcast %222 : f32 to vector<14x14xf32>
    %224 = arith.mulf %5, %223 : vector<14x14xf32>
    %225 = arith.addf %221, %224 : vector<14x14xf32>
    %c4_101 = arith.constant 4 : index
    %c4_102 = arith.constant 4 : index
    %226 = memref.load %arg2[%c4_101, %c4_102] : memref<9x8xf32, #tpu.memory_space<smem>>
    %227 = vector.broadcast %226 : f32 to vector<14x14xf32>
    %228 = arith.mulf %6, %227 : vector<14x14xf32>
    %229 = arith.addf %225, %228 : vector<14x14xf32>
    %c5_103 = arith.constant 5 : index
    %c4_104 = arith.constant 4 : index
    %230 = memref.load %arg2[%c5_103, %c4_104] : memref<9x8xf32, #tpu.memory_space<smem>>
    %231 = vector.broadcast %230 : f32 to vector<14x14xf32>
    %232 = arith.mulf %7, %231 : vector<14x14xf32>
    %233 = arith.addf %229, %232 : vector<14x14xf32>
    %c6_105 = arith.constant 6 : index
    %c4_106 = arith.constant 4 : index
    %234 = memref.load %arg2[%c6_105, %c4_106] : memref<9x8xf32, #tpu.memory_space<smem>>
    %235 = vector.broadcast %234 : f32 to vector<14x14xf32>
    %236 = arith.mulf %8, %235 : vector<14x14xf32>
    %237 = arith.addf %233, %236 : vector<14x14xf32>
    %c7_107 = arith.constant 7 : index
    %c4_108 = arith.constant 4 : index
    %238 = memref.load %arg2[%c7_107, %c4_108] : memref<9x8xf32, #tpu.memory_space<smem>>
    %239 = vector.broadcast %238 : f32 to vector<14x14xf32>
    %240 = arith.mulf %9, %239 : vector<14x14xf32>
    %241 = arith.addf %237, %240 : vector<14x14xf32>
    %c8_109 = arith.constant 8 : index
    %c4_110 = arith.constant 4 : index
    %242 = memref.load %arg2[%c8_109, %c4_110] : memref<9x8xf32, #tpu.memory_space<smem>>
    %243 = vector.broadcast %242 : f32 to vector<14x14xf32>
    %244 = arith.mulf %10, %243 : vector<14x14xf32>
    %245 = arith.addf %241, %244 : vector<14x14xf32>
    %c4_111 = arith.constant 4 : index
    %246 = memref.load %arg3[%c4_111] : memref<8xf32, #tpu.memory_space<smem>>
    %247 = vector.broadcast %246 : f32 to vector<14x14xf32>
    %248 = arith.addf %245, %247 : vector<14x14xf32>
    %cst_112 = arith.constant 1.000000e+00 : f32
    %249 = vector.broadcast %cst_112 : f32 to vector<14x14xf32>
    %250 = arith.subf %248, %249 : vector<14x14xf32>
    %251 = arith.negf %250 : vector<14x14xf32>
    %252 = math.exp %251 : vector<14x14xf32>
    %cst_113 = arith.constant 1.000000e+00 : f32
    %253 = vector.broadcast %cst_113 : f32 to vector<14x14xf32>
    %254 = arith.addf %253, %252 : vector<14x14xf32>
    %255 = arith.divf %253, %254 : vector<14x14xf32>
    %256 = arith.mulf %248, %255 : vector<14x14xf32>
    %257 = arith.truncf %256 : vector<14x14xf32> to vector<14x14xbf16>
    %c0_114 = arith.constant 0 : index
    %c4_115 = arith.constant 4 : index
    %c0_116 = arith.constant 0 : index
    %c0_117 = arith.constant 0 : index
    %258 = vector.load %arg4[%c0_114, %c4_115, %c0_116, %c0_117] : memref<1x8x14x14xbf16, #tpu.memory_space<vmem>>, vector<1x1x14x14xbf16>
    %259 = vector.shape_cast %258 : vector<1x1x14x14xbf16> to vector<14x14xbf16>
    %260 = vector.shape_cast %257 : vector<14x14xbf16> to vector<1x1x14x14xbf16>
    tpu.vector_store %arg4[%c0_114, %c4_115, %c0_116, %c0_117], %260 {strides = array<i32>} : memref<1x8x14x14xbf16, #tpu.memory_space<vmem>>, vector<1x1x14x14xbf16>,
    %c0_118 = arith.constant 0 : index
    %c5_119 = arith.constant 5 : index
    %261 = memref.load %arg2[%c0_118, %c5_119] : memref<9x8xf32, #tpu.memory_space<smem>>
    %262 = vector.broadcast %261 : f32 to vector<14x14xf32>
    %263 = arith.mulf %2, %262 : vector<14x14xf32>
    %c1_120 = arith.constant 1 : index
    %c5_121 = arith.constant 5 : index
    %264 = memref.load %arg2[%c1_120, %c5_121] : memref<9x8xf32, #tpu.memory_space<smem>>
    %265 = vector.broadcast %264 : f32 to vector<14x14xf32>
    %266 = arith.mulf %3, %265 : vector<14x14xf32>
    %267 = arith.addf %263, %266 : vector<14x14xf32>
    %c2_122 = arith.constant 2 : index
    %c5_123 = arith.constant 5 : index
    %268 = memref.load %arg2[%c2_122, %c5_123] : memref<9x8xf32, #tpu.memory_space<smem>>
    %269 = vector.broadcast %268 : f32 to vector<14x14xf32>
    %270 = arith.mulf %4, %269 : vector<14x14xf32>
    %271 = arith.addf %267, %270 : vector<14x14xf32>
    %c3_124 = arith.constant 3 : index
    %c5_125 = arith.constant 5 : index
    %272 = memref.load %arg2[%c3_124, %c5_125] : memref<9x8xf32, #tpu.memory_space<smem>>
    %273 = vector.broadcast %272 : f32 to vector<14x14xf32>
    %274 = arith.mulf %5, %273 : vector<14x14xf32>
    %275 = arith.addf %271, %274 : vector<14x14xf32>
    %c4_126 = arith.constant 4 : index
    %c5_127 = arith.constant 5 : index
    %276 = memref.load %arg2[%c4_126, %c5_127] : memref<9x8xf32, #tpu.memory_space<smem>>
    %277 = vector.broadcast %276 : f32 to vector<14x14xf32>
    %278 = arith.mulf %6, %277 : vector<14x14xf32>
    %279 = arith.addf %275, %278 : vector<14x14xf32>
    %c5_128 = arith.constant 5 : index
    %c5_129 = arith.constant 5 : index
    %280 = memref.load %arg2[%c5_128, %c5_129] : memref<9x8xf32, #tpu.memory_space<smem>>
    %281 = vector.broadcast %280 : f32 to vector<14x14xf32>
    %282 = arith.mulf %7, %281 : vector<14x14xf32>
    %283 = arith.addf %279, %282 : vector<14x14xf32>
    %c6_130 = arith.constant 6 : index
    %c5_131 = arith.constant 5 : index
    %284 = memref.load %arg2[%c6_130, %c5_131] : memref<9x8xf32, #tpu.memory_space<smem>>
    %285 = vector.broadcast %284 : f32 to vector<14x14xf32>
    %286 = arith.mulf %8, %285 : vector<14x14xf32>
    %287 = arith.addf %283, %286 : vector<14x14xf32>
    %c7_132 = arith.constant 7 : index
    %c5_133 = arith.constant 5 : index
    %288 = memref.load %arg2[%c7_132, %c5_133] : memref<9x8xf32, #tpu.memory_space<smem>>
    %289 = vector.broadcast %288 : f32 to vector<14x14xf32>
    %290 = arith.mulf %9, %289 : vector<14x14xf32>
    %291 = arith.addf %287, %290 : vector<14x14xf32>
    %c8_134 = arith.constant 8 : index
    %c5_135 = arith.constant 5 : index
    %292 = memref.load %arg2[%c8_134, %c5_135] : memref<9x8xf32, #tpu.memory_space<smem>>
    %293 = vector.broadcast %292 : f32 to vector<14x14xf32>
    %294 = arith.mulf %10, %293 : vector<14x14xf32>
    %295 = arith.addf %291, %294 : vector<14x14xf32>
    %c5_136 = arith.constant 5 : index
    %296 = memref.load %arg3[%c5_136] : memref<8xf32, #tpu.memory_space<smem>>
    %297 = vector.broadcast %296 : f32 to vector<14x14xf32>
    %298 = arith.addf %295, %297 : vector<14x14xf32>
    %cst_137 = arith.constant 1.000000e+00 : f32
    %299 = vector.broadcast %cst_137 : f32 to vector<14x14xf32>
    %300 = arith.subf %298, %299 : vector<14x14xf32>
    %301 = arith.negf %300 : vector<14x14xf32>
    %302 = math.exp %301 : vector<14x14xf32>
    %cst_138 = arith.constant 1.000000e+00 : f32
    %303 = vector.broadcast %cst_138 : f32 to vector<14x14xf32>
    %304 = arith.addf %303, %302 : vector<14x14xf32>
    %305 = arith.divf %303, %304 : vector<14x14xf32>
    %306 = arith.mulf %298, %305 : vector<14x14xf32>
    %307 = arith.truncf %306 : vector<14x14xf32> to vector<14x14xbf16>
    %c0_139 = arith.constant 0 : index
    %c5_140 = arith.constant 5 : index
    %c0_141 = arith.constant 0 : index
    %c0_142 = arith.constant 0 : index
    %308 = vector.load %arg4[%c0_139, %c5_140, %c0_141, %c0_142] : memref<1x8x14x14xbf16, #tpu.memory_space<vmem>>, vector<1x1x14x14xbf16>
    %309 = vector.shape_cast %308 : vector<1x1x14x14xbf16> to vector<14x14xbf16>
    %310 = vector.shape_cast %307 : vector<14x14xbf16> to vector<1x1x14x14xbf16>
    tpu.vector_store %arg4[%c0_139, %c5_140, %c0_141, %c0_142], %310 {strides = array<i32>} : memref<1x8x14x14xbf16, #tpu.memory_space<vmem>>, vector<1x1x14x14xbf16>,
    %c0_143 = arith.constant 0 : index
    %c6_144 = arith.constant 6 : index
    %311 = memref.load %arg2[%c0_143, %c6_144] : memref<9x8xf32, #tpu.memory_space<smem>>
    %312 = vector.broadcast %311 : f32 to vector<14x14xf32>
    %313 = arith.mulf %2, %312 : vector<14x14xf32>
    %c1_145 = arith.constant 1 : index
    %c6_146 = arith.constant 6 : index
    %314 = memref.load %arg2[%c1_145, %c6_146] : memref<9x8xf32, #tpu.memory_space<smem>>
    %315 = vector.broadcast %314 : f32 to vector<14x14xf32>
    %316 = arith.mulf %3, %315 : vector<14x14xf32>
    %317 = arith.addf %313, %316 : vector<14x14xf32>
    %c2_147 = arith.constant 2 : index
    %c6_148 = arith.constant 6 : index
    %318 = memref.load %arg2[%c2_147, %c6_148] : memref<9x8xf32, #tpu.memory_space<smem>>
    %319 = vector.broadcast %318 : f32 to vector<14x14xf32>
    %320 = arith.mulf %4, %319 : vector<14x14xf32>
    %321 = arith.addf %317, %320 : vector<14x14xf32>
    %c3_149 = arith.constant 3 : index
    %c6_150 = arith.constant 6 : index
    %322 = memref.load %arg2[%c3_149, %c6_150] : memref<9x8xf32, #tpu.memory_space<smem>>
    %323 = vector.broadcast %322 : f32 to vector<14x14xf32>
    %324 = arith.mulf %5, %323 : vector<14x14xf32>
    %325 = arith.addf %321, %324 : vector<14x14xf32>
    %c4_151 = arith.constant 4 : index
    %c6_152 = arith.constant 6 : index
    %326 = memref.load %arg2[%c4_151, %c6_152] : memref<9x8xf32, #tpu.memory_space<smem>>
    %327 = vector.broadcast %326 : f32 to vector<14x14xf32>
    %328 = arith.mulf %6, %327 : vector<14x14xf32>
    %329 = arith.addf %325, %328 : vector<14x14xf32>
    %c5_153 = arith.constant 5 : index
    %c6_154 = arith.constant 6 : index
    %330 = memref.load %arg2[%c5_153, %c6_154] : memref<9x8xf32, #tpu.memory_space<smem>>
    %331 = vector.broadcast %330 : f32 to vector<14x14xf32>
    %332 = arith.mulf %7, %331 : vector<14x14xf32>
    %333 = arith.addf %329, %332 : vector<14x14xf32>
    %c6_155 = arith.constant 6 : index
    %c6_156 = arith.constant 6 : index
    %334 = memref.load %arg2[%c6_155, %c6_156] : memref<9x8xf32, #tpu.memory_space<smem>>
    %335 = vector.broadcast %334 : f32 to vector<14x14xf32>
    %336 = arith.mulf %8, %335 : vector<14x14xf32>
    %337 = arith.addf %333, %336 : vector<14x14xf32>
    %c7_157 = arith.constant 7 : index
    %c6_158 = arith.constant 6 : index
    %338 = memref.load %arg2[%c7_157, %c6_158] : memref<9x8xf32, #tpu.memory_space<smem>>
    %339 = vector.broadcast %338 : f32 to vector<14x14xf32>
    %340 = arith.mulf %9, %339 : vector<14x14xf32>
    %341 = arith.addf %337, %340 : vector<14x14xf32>
    %c8_159 = arith.constant 8 : index
    %c6_160 = arith.constant 6 : index
    %342 = memref.load %arg2[%c8_159, %c6_160] : memref<9x8xf32, #tpu.memory_space<smem>>
    %343 = vector.broadcast %342 : f32 to vector<14x14xf32>
    %344 = arith.mulf %10, %343 : vector<14x14xf32>
    %345 = arith.addf %341, %344 : vector<14x14xf32>
    %c6_161 = arith.constant 6 : index
    %346 = memref.load %arg3[%c6_161] : memref<8xf32, #tpu.memory_space<smem>>
    %347 = vector.broadcast %346 : f32 to vector<14x14xf32>
    %348 = arith.addf %345, %347 : vector<14x14xf32>
    %cst_162 = arith.constant 1.000000e+00 : f32
    %349 = vector.broadcast %cst_162 : f32 to vector<14x14xf32>
    %350 = arith.subf %348, %349 : vector<14x14xf32>
    %351 = arith.negf %350 : vector<14x14xf32>
    %352 = math.exp %351 : vector<14x14xf32>
    %cst_163 = arith.constant 1.000000e+00 : f32
    %353 = vector.broadcast %cst_163 : f32 to vector<14x14xf32>
    %354 = arith.addf %353, %352 : vector<14x14xf32>
    %355 = arith.divf %353, %354 : vector<14x14xf32>
    %356 = arith.mulf %348, %355 : vector<14x14xf32>
    %357 = arith.truncf %356 : vector<14x14xf32> to vector<14x14xbf16>
    %c0_164 = arith.constant 0 : index
    %c6_165 = arith.constant 6 : index
    %c0_166 = arith.constant 0 : index
    %c0_167 = arith.constant 0 : index
    %358 = vector.load %arg4[%c0_164, %c6_165, %c0_166, %c0_167] : memref<1x8x14x14xbf16, #tpu.memory_space<vmem>>, vector<1x1x14x14xbf16>
    %359 = vector.shape_cast %358 : vector<1x1x14x14xbf16> to vector<14x14xbf16>
    %360 = vector.shape_cast %357 : vector<14x14xbf16> to vector<1x1x14x14xbf16>
    tpu.vector_store %arg4[%c0_164, %c6_165, %c0_166, %c0_167], %360 {strides = array<i32>} : memref<1x8x14x14xbf16, #tpu.memory_space<vmem>>, vector<1x1x14x14xbf16>,
    %c0_168 = arith.constant 0 : index
    %c7_169 = arith.constant 7 : index
    %361 = memref.load %arg2[%c0_168, %c7_169] : memref<9x8xf32, #tpu.memory_space<smem>>
    %362 = vector.broadcast %361 : f32 to vector<14x14xf32>
    %363 = arith.mulf %2, %362 : vector<14x14xf32>
    %c1_170 = arith.constant 1 : index
    %c7_171 = arith.constant 7 : index
    %364 = memref.load %arg2[%c1_170, %c7_171] : memref<9x8xf32, #tpu.memory_space<smem>>
    %365 = vector.broadcast %364 : f32 to vector<14x14xf32>
    %366 = arith.mulf %3, %365 : vector<14x14xf32>
    %367 = arith.addf %363, %366 : vector<14x14xf32>
    %c2_172 = arith.constant 2 : index
    %c7_173 = arith.constant 7 : index
    %368 = memref.load %arg2[%c2_172, %c7_173] : memref<9x8xf32, #tpu.memory_space<smem>>
    %369 = vector.broadcast %368 : f32 to vector<14x14xf32>
    %370 = arith.mulf %4, %369 : vector<14x14xf32>
    %371 = arith.addf %367, %370 : vector<14x14xf32>
    %c3_174 = arith.constant 3 : index
    %c7_175 = arith.constant 7 : index
    %372 = memref.load %arg2[%c3_174, %c7_175] : memref<9x8xf32, #tpu.memory_space<smem>>
    %373 = vector.broadcast %372 : f32 to vector<14x14xf32>
    %374 = arith.mulf %5, %373 : vector<14x14xf32>
    %375 = arith.addf %371, %374 : vector<14x14xf32>
    %c4_176 = arith.constant 4 : index
    %c7_177 = arith.constant 7 : index
    %376 = memref.load %arg2[%c4_176, %c7_177] : memref<9x8xf32, #tpu.memory_space<smem>>
    %377 = vector.broadcast %376 : f32 to vector<14x14xf32>
    %378 = arith.mulf %6, %377 : vector<14x14xf32>
    %379 = arith.addf %375, %378 : vector<14x14xf32>
    %c5_178 = arith.constant 5 : index
    %c7_179 = arith.constant 7 : index
    %380 = memref.load %arg2[%c5_178, %c7_179] : memref<9x8xf32, #tpu.memory_space<smem>>
    %381 = vector.broadcast %380 : f32 to vector<14x14xf32>
    %382 = arith.mulf %7, %381 : vector<14x14xf32>
    %383 = arith.addf %379, %382 : vector<14x14xf32>
    %c6_180 = arith.constant 6 : index
    %c7_181 = arith.constant 7 : index
    %384 = memref.load %arg2[%c6_180, %c7_181] : memref<9x8xf32, #tpu.memory_space<smem>>
    %385 = vector.broadcast %384 : f32 to vector<14x14xf32>
    %386 = arith.mulf %8, %385 : vector<14x14xf32>
    %387 = arith.addf %383, %386 : vector<14x14xf32>
    %c7_182 = arith.constant 7 : index
    %c7_183 = arith.constant 7 : index
    %388 = memref.load %arg2[%c7_182, %c7_183] : memref<9x8xf32, #tpu.memory_space<smem>>
    %389 = vector.broadcast %388 : f32 to vector<14x14xf32>
    %390 = arith.mulf %9, %389 : vector<14x14xf32>
    %391 = arith.addf %387, %390 : vector<14x14xf32>
    %c8_184 = arith.constant 8 : index
    %c7_185 = arith.constant 7 : index
    %392 = memref.load %arg2[%c8_184, %c7_185] : memref<9x8xf32, #tpu.memory_space<smem>>
    %393 = vector.broadcast %392 : f32 to vector<14x14xf32>
    %394 = arith.mulf %10, %393 : vector<14x14xf32>
    %395 = arith.addf %391, %394 : vector<14x14xf32>
    %c7_186 = arith.constant 7 : index
    %396 = memref.load %arg3[%c7_186] : memref<8xf32, #tpu.memory_space<smem>>
    %397 = vector.broadcast %396 : f32 to vector<14x14xf32>
    %398 = arith.addf %395, %397 : vector<14x14xf32>
    %cst_187 = arith.constant 1.000000e+00 : f32
    %399 = vector.broadcast %cst_187 : f32 to vector<14x14xf32>
    %400 = arith.subf %398, %399 : vector<14x14xf32>
    %401 = arith.negf %400 : vector<14x14xf32>
    %402 = math.exp %401 : vector<14x14xf32>
    %cst_188 = arith.constant 1.000000e+00 : f32
    %403 = vector.broadcast %cst_188 : f32 to vector<14x14xf32>
    %404 = arith.addf %403, %402 : vector<14x14xf32>
    %405 = arith.divf %403, %404 : vector<14x14xf32>
    %406 = arith.mulf %398, %405 : vector<14x14xf32>
    %407 = arith.truncf %406 : vector<14x14xf32> to vector<14x14xbf16>
    %c0_189 = arith.constant 0 : index
    %c7_190 = arith.constant 7 : index
    %c0_191 = arith.constant 0 : index
    %c0_192 = arith.constant 0 : index
    %408 = vector.load %arg4[%c0_189, %c7_190, %c0_191, %c0_192] : memref<1x8x14x14xbf16, #tpu.memory_space<vmem>>, vector<1x1x14x14xbf16>
    %409 = vector.shape_cast %408 : vector<1x1x14x14xbf16> to vector<14x14xbf16>
    %410 = vector.shape_cast %407 : vector<14x14xbf16> to vector<1x1x14x14xbf16>
    tpu.vector_store %arg4[%c0_189, %c7_190, %c0_191, %c0_192], %410 {strides = array<i32>} : memref<1x8x14x14xbf16, #tpu.memory_space<vmem>>, vector<1x1x14x14xbf16>,
    return
  }
  func.func @transform_0(%arg0: i32) -> (i32, i32, i32) {
    %c0_i32 = arith.constant 0 : i32
    %c0_i32_0 = arith.constant 0 : i32
    %c0_i32_1 = arith.constant 0 : i32
    return %arg0, %c0_i32, %c0_i32_0 : i32, i32, i32
  }
  func.func @transform_1(%arg0: i32) -> (i32, i32) {
    %c0_i32 = arith.constant 0 : i32
    %c0_i32_0 = arith.constant 0 : i32
    %c0_i32_1 = arith.constant 0 : i32
    return %c0_i32, %c0_i32_0 : i32, i32
  }
  func.func @transform_2(%arg0: i32) -> i32 {
    %c0_i32 = arith.constant 0 : i32
    %c0_i32_0 = arith.constant 0 : i32
    return %c0_i32 : i32
  }
  func.func @transform_3(%arg0: i32) -> (i32, i32, i32, i32) {
    %c0_i32 = arith.constant 0 : i32
    %c0_i32_0 = arith.constant 0 : i32
    %c0_i32_1 = arith.constant 0 : i32
    %c0_i32_2 = arith.constant 0 : i32
    return %arg0, %c0_i32, %c0_i32_0, %c0_i32_1 : i32, i32, i32, i32
  }
}

module attributes {stable_mosaic.version = 11 : i64} {
  func.func @_mm_bias_dswish_kernel(%arg0: i32, %arg1: memref<80x72xbf16, #tpu.memory_space<vmem>>, %arg2: memref<72x32xbf16, #tpu.memory_space<vmem>>, %arg3: memref<1x32xf32, #tpu.memory_space<vmem>>, %arg4: memref<80x32xbf16, #tpu.memory_space<vmem>>) attributes {dimension_semantics = [#tpu.dimension_semantics<parallel>], iteration_bounds = array<i64: 1>, scalar_prefetch = 0 : i64, scratch_operands = 0 : i64, tpu.core_type = #tpu.core_type<tc>, window_params = [{transform_indices = @transform_0, window_bounds = array<i64: 80, 72>}, {pipeline_mode = #tpu.pipeline_mode<synchronous>, transform_indices = @transform_1, window_bounds = array<i64: 72, 32>}, {pipeline_mode = #tpu.pipeline_mode<synchronous>, transform_indices = @transform_2, window_bounds = array<i64: 1, 32>}, {transform_indices = @transform_3, window_bounds = array<i64: 80, 32>}]} {
    %c0 = arith.constant 0 : index
    %c0_0 = arith.constant 0 : index
    %0 = vector.load %arg1[%c0, %c0_0] : memref<80x72xbf16, #tpu.memory_space<vmem>>, vector<80x72xbf16>
    %c0_1 = arith.constant 0 : index
    %c0_2 = arith.constant 0 : index
    %1 = vector.load %arg2[%c0_1, %c0_2] : memref<72x32xbf16, #tpu.memory_space<vmem>>, vector<72x32xbf16>
    %cst = arith.constant dense<0.000000e+00> : vector<80x32xf32>
    %2 = tpu.matmul %0, %1, %cst {dimension_numbers = #tpu.dot_dimension_numbers<[1], [0], [0], [1], [0, 0, 1, 1], [], []>} : vector<80x72xbf16>, vector<72x32xbf16>, vector<80x32xf32> -> vector<80x32xf32>
    %c0_3 = arith.constant 0 : index
    %c0_4 = arith.constant 0 : index
    %3 = vector.load %arg3[%c0_3, %c0_4] : memref<1x32xf32, #tpu.memory_space<vmem>>, vector<1x32xf32>
    %4 = vector.broadcast %3 : vector<1x32xf32> to vector<80x32xf32>
    %5 = arith.addf %2, %4 : vector<80x32xf32>
    %cst_5 = arith.constant 1.000000e+00 : f32
    %6 = vector.broadcast %cst_5 : f32 to vector<80x32xf32>
    %7 = arith.subf %5, %6 : vector<80x32xf32>
    %8 = arith.negf %7 : vector<80x32xf32>
    %9 = math.exp %8 : vector<80x32xf32>
    %cst_6 = arith.constant 1.000000e+00 : f32
    %10 = vector.broadcast %cst_6 : f32 to vector<80x32xf32>
    %11 = arith.addf %10, %9 : vector<80x32xf32>
    %12 = arith.divf %10, %11 : vector<80x32xf32>
    %13 = arith.mulf %5, %12 : vector<80x32xf32>
    %14 = arith.truncf %13 : vector<80x32xf32> to vector<80x32xbf16>
    %c0_7 = arith.constant 0 : index
    %c0_8 = arith.constant 0 : index
    %15 = vector.load %arg4[%c0_7, %c0_8] : memref<80x32xbf16, #tpu.memory_space<vmem>>, vector<80x32xbf16>
    tpu.vector_store %arg4[%c0_7, %c0_8], %14 {strides = array<i32>} : memref<80x32xbf16, #tpu.memory_space<vmem>>, vector<80x32xbf16>,
    return
  }
  func.func @transform_0(%arg0: i32) -> (i32, i32) {
    %c0_i32 = arith.constant 0 : i32
    %c0_i32_0 = arith.constant 0 : i32
    return %arg0, %c0_i32 : i32, i32
  }
  func.func @transform_1(%arg0: i32) -> (i32, i32) {
    %c0_i32 = arith.constant 0 : i32
    %c0_i32_0 = arith.constant 0 : i32
    %c0_i32_1 = arith.constant 0 : i32
    return %c0_i32, %c0_i32_0 : i32, i32
  }
  func.func @transform_2(%arg0: i32) -> (i32, i32) {
    %c0_i32 = arith.constant 0 : i32
    %c0_i32_0 = arith.constant 0 : i32
    %c0_i32_1 = arith.constant 0 : i32
    return %c0_i32, %c0_i32_0 : i32, i32
  }
  func.func @transform_3(%arg0: i32) -> (i32, i32) {
    %c0_i32 = arith.constant 0 : i32
    %c0_i32_0 = arith.constant 0 : i32
    return %arg0, %c0_i32 : i32, i32
  }
}

module attributes {stable_mosaic.version = 11 : i64} {
  func.func @_mm_bias_dswish_kernel(%arg0: i32, %arg1: memref<16x288xbf16, #tpu.memory_space<vmem>>, %arg2: memref<288x128xbf16, #tpu.memory_space<vmem>>, %arg3: memref<1x128xf32, #tpu.memory_space<vmem>>, %arg4: memref<16x128xbf16, #tpu.memory_space<vmem>>) attributes {dimension_semantics = [#tpu.dimension_semantics<parallel>], iteration_bounds = array<i64: 1>, scalar_prefetch = 0 : i64, scratch_operands = 0 : i64, tpu.core_type = #tpu.core_type<tc>, window_params = [{transform_indices = @transform_0, window_bounds = array<i64: 16, 288>}, {pipeline_mode = #tpu.pipeline_mode<synchronous>, transform_indices = @transform_1, window_bounds = array<i64: 288, 128>}, {pipeline_mode = #tpu.pipeline_mode<synchronous>, transform_indices = @transform_2, window_bounds = array<i64: 1, 128>}, {transform_indices = @transform_3, window_bounds = array<i64: 16, 128>}]} {
    %c0 = arith.constant 0 : index
    %c0_0 = arith.constant 0 : index
    %0 = vector.load %arg1[%c0, %c0_0] : memref<16x288xbf16, #tpu.memory_space<vmem>>, vector<16x288xbf16>
    %c0_1 = arith.constant 0 : index
    %c0_2 = arith.constant 0 : index
    %1 = vector.load %arg2[%c0_1, %c0_2] : memref<288x128xbf16, #tpu.memory_space<vmem>>, vector<288x128xbf16>
    %cst = arith.constant dense<0.000000e+00> : vector<16x128xf32>
    %2 = tpu.matmul %0, %1, %cst {dimension_numbers = #tpu.dot_dimension_numbers<[1], [0], [0], [1], [0, 0, 1, 1], [], []>} : vector<16x288xbf16>, vector<288x128xbf16>, vector<16x128xf32> -> vector<16x128xf32>
    %c0_3 = arith.constant 0 : index
    %c0_4 = arith.constant 0 : index
    %3 = vector.load %arg3[%c0_3, %c0_4] : memref<1x128xf32, #tpu.memory_space<vmem>>, vector<1x128xf32>
    %4 = vector.broadcast %3 : vector<1x128xf32> to vector<16x128xf32>
    %5 = arith.addf %2, %4 : vector<16x128xf32>
    %cst_5 = arith.constant 1.000000e+00 : f32
    %6 = vector.broadcast %cst_5 : f32 to vector<16x128xf32>
    %7 = arith.subf %5, %6 : vector<16x128xf32>
    %8 = arith.negf %7 : vector<16x128xf32>
    %9 = math.exp %8 : vector<16x128xf32>
    %cst_6 = arith.constant 1.000000e+00 : f32
    %10 = vector.broadcast %cst_6 : f32 to vector<16x128xf32>
    %11 = arith.addf %10, %9 : vector<16x128xf32>
    %12 = arith.divf %10, %11 : vector<16x128xf32>
    %13 = arith.mulf %5, %12 : vector<16x128xf32>
    %14 = arith.truncf %13 : vector<16x128xf32> to vector<16x128xbf16>
    %c0_7 = arith.constant 0 : index
    %c0_8 = arith.constant 0 : index
    %15 = vector.load %arg4[%c0_7, %c0_8] : memref<16x128xbf16, #tpu.memory_space<vmem>>, vector<16x128xbf16>
    tpu.vector_store %arg4[%c0_7, %c0_8], %14 {strides = array<i32>} : memref<16x128xbf16, #tpu.memory_space<vmem>>, vector<16x128xbf16>,
    return
  }
  func.func @transform_0(%arg0: i32) -> (i32, i32) {
    %c0_i32 = arith.constant 0 : i32
    %c0_i32_0 = arith.constant 0 : i32
    return %arg0, %c0_i32 : i32, i32
  }
  func.func @transform_1(%arg0: i32) -> (i32, i32) {
    %c0_i32 = arith.constant 0 : i32
    %c0_i32_0 = arith.constant 0 : i32
    %c0_i32_1 = arith.constant 0 : i32
    return %c0_i32, %c0_i32_0 : i32, i32
  }
  func.func @transform_2(%arg0: i32) -> (i32, i32) {
    %c0_i32 = arith.constant 0 : i32
    %c0_i32_0 = arith.constant 0 : i32
    %c0_i32_1 = arith.constant 0 : i32
    return %c0_i32, %c0_i32_0 : i32, i32
  }
  func.func @transform_3(%arg0: i32) -> (i32, i32) {
    %c0_i32 = arith.constant 0 : i32
    %c0_i32_0 = arith.constant 0 : i32
    return %arg0, %c0_i32 : i32, i32
  }
}

module attributes {stable_mosaic.version = 11 : i64} {
  func.func @_mm_bias_basicnorm_kernel(%arg0: i32, %arg1: memref<16x256xbf16, #tpu.memory_space<vmem>>, %arg2: memref<256x32xbf16, #tpu.memory_space<vmem>>, %arg3: memref<1x32xf32, #tpu.memory_space<vmem>>, %arg4: memref<16x32xf32, #tpu.memory_space<vmem>>) attributes {dimension_semantics = [#tpu.dimension_semantics<parallel>], iteration_bounds = array<i64: 1>, scalar_prefetch = 0 : i64, scratch_operands = 0 : i64, tpu.core_type = #tpu.core_type<tc>, window_params = [{transform_indices = @transform_0, window_bounds = array<i64: 16, 256>}, {pipeline_mode = #tpu.pipeline_mode<synchronous>, transform_indices = @transform_1, window_bounds = array<i64: 256, 32>}, {pipeline_mode = #tpu.pipeline_mode<synchronous>, transform_indices = @transform_2, window_bounds = array<i64: 1, 32>}, {transform_indices = @transform_3, window_bounds = array<i64: 16, 32>}]} {
    %c0 = arith.constant 0 : index
    %c0_0 = arith.constant 0 : index
    %0 = vector.load %arg1[%c0, %c0_0] : memref<16x256xbf16, #tpu.memory_space<vmem>>, vector<16x256xbf16>
    %c0_1 = arith.constant 0 : index
    %c0_2 = arith.constant 0 : index
    %1 = vector.load %arg2[%c0_1, %c0_2] : memref<256x32xbf16, #tpu.memory_space<vmem>>, vector<256x32xbf16>
    %cst = arith.constant dense<0.000000e+00> : vector<16x32xf32>
    %2 = tpu.matmul %0, %1, %cst {dimension_numbers = #tpu.dot_dimension_numbers<[1], [0], [0], [1], [0, 0, 1, 1], [], []>} : vector<16x256xbf16>, vector<256x32xbf16>, vector<16x32xf32> -> vector<16x32xf32>
    %c0_3 = arith.constant 0 : index
    %c0_4 = arith.constant 0 : index
    %3 = vector.load %arg3[%c0_3, %c0_4] : memref<1x32xf32, #tpu.memory_space<vmem>>, vector<1x32xf32>
    %4 = vector.broadcast %3 : vector<1x32xf32> to vector<16x32xf32>
    %5 = arith.addf %2, %4 : vector<16x32xf32>
    %6 = arith.mulf %5, %5 : vector<16x32xf32>
    %cst_5 = arith.constant dense<0.000000e+00> : vector<16xf32>
    %7 = vector.multi_reduction <add>, %6, %cst_5 [1] : vector<16x32xf32> to vector<16xf32>
    %8 = vector.shape_cast %7 : vector<16xf32> to vector<16x1xf32>
    %cst_6 = arith.constant 3.200000e+01 : f32
    %9 = vector.broadcast %cst_6 : f32 to vector<16x1xf32>
    %10 = arith.divf %8, %9 : vector<16x1xf32>
    %cst_7 = arith.constant 2.500000e-01 : f32
    %11 = vector.broadcast %cst_7 : f32 to vector<16x1xf32>
    %12 = arith.addf %10, %11 : vector<16x1xf32>
    %13 = math.rsqrt %12 : vector<16x1xf32>
    %14 = vector.broadcast %13 : vector<16x1xf32> to vector<16x32xf32>
    %15 = arith.mulf %5, %14 : vector<16x32xf32>
    %c0_8 = arith.constant 0 : index
    %c0_9 = arith.constant 0 : index
    %16 = vector.load %arg4[%c0_8, %c0_9] : memref<16x32xf32, #tpu.memory_space<vmem>>, vector<16x32xf32>
    tpu.vector_store %arg4[%c0_8, %c0_9], %15 {strides = array<i32>} : memref<16x32xf32, #tpu.memory_space<vmem>>, vector<16x32xf32>,
    return
  }
  func.func @transform_0(%arg0: i32) -> (i32, i32) {
    %c0_i32 = arith.constant 0 : i32
    %c0_i32_0 = arith.constant 0 : i32
    return %arg0, %c0_i32 : i32, i32
  }
  func.func @transform_1(%arg0: i32) -> (i32, i32) {
    %c0_i32 = arith.constant 0 : i32
    %c0_i32_0 = arith.constant 0 : i32
    %c0_i32_1 = arith.constant 0 : i32
    return %c0_i32, %c0_i32_0 : i32, i32
  }
  func.func @transform_2(%arg0: i32) -> (i32, i32) {
    %c0_i32 = arith.constant 0 : i32
    %c0_i32_0 = arith.constant 0 : i32
    %c0_i32_1 = arith.constant 0 : i32
    return %c0_i32, %c0_i32_0 : i32, i32
  }
  func.func @transform_3(%arg0: i32) -> (i32, i32) {
    %c0_i32 = arith.constant 0 : i32
    %c0_i32_0 = arith.constant 0 : i32
    return %arg0, %c0_i32 : i32, i32
  }
}

</mosaic_0001>

<bundles_post_ra>
// kernel: conv2d_subsampling_forward.4
= control target key start
LH: loop header
LB: loop body
LE: loop exit
PB: predicated region body
PF: predicated region fallthrough
CT: control target
= control target key end

     0   :  { %8 = vsyncpa [#allocation3], 0  ;;  %s3040_s0 = inlined_call_operand.hbm [shape: f32[2,16,16], index: 0, kind: input, shape index: {}]   ;;  %s3041_s1 = inlined_call_operand.vmem [shape: f32[9,8], index: 1, kind: input, shape index: {}]   ;;  %s3042_s2 = inlined_call_operand.vmem [shape: f32[8], index: 2, kind: input, shape index: {}]   ;;  %s3043_s3 = inlined_call_operand.vmem [shape: bf16[2,8,14,14], index: 3, kind: output, shape index: {}]  }
   0x1   :  { %10 = vsyncpa [#allocation3 + $0x1], 0 }
   0x2   :  { %11 = vsyncpa [#allocation4], 0 }
   0x3   :  { %12 = vsyncpa [#allocation7], 0  ;;  %s2134_s12 = smov 0   ;;  %s2136_s13 = smov 0  }
   0x4   :  { %s2138_s14 = smov 0   ;;  %s2140_s15 = smov 0  }
   0x5 LB: > { %s2153_s16 = sadd.s32 4294967295, %s2106_s15   ;;  %p38_p0 = scmp.ne.s32.totalorder %s2098_s13, %s2094_s12  ;;  %s2106_s15 = sphi %s2140_s15, %s3050_s15   ;;  %s2102_s14 = sphi %s2138_s14, %s3049_s14   ;;  %s2098_s13 = sphi %s2136_s13, %s3048_s13   ;;  %s2094_s12 = sphi %s2134_s12, %s3047_s12  }
   0x6   : > { %p39_p1 = scmp.eq.s32.totalorder %s2153_s16, 0  ;;  %p1733_p2 = scmp.ge.s32.totalorder %s2106_s15, 1 }
   0x7   : > { %p117_p3 = scmp.lt.s32.totalorder %s2106_s15, 3  ;;  %s128_s20 = sshll.u32 %s3041_s1, 4  ;;  %s129_s20 = int_to_ptr.vmem [resolvable:$true] %s128_s20 }
   0x8   : > { %p2161_p4 = por %p39_p1, %p38_p0  ;;  %s141_s24 = sshll.u32 %s3042_s2, 4  ;;  %s142_s24 = int_to_ptr.vmem [resolvable:$true] %s141_s24 }
   0x9   : > { %p2168_p5 = pnand %p1733_p2, %p117_p3  ;;  %s2108_s25 = smov [#allocation5]  }
   0xa   : > { %s2109_s26 = smov 128   ;;  %s2110_s27 = smov 8  }
   0xb   : > { %p1884_p6 = pneg %p2168_p5  ;;  %s2111_s28 = smov [#allocation6]  }
   0xc   : > { %s2183_s29 = sadd.s32 1, %s2106_s15   ;;  %s25_s30 = sadd.s32 1, %s2102_s14 }
   0xd   : > { %p1885_p7 = pnand %p1884_p6, %p39_p1  ;;  %s22_s4 = ssub.s32 %s2106_s15, %s2183_s29 }
   0xe   : > { %p32_p8 = scmp.ne.s32.totalorder %s2102_s14, %s2098_s13  ;;  %p23_p9 = scmp.eq.s32.totalorder %s22_s4, 0 }
   0xf   : > { %1887 = dma.vmem_to_smem (!%p1885_p7), %s129_s20, 256, %s2108_s25, [#allocation4], %s2109_s26, %s2109_s26, %s2110_s27  }
  0x10   : > { %1890 = dma.vmem_to_smem (!%p1885_p7), %s142_s24, 16, %s2111_s28, [#allocation7]  }
  0x11   : > { %p33_p10 = scmp.eq.s32.totalorder %s2106_s15, 0  ;;  %s152_s5 = sand.u32 1, %s2102_s14  }
  0x12   : > { %s2193_s6 = scalar_select %p23_p9, %s2102_s14, %s25_s30  }
  0x13   : > { %p34_p11 = por %p33_p10, %p32_p8  ;;  %p1897_p12 = scmp.lt.s32.totalorder %s2106_s15, 2 }
  0x14   : > { %s1737_s7 = sshll.u32 %s152_s5, 4  ;;  %s1872_s8 = sshll.u32 %s2106_s15, 4 }
  0x15   : > { %s161_s11 = scalar_lea.hbm %s3040_s0, %s1872_s8  ;;  %s156_s18 = scalar_lea.vmem [#allocation2], %s1737_s7 }
  0x16   : > { %s162_s12 = sshll.u32 %s161_s11, 4  ;;  %s164_s19 = sshll.u32 %s156_s18, 4  ;;  %s163_s12 = int_to_ptr.hbm [resolvable:$true] %s162_s12  ;;  %s165_s19 = int_to_ptr.vmem [resolvable:$true] %s164_s19 }
  0x17   : > { %p2200_p13 = pnand %p1897_p12, %p34_p11  ;;  %s153_s22 = scalar_lea.sflag [#allocation3], %s152_s5 }
  0x18   : > { %s2034_s23 = sshra.s32 %s163_s12, 4  ;;  %s2041_s28 = scalar_lea.hbm %s3040_s0, 32  ;;  %s2035_s23 = int_to_ptr.hbm [resolvable:$true] %s2034_s23 }
  0x19   : > { %s2036_s24 = scalar_lea.hbm %s2035_s23, 16  ;;  %p2038_p2 = pneg %p2200_p13 }
  0x1a   : > { %p2037_p0 = scmp.ne.s32.totalorder %s2035_s23, %s2036_s24  ;;  %p2042_p7 = scmp.lt.s32.totalorder %s2035_s23, %s3040_s0 }
  0x1b   : > { %p2043_p8 = scmp.lt.s32.totalorder %s2041_s28, %s2036_s24 }
  0x1c   : > { %p2039_p3 = pnand %p2038_p2, %p2037_p0 }
  0x1d   : > { %p2044_p9 = por %p2043_p8, %p2042_p7 }
  0x1e   : > { %p2040_p6 = pneg %p2039_p3 }
  0x20   : > { %p2045_p10 = pnand %p2044_p9, %p2040_p6 }
  0x22   : > { %2048 = shalt.err (!%p2045_p10)
}
  0x23   : > { %1894 = dma.hbm_to_vmem [thread:$0]  (!%p2200_p13), %s163_s12, 256, %s165_s19, %s153_s22, %s2109_s26, %s2109_s26, %s2110_s27  }
  0x24   : > { %176 = sbr.rel (%p2168_p5) target bundleno = 461 (0x1cd), region = 32  ;;  %s178_s5 = sand.u32 (!%p2168_p5), 1, %s2098_s13  }
  0x25   : > { %s1741_s7 = sshll.u32 (!%p2168_p5), %s178_s5, 4  ;;  %s179_s8 = scalar_lea.sflag (!%p2168_p5), [#allocation3], %s178_s5 }
  0x26   : > { %s2220_s9 = scalar_lea.vmem (!%p2168_p5), [#allocation2], %s1741_s7 }
  0x29   : > { %2081 = dma.done.wait (%p2161_p4), %s179_s8, 256  }
  0x2a   : > { %2083 = vsyncadd (%p2161_p4), %s179_s8, 4294967040 }
  0x2b   : > { %2085 = dma.done.wait (%p39_p1), [#allocation4], 256  }
  0x2c   : > { %2087 = vsyncadd (%p39_p1), [#allocation4], 4294967040 }
  0x2d   : > { %2089 = dma.done.wait (%p39_p1), [#allocation7], 16  }
  0x2e   : > { %2091 = vsyncadd (%p39_p1), [#allocation7], 4294967280 }
  0x2f   : > { %198 = sfence }
  0x30   : > { %s1747_s21 = sld [smem:[#allocation5 + $0x100]]  ;;  %v2235_v0 = vld [vmem:[%s2220_s9] sm:$0xff]  ;;  %v2238_v1 = vld [vmem:[%s2220_s9 + $0x8] sm:$0xff]  ;;  %s2112_s11 = smov 126   ;;  %vm262_vm0 = vcmask 1046528   ;;  %vm310_vm1 = vcmask 1045504  }
  0x31   : > { %s1746_s26 = sld [smem:[#allocation5 + $0x80]]  ;;  %s2113_s12 = smov 127   ;;  %vm400_vm9 = vcmask 109568   ;;  %vm402_vm11 = vcmask 108544  }
  0x32   : > { %s1749_s27 = sld [smem:[#allocation5 + $0x200]]  ;;  %p217_p1 = scmp.lt.s32.totalorder %s2153_s16, 1 }
  0x33   : > { %s1750_s17 = sld [smem:[#allocation5 + $0x280]] }
  0x34   : > { %s1752_s10 = sld [smem:[#allocation5 + $0x380]]  ;;  %s3052_s16 = smov (!%p217_p1, %s2153_s16), 1 }
  0x35   : > { %s1753_s18 = sld [smem:[#allocation5 + $0x400]] }
  0x36   : > { %v243_v2 = vstv %s1747_s21  ;;  %s1759_s19 = sld [smem:[#allocation5 + $0x81]] }
  0x37   : > { %v244_v3 = vmul.f32 %v243_v2, %v2235_v0  ;;  %v229_v4 = vstv %s1746_s26  ;;  %v245_v11 = vmul.f32 %v243_v2, %v2238_v1  ;;  %s1762_s20 = sld [smem:[#allocation5 + $0x201]] }
  0x38   : > { %v230_v5 = vmul.f32 %v229_v4, %v2235_v0  ;;  %v271_v6 = vstv %s1749_s27  ;;  %v231_v12 = vmul.f32 %v229_v4, %v2238_v1  ;;  %s1760_s22 = sld [smem:[#allocation5 + $0x101]] }
  0x39   : > { %248 = vrot.lane.b32.xlu1 %v244_v3, %s2112_s11  ;;  %v273_v7 = vmul.f32 %v271_v6, %v2238_v1  ;;  %v272_v8 = vmul.f32 %v271_v6, %v2235_v0  ;;  %v288_v10 = vstv %s1750_s17  ;;  %s1763_s23 = sld [smem:[#allocation5 + $0x281]] }
  0x3a   : > { %234 = vrot.lane.b32.xlu0 %v230_v5, %s2113_s12  ;;  %v289_v14 = vmul.f32 %v288_v10, %v2235_v0  ;;  %v290_v15 = vmul.f32 %v288_v10, %v2238_v1  ;;  %v319_v16 = vstv %s1752_s10  ;;  %s1765_s24 = sld [smem:[#allocation5 + $0x381]] }
  0x3b   : > { %v277_v9 = vrot.slane %v273_v7, 1  ;;  %v276_v13 = vrot.slane %v272_v8, 1  ;;  %v320_v18 = vmul.f32 %v319_v16, %v2235_v0  ;;  %v321_v19 = vmul.f32 %v319_v16, %v2238_v1  ;;  %s1766_s15 = sld [smem:[#allocation5 + $0x401]] }
  0x3c   : > { %v294_v20 = vrot.slane %v290_v15, 1  ;;  %v293_v21 = vrot.slane %v289_v14, 1  ;;  %v336_v22 = vstv %s1753_s18  ;;  %v409_v32 = vstv %s1759_s19  ;;  %s1775_s25 = sld [smem:[#allocation5 + $0x82]] }
  0x3d   : > { %281 = vrot.lane.b32.xlu2 %v277_v9, %s2113_s12  ;;  %v278_v17 = vsel %vm262_vm0, %v276_v13, %v277_v9  ;;  %v324_v23 = vrot.slane %v320_v18, 2  ;;  %v325_v24 = vrot.slane %v321_v19, 2  ;;  %v337_v25 = vmul.f32 %v336_v22, %v2235_v0  ;;  %s1778_s28 = sld [smem:[#allocation5 + $0x202]] }
  0x3e   : > { %v338_v26 = vmul.f32 %v336_v22, %v2238_v1  ;;  %v295_v27 = vsel %vm262_vm0, %v293_v21, %v294_v20  ;;  %v450_v33 = vstv %s1762_s20  ;;  %v411_v34 = vmul.f32 %v409_v32, %v2238_v1  ;;  %s1776_s30 = sld [smem:[#allocation5 + $0x102]] }
  0x3f   : > { %v326_v28 = vsel %vm310_vm1, %v324_v23, %v325_v24  ;;  %v341_v29 = vrot.slane %v337_v25, 2  ;;  %v410_v35 = vmul.f32 %v409_v32, %v2235_v0  ;;  %v423_v36 = vstv %s1760_s22  ;;  %s1779_s4 = sld [smem:[#allocation5 + $0x282]] }
  0x40   : > { %v342_v30 = vrot.slane %v338_v26, 2  ;;  %v451_v37 = vmul.f32 %v450_v33, %v2235_v0  ;;  %v452_v38 = vmul.f32 %v450_v33, %v2238_v1  ;;  %v424_v39 = vmul.f32 %v423_v36, %v2235_v0  ;;  %s1781_s5 = sld [smem:[#allocation5 + $0x382]] }
  0x41   : > { %250 = vrot.lane.b32.xlu1 %v245_v11, %s2112_s11  ;;  %v467_v42 = vstv %s1763_s23  ;;  %v425_v44 = vmul.f32 %v423_v36, %v2238_v1  ;;  %v497_v47 = vstv %s1765_s24  ;;  %v514_v52 = vstv %s1766_s15  ;;  %s1782_s7 = sld [smem:[#allocation5 + $0x402]] }
  0x42   : > { %236 = vrot.lane.b32.xlu0 %v231_v12, %s2113_s12  ;;  %v343_v31 = vsel %vm310_vm1, %v341_v29, %v342_v30  ;;  %v455_v40 = vrot.slane %v451_v37, 1  ;;  %v456_v41 = vrot.slane %v452_v38, 1  ;;  %v468_v45 = vmul.f32 %v467_v42, %v2235_v0  ;;  %s1791_s8 = sld [smem:[#allocation5 + $0x83]] }
  0x43   : > { %v469_v46 = vmul.f32 %v467_v42, %v2238_v1  ;;  %v498_v48 = vmul.f32 %v497_v47, %v2235_v0  ;;  %v499_v49 = vmul.f32 %v497_v47, %v2238_v1  ;;  %v515_v55 = vmul.f32 %v514_v52, %v2235_v0  ;;  %s1794_s21 = sld [smem:[#allocation5 + $0x203]] }
  0x44   : > { %v457_v43 = vsel %vm262_vm0, %v455_v40, %v456_v41  ;;  %v472_v51 = vrot.slane %v468_v45, 1  ;;  %v516_v56 = vmul.f32 %v514_v52, %v2238_v1  ;;  %v586_v62 = vstv %s1775_s25  ;;  %s1792_s26 = sld [smem:[#allocation5 + $0x103]] }
  0x45   : > { %279 = vrot.lane.b32.xlu2 %v278_v17, %s2113_s12  ;;  %v473_v50 = vrot.slane %v469_v46, 1  ;;  %v502_v53 = vrot.slane %v498_v48, 2  ;;  %v503_v54 = vrot.slane %v499_v49, 2  ;;  %v519_v59 = vrot.slane %v515_v55, 2  ;;  %s1795_s27 = sld [smem:[#allocation5 + $0x283]] }
  0x46   : > { %v520_v60 = vrot.slane %v516_v56, 2  ;;  %v627_v63 = vstv %s1778_s28  ;;  %v588_v2 = vmul.f32 %v586_v62, %v2238_v1  ;;  %v587_v3 = vmul.f32 %v586_v62, %v2235_v0  ;;  %s1797_s17 = sld [smem:[#allocation5 + $0x383]] }
  0x47   : > { %v474_v57 = vsel %vm262_vm0, %v472_v51, %v473_v50  ;;  %v504_v58 = vsel %vm310_vm1, %v502_v53, %v503_v54  ;;  %v600_v4 = vstv %s1776_s30  ;;  %v628_v5 = vmul.f32 %v627_v63, %v2235_v0  ;;  %s1798_s10 = sld [smem:[#allocation5 + $0x403]] }
  0x48   : > { %v521_v61 = vsel %vm310_vm1, %v519_v59, %v520_v60  ;;  %v629_v6 = vmul.f32 %v627_v63, %v2238_v1  ;;  %v601_v7 = vmul.f32 %v600_v4, %v2235_v0  ;;  %v644_v10 = vstv %s1779_s4  ;;  %s2340_s18 = sld [smem:[#allocation5]] }
  0x49   : > { %298 = vrot.lane.b32.xlu1 %v294_v20, %s2112_s11  ;;  %v632_v8 = vrot.slane %v628_v5, 1  ;;  %v602_v12 = vmul.f32 %v600_v4, %v2238_v1  ;;  %v645_v13 = vmul.f32 %v644_v10, %v2235_v0  ;;  %v646_v14 = vmul.f32 %v644_v10, %v2238_v1  ;;  %s1748_s19 = sld [smem:[#allocation5 + $0x180]] }
  0x4a   : > { %296 = vrot.lane.b32.xlu0 %v295_v27, %s2112_s11  ;;  %v633_v9 = vrot.slane %v629_v6, 1  ;;  %v674_v15 = vstv %s1781_s5  ;;  %v691_v20 = vstv %s1782_s7  ;;  %s1751_s20 = sld [smem:[#allocation5 + $0x300]] }
  0x4b   : > { %v675_v16 = vmul.f32 %v674_v15, %v2235_v0  ;;  %v676_v17 = vmul.f32 %v674_v15, %v2238_v1  ;;  %v650_v18 = vrot.slane %v646_v14, 1  ;;  %v649_v19 = vrot.slane %v645_v13, 1  ;;  %s1807_s22 = sld [smem:[#allocation5 + $0x84]] }
  0x4c   : > { %v634_v11 = vsel %vm262_vm0, %v632_v8, %v633_v9  ;;  %v692_v23 = vmul.f32 %v691_v20, %v2235_v0  ;;  %v851_v47 = vstv %s1797_s17  ;;  %s1810_s23 = sld [smem:[#allocation5 + $0x204]] }
  0x4d   : > { %327 = vrot.lane.b32.xlu2 %v326_v28, %s2113_s12  ;;  %v679_v21 = vrot.slane %v675_v16, 2  ;;  %v680_v22 = vrot.slane %v676_v17, 2  ;;  %v651_v25 = vsel %vm262_vm0, %v649_v19, %v650_v18  ;;  %v852_v48 = vmul.f32 %v851_v47, %v2235_v0  ;;  %s2361_s24 = sld [smem:[#allocation5 + $0x104]] }
  0x4e   : > { %v696_v27 = vrot.slane %v692_v23, 2  ;;  %v853_v49 = vmul.f32 %v851_v47, %v2238_v1  ;;  %v868_v52 = vstv %s1798_s10  ;;  %v225_v59 = vstv %s2340_s18  ;;  %s2371_s15 = sld [smem:[#allocation5 + $0x284]] }
  0x4f   : > { %v681_v26 = vsel %vm310_vm1, %v679_v21, %v680_v22  ;;  %v856_v53 = vrot.slane %v852_v48, 2  ;;  %v869_v55 = vmul.f32 %v868_v52, %v2235_v0  ;;  %v870_v56 = vmul.f32 %v868_v52, %v2238_v1  ;;  %s2379_s25 = sld [smem:[#allocation5 + $0x384]] }
  0x50   : > { %v305_v13 = vstv %s1751_s20  ;;  %s2386_s28 = sld [smem:[#allocation6]] }
  0x51   : > { %344 = vrot.lane.b32.xlu1 %v343_v31, %s2112_s11  ;;  %v804_v31 = vstv %s1794_s21  ;;  %v873_v62 = vrot.slane %v869_v55, 2  ;;  %v874_v63 = vrot.slane %v870_v56, 2  ;;  %v940_v14 = vstv %s1807_s22  ;;  %s2390_s30 = sld [smem:[#allocation5 + $0x404]]  ;;  %s1873_s22 = sshll.u32 %s3052_s16, 6 }
  0x52   : > { %329 = vrot.lane.b32.xlu0 %v325_v24, %s2113_s12  ;;  %v693_v24 = vmul.f32 %v691_v20, %v2238_v1  ;;  %v806_v36 = vmul.f32 %v804_v31, %v2238_v1  ;;  %v981_v17 = vstv %s1810_s23  ;;  %v306_v20 = vmul.f32 %v305_v13, %v2235_v0  ;;  %s2402_s4 = sld [smem:[#allocation5 + $0x181]] }
  0x53   : > { %v307_v21 = vmul.f32 %v305_v13, %v2238_v1  ;;  %v942_v23 = vmul.f32 %v940_v14, %v2238_v1  ;;  %s2406_s5 = sld [smem:[#allocation5 + $0x1]] }
  0x54   : > { %v697_v28 = vrot.slane %v693_v24, 2  ;;  %v810_v40 = vrot.slane %v806_v36, 1  ;;  %v941_v24 = vmul.f32 %v940_v14, %v2235_v0  ;;  %s2424_s7 = sld [smem:[#allocation5 + $0x85]] }
  0x55   : > { %346 = vrot.lane.b32.xlu2 %v342_v30, %s2112_s11  ;;  %v763_v30 = vstv %s1791_s8  ;;  %v1028_v48 = vstv %s2379_s25  ;;  %s2430_s8 = sld [smem:[#allocation5 + $0x301]] }
  0x56   : > { %v698_v29 = vsel %vm310_vm1, %v696_v27, %v697_v28  ;;  %v765_v32 = vmul.f32 %v763_v30, %v2238_v1  ;;  %v764_v33 = vmul.f32 %v763_v30, %v2235_v0  ;;  %v983_v27 = vmul.f32 %v981_v17, %v2238_v1  ;;  %s2437_s21 = sld [smem:[#allocation5 + $0x205]] }
  0x57   : > { %v1029_v52 = vmul.f32 %v1028_v48, %v2235_v0  ;;  %v1030_v55 = vmul.f32 %v1028_v48, %v2238_v1  ;;  %s2479_s17 = sld [smem:[#allocation6 + $0x1]] }
  0x58   : > { %v987_v36 = vrot.slane %v983_v27, 1  ;;  %s2492_s10 = sld [smem:[#allocation5 + $0x87]] }
  0x59   : > { %416 = vrot.lane.b32.xlu1 %v411_v34, %s2113_s12  ;;  %v777_v34 = vstv %s1792_s26  ;;  %v405_v14 = vstv %s2406_s5  ;;  %s2441_s26 = sld [smem:[#allocation5 + $0x105]] }
  0x5a   : > { %414 = vrot.lane.b32.xlu0 %v410_v35, %s2113_s12  ;;  %v805_v35 = vmul.f32 %v804_v31, %v2235_v0  ;;  %v778_v38 = vmul.f32 %v777_v34, %v2235_v0  ;;  %v311_v31 = vrot.slane %v306_v20, 2  ;;  %s2503_s18 = sld [smem:[#allocation5 + $0x182]] }
  0x5b   : > { %s2514_s20 = sld [smem:[#allocation5 + $0x106]] }
  0x5c   : > { %s2527_s16 = sld [smem:[#allocation5 + $0x206]] }
  0x5d   : > { %428 = vrot.lane.b32.xlu2 %v424_v39, %s2112_s11  ;;  %v809_v39 = vrot.slane %v805_v35, 1  ;;  %s2537_s25 = sld [smem:[#allocation5 + $0x107]] }
  0x5e   : > { %s2575_s5 = sld [smem:[#allocation5 + $0x286]] }
  0x5f   : > { %v811_v42 = vsel %vm262_vm0, %v809_v39, %v810_v40  ;;  %s2793_s23 = sld [smem:[#allocation5 + $0x184]] }
  0x61   : > { %458 = vrot.lane.b32.xlu1 %v457_v43, %s2113_s12  ;;  %v779_v43 = vmul.f32 %v777_v34, %v2238_v1 }
  0x62   : > { %430 = vrot.lane.b32.xlu0 %v425_v44, %s2112_s11 }
  0x65   : > { %460 = vrot.lane.b32.xlu2 %v456_v41, %s2113_s12  ;;  %v821_v41 = vstv %s1795_s27  ;;  %s2471_s27 = sld [smem:[#allocation5 + $0x86]] }
  0x66   : > { %v822_v45 = vmul.f32 %v821_v41, %v2235_v0  ;;  %v823_v46 = vmul.f32 %v821_v41, %v2238_v1 }
  0x68   : > { %v826_v51 = vrot.slane %v822_v45, 1 }
  0x69   : > { %477 = vrot.lane.b32.xlu1 %v473_v50, %s2112_s11  ;;  %v827_v50 = vrot.slane %v823_v46, 1 }
  0x6a   : > { %475 = vrot.lane.b32.xlu0 %v474_v57, %s2112_s11 }
  0x6d   : > { %505 = vrot.lane.b32.xlu2 %v504_v58, %s2113_s12  ;;  %v828_v58 = vsel %vm262_vm0, %v826_v51, %v827_v50 }
  0x71   : > { %522 = vrot.lane.b32.xlu1 %v521_v61, %s2112_s11 }
  0x72   : > { %507 = vrot.lane.b32.xlu0 %v503_v54, %s2113_s12  ;;  %v857_v54 = vrot.slane %v853_v49, 2 }
  0x74   : > { %v858_v61 = vsel %vm310_vm1, %v856_v53, %v857_v54  ;;  %v353_v53 = vstv %s2386_s28  ;;  %s2541_s28 = sld [smem:[#allocation5 + $0x302]] }
  0x75   : > { %524 = vrot.lane.b32.xlu2 %v520_v60, %s2112_s11  ;;  %v257_v60 = vstv %s1748_s19  ;;  %s2509_s19 = sld [smem:[#allocation5 + $0x2]] }
  0x76   : > { %v258_v5 = vmul.f32 %v257_v60, %v2235_v0  ;;  %v259_v6 = vmul.f32 %v257_v60, %v2238_v1 }
  0x78   : > { %v263_v10 = vrot.slane %v258_v5, 1  ;;  %v1034_v5 = vrot.slane %v1030_v55, 2 }
  0x79   : > { %593 = vrot.lane.b32.xlu1 %v588_v2, %s2113_s12 }
  0x7a   : > { %591 = vrot.lane.b32.xlu0 %v587_v3, %s2113_s12  ;;  %v226_v3 = vmul.f32 %v225_v59, %v2235_v0 }
  0x7d   : > { %605 = vrot.lane.b32.xlu2 %v601_v7, %s2112_s11  ;;  %v875_v7 = vsel %vm310_vm1, %v873_v62, %v874_v63 }
  0x81   : > { %635 = vrot.lane.b32.xlu1 %v634_v11, %s2113_s12  ;;  %v264_v11 = vrot.slane %v259_v6, 1 }
  0x82   : > { %607 = vrot.lane.b32.xlu0 %v602_v12, %s2112_s11  ;;  %v227_v12 = vmul.f32 %v225_v59, %v2238_v1 }
  0x83   : > { %v265_v19 = vsel %vm262_vm0, %v263_v10, %v264_v11 }
  0x85   : > { %637 = vrot.lane.b32.xlu2 %v633_v9, %s2113_s12 }
  0x89   : > { %654 = vrot.lane.b32.xlu1 %v650_v18, %s2112_s11 }
  0x8a   : > { %652 = vrot.lane.b32.xlu0 %v651_v25, %s2112_s11  ;;  %v954_v25 = vstv %s2361_s24  ;;  %s2845_s24 = sld [smem:[#allocation6 + $0x4]] }
  0x8b   : > { %v956_v47 = vmul.f32 %v954_v25, %v2238_v1 }
  0x8d   : > { %682 = vrot.lane.b32.xlu2 %v681_v26, %s2113_s12  ;;  %v982_v26 = vmul.f32 %v981_v17, %v2235_v0 }
  0x8f   : > { %v986_v35 = vrot.slane %v982_v26, 1 }
  0x91   : > { %699 = vrot.lane.b32.xlu1 %v698_v29, %s2112_s11  ;;  %v988_v46 = vsel %vm262_vm0, %v986_v35, %v987_v36 }
  0x92   : > { %684 = vrot.lane.b32.xlu0 %v680_v22, %s2113_s12 }
  0x95   : > { %701 = vrot.lane.b32.xlu2 %v697_v28, %s2112_s11 }
  0x97   : > { %v2328_v37 = vpop.permute.xlu2 %281 }
  0x99   : > { %770 = vrot.lane.b32.xlu1 %v765_v32, %s2113_s12  ;;  %v312_v32 = vrot.slane %v307_v21, 2 }
  0x9a   : > { %768 = vrot.lane.b32.xlu0 %v764_v33, %s2113_s12  ;;  %v955_v33 = vmul.f32 %v954_v25, %v2235_v0 }
  0x9b   : > { %v313_v41 = vsel %vm310_vm1, %v311_v31, %v312_v32 }
  0x9d   : > { %782 = vrot.lane.b32.xlu2 %v778_v38, %s2112_s11 }
  0x9f   : > { %v2336_v44 = vpop.permute.xlu2 %279 }
  0xa1   : > { %812 = vrot.lane.b32.xlu1 %v811_v42, %s2113_s12 }
  0xa2   : > { %784 = vrot.lane.b32.xlu0 %v779_v43, %s2112_s11  ;;  %v998_v43 = vstv %s2371_s15  ;;  %s2532_s15 = scalar_lea.vmem %s3043_s3, %s1873_s22  ;;  %s2753_s22 = sld [smem:[#allocation5 + $0x407]] }
  0xa3   : > { %v1000_v51 = vmul.f32 %v998_v43, %v2238_v1 }
  0xa5   : > { %814 = vrot.lane.b32.xlu2 %v810_v40, %s2113_s12  ;;  %v1004_v59 = vrot.slane %v1000_v51, 1 }
  0xa7   : > { %v2349_v57 = vpop.permute.xlu2 %327 }
  0xa9   : > { %831 = vrot.lane.b32.xlu1 %v827_v50, %s2112_s11 }
  0xaa   : > { %829 = vrot.lane.b32.xlu0 %v828_v58, %s2112_s11 }
  0xab   : > { %v249_v2 = vpop.permute.xlu1 %248 }
  0xac   : > { %v235_v4 = vpop.permute.xlu0 %234 }
  0xad   : > { %859 = vrot.lane.b32.xlu2 %v858_v61, %s2113_s12  ;;  %v240_v8 = vadd.f32 %v235_v4, %v226_v3  ;;  %v1045_v61 = vstv %s2390_s30  ;;  %v1033_v3 = vrot.slane %v1029_v52, 2  ;;  %s2548_s30 = sld [smem:[#allocation5 + $0x207]] }
  0xae   : > { %v1047_v6 = vmul.f32 %v1045_v61, %v2238_v1 }
  0xaf   : > { %v2363_v9 = vpop.permute.xlu2 %346  ;;  %v254_v15 = vadd.f32 %v249_v2, %v240_v8 }
  0xb0   : > { %v1051_v17 = vrot.slane %v1047_v6, 2 }
  0xb1   : > { %876 = vrot.lane.b32.xlu1 %v875_v7, %s2112_s11  ;;  %v268_v30 = vadd.f32 %v265_v19, %v254_v15 }
  0xb2   : > { %861 = vrot.lane.b32.xlu0 %v857_v54, %s2113_s12 }
  0xb3   : > { %v251_v16 = vpop.permute.xlu1 %250  ;;  %v285_v40 = vadd.f32 %v2336_v44, %v268_v30  ;;  %v999_v44 = vmul.f32 %v998_v43, %v2235_v0  ;;  %v407_v30 = vmul.f32 %v405_v14, %v2238_v1 }
  0xb4   : > { %v237_v18 = vpop.permute.xlu0 %236 }
  0xb5   : > { %878 = vrot.lane.b32.xlu2 %v874_v63, %s2112_s11  ;;  %v241_v22 = vadd.f32 %v237_v18, %v227_v12  ;;  %v1003_v60 = vrot.slane %v999_v44, 1  ;;  %v437_v12 = vstv %s2402_s4  ;;  %s2567_s4 = sld [smem:[#allocation5 + $0x285]] }
  0xb6   : > { %v438_v20 = vmul.f32 %v437_v12, %v2235_v0  ;;  %v439_v21 = vmul.f32 %v437_v12, %v2238_v1 }
  0xb7   : > { %v255_v28 = vadd.f32 %v251_v16, %v241_v22  ;;  %v2381_v29 = vpop.permute.xlu2 %428  ;;  %v1005_v10 = vsel %vm262_vm0, %v1003_v60, %v1004_v59 }
  0xb8   : > { %v442_v27 = vrot.slane %v438_v20, 1 }
  0xb9   : > { %947 = vrot.lane.b32.xlu1 %v942_v23, %s2113_s12  ;;  %v269_v34 = vadd.f32 %v264_v11, %v255_v28  ;;  %v443_v28 = vrot.slane %v439_v21, 1  ;;  %v531_v21 = vstv %s2479_s17  ;;  %s2679_s17 = sld [smem:[#allocation5 + $0x303]] }
  0xba   : > { %945 = vrot.lane.b32.xlu0 %v941_v24, %s2113_s12  ;;  %v406_v24 = vmul.f32 %v405_v14, %v2235_v0 }
  0xbb   : > { %v299_v38 = vpop.permute.xlu1 %298  ;;  %v286_v39 = vadd.f32 %v2328_v37, %v269_v34 }
  0xbc   : > { %v297_v42 = vpop.permute.xlu0 %296 }
  0xbd   : > { %959 = vrot.lane.b32.xlu2 %v955_v33, %s2112_s11  ;;  %v302_v45 = vadd.f32 %v297_v42, %v285_v40  ;;  %v303_v49 = vadd.f32 %v299_v38, %v286_v39  ;;  %v484_v33 = vstv %s2430_s8  ;;  %v1158_v39 = vstv %s2437_s21  ;;  %s2611_s8 = sld [smem:[#allocation5 + $0x287]] }
  0xbe   : > { %v485_v43 = vmul.f32 %v484_v33, %v2235_v0  ;;  %v1159_v51 = vmul.f32 %v1158_v39, %v2235_v0  ;;  %v2469_v52 = vmul.f32 %v1158_v39, %v2238_v1  ;;  %s2644_s21 = sld [smem:[#allocation5 + $0x3]] }
  0xbf   : > { %v316_v50 = vadd.f32 %v313_v41, %v302_v45  ;;  %v2398_v37 = vpop.permute.xlu2 %460  ;;  %v317_v58 = vadd.f32 %v312_v32, %v303_v49  ;;  %v1117_v32 = vstv %s2424_s7  ;;  %v2458_v45 = vmul.f32 %v484_v33, %v2238_v1  ;;  %s2601_s7 = sld [smem:[#allocation6 + $0x2]] }
  0xc0   : > { %v1119_v42 = vmul.f32 %v1117_v32, %v2238_v1  ;;  %v1118_v48 = vmul.f32 %v1117_v32, %v2235_v0  ;;  %v1131_v49 = vstv %s2441_s26  ;;  %v1164_v60 = vrot.slane %v2469_v52, 1  ;;  %s2650_s26 = sld [smem:[#allocation5 + $0x183]] }
  0xc1   : > { %989 = vrot.lane.b32.xlu1 %v988_v46, %s2113_s12  ;;  %v333_v54 = vadd.f32 %v2349_v57, %v316_v50  ;;  %v1046_v57 = vmul.f32 %v1045_v61, %v2235_v0 }
  0xc2   : > { %961 = vrot.lane.b32.xlu0 %v956_v47, %s2112_s11 }
  0xc3   : > { %v345_v56 = vpop.permute.xlu1 %344  ;;  %v1050_v16 = vrot.slane %v1046_v57, 2 }
  0xc4   : > { %v350_v62 = vadd.f32 %v345_v56, %v333_v54  ;;  %v330_v63 = vpop.permute.xlu0 %329  ;;  %v490_v54 = vrot.slane %v2458_v45, 2 }
  0xc5   : > { %991 = vrot.lane.b32.xlu2 %v987_v36, %s2113_s12  ;;  %v334_v2 = vadd.f32 %v330_v63, %v317_v58  ;;  %v1052_v25 = vsel %vm310_vm1, %v1050_v16, %v1051_v17  ;;  %v444_v36 = vsel %vm262_vm0, %v442_v27, %v443_v28  ;;  %v1132_v58 = vmul.f32 %v1131_v49, %v2235_v0 }
  0xc6   : > { %v2414_v4 = vadd.f32 %v353_v53, %v350_v62 }
  0xc7   : > { %v351_v7 = vadd.f32 %v2363_v9, %v334_v2  ;;  %v2419_v8 = vpop.permute.xlu2 %505  ;;  %v1035_v9 = vsel %vm310_vm1, %v1033_v3, %v1034_v5 }
  0xc8   : > { %v1754_v11 = vadd.f32 -1.0, %v2414_v4 }
  0xc9   : > { %v2426_v13 = vadd.f32 %v353_v53, %v351_v7  ;;  %1008 = vrot.lane.b32.xlu1 %v1004_v59, %s2112_s11  ;;  %v1163_v59 = vrot.slane %v1159_v51, 1  ;;  %v1133_v7 = vmul.f32 %v1131_v49, %v2238_v1 }
  0xca   : > { %v1756_v15 = vmul.f32 -1.442695, %v1754_v11  ;;  %1006 = vrot.lane.b32.xlu0 %v1005_v10, %s2112_s11 }
  0xcb   : > { %v1755_v18 = vadd.f32 -1.0, %v2426_v13  ;;  %v417_v19 = vpop.permute.xlu1 %416  ;;  %v1165_v14 = vsel %vm262_vm0, %v1163_v59, %v1164_v60 }
  0xcc   : > { %1938 = vpow2.f32 %v1756_v15  ;;  %v415_v22 = vpop.permute.xlu0 %414  ;;  %v421_v40 = vadd.f32 %v417_v19, %v407_v30  ;;  %v1294_v15 = vstv %s2471_s27  ;;  %s2661_s27 = sld [smem:[#allocation5 + $0x385]] }
  0xcd   : > { %v1757_v23 = vmul.f32 -1.442695, %v1755_v18  ;;  %1036 = vrot.lane.b32.xlu2 %v1035_v9, %s2113_s12  ;;  %v420_v31 = vadd.f32 %v415_v22, %v406_v24  ;;  %v1296_v22 = vmul.f32 %v1294_v15, %v2238_v1 }
  0xcf   : > { %1940 = vpow2.f32 %v1757_v23  ;;  %v2444_v26 = vpop.permute.xlu2 %524  ;;  %v434_v47 = vadd.f32 %v2381_v29, %v420_v31  ;;  %v489_v29 = vrot.slane %v485_v43, 2  ;;  %v1471_v43 = vstv %s2492_s10  ;;  %s2687_s10 = sld [smem:[#allocation5 + $0x387]] }
  0xd1   : > { %1053 = vrot.lane.b32.xlu1 %v1052_v25, %s2112_s11  ;;  %v447_v55 = vadd.f32 %v444_v36, %v434_v47  ;;  %v491_v3 = vsel %vm310_vm1, %v489_v29, %v490_v54  ;;  %v1295_v36 = vmul.f32 %v1294_v15, %v2235_v0  ;;  %v582_v29 = vstv %s2509_s19  ;;  %s2716_s19 = sld [smem:[#allocation5 + $0x406]] }
  0xd2   : > { %v1939_v34 = vpop.eup %1938  ;;  %1038 = vrot.lane.b32.xlu0 %v1034_v5, %s2113_s12  ;;  %v1512_v15 = vstv %s2548_s30  ;;  %s1841_s30 = sld [smem:[#allocation5 + $0x186]] }
  0xd3   : > { %v2451_v35 = vadd.f32 1.0, %v1939_v34  ;;  %v459_v38 = vpop.permute.xlu1 %458 }
  0xd4   : > { %v431_v41 = vpop.permute.xlu0 %430  ;;  %v464_v62 = vadd.f32 %v459_v38, %v447_v55 }
  0xd5   : > { %v1941_v46 = vpop.eup %1940  ;;  %1942 = vrcp.f32 %v2451_v35  ;;  %1055 = vrot.lane.b32.xlu2 %v1051_v17, %s2112_s11  ;;  %v435_v44 = vadd.f32 %v431_v41, %v421_v40  ;;  %v377_v12 = vand.u32 2147483648, %v2451_v35  ;;  %v375_v19 = vand.u32 2147483647, %v2451_v35 }
  0xd6   : > { %v2465_v50 = vadd.f32 1.0, %v1941_v46  ;;  %vm371_vm3 = vweird.f32 %v2451_v35 }
  0xd7   : > { %v2473_v53 = vpop.permute.xlu2 %605  ;;  %v448_v56 = vadd.f32 %v443_v28, %v435_v44  ;;  %v378_v24 = vor.u32 1.1754944e-38, %v377_v12  ;;  %vm376_vm6 = vcmp.eq.f32.partialorder %v375_v19, 8.507059e+37 }
  0xd8   : > { %1944 = vrcp.f32 %v2465_v50  ;;  %v392_v25 = vand.u32 2147483648, %v2465_v50  ;;  %v390_v30 = vand.u32 2147483647, %v2465_v50  ;;  %vm386_vm7 = vweird.f32 %v2465_v50 }
  0xd9   : > { %1124 = vrot.lane.b32.xlu1 %v1119_v42, %s2113_s12  ;;  %v465_v57 = vadd.f32 %v2398_v37, %v448_v56 }
  0xda   : > { %1122 = vrot.lane.b32.xlu0 %v1118_v48, %s2113_s12  ;;  %v393_v41 = vor.u32 1.1754944e-38, %v392_v25  ;;  %vm391_vm10 = vcmp.eq.f32.partialorder %v390_v30, 8.507059e+37 }
  0xdb   : > { %v1943_v61 = vpop.eup %1942  ;;  %v478_v63 = vpop.permute.xlu1 %477 }
  0xdc   : > { %v367_v2 = vmul.f32 %v1943_v61, %v2451_v35  ;;  %v476_v5 = vpop.permute.xlu0 %475  ;;  %v482_v16 = vadd.f32 %v478_v63, %v465_v57  ;;  %vm372_vm2 = vweird.f32 %v1943_v61 }
  0xdd   : > { %1136 = vrot.lane.b32.xlu2 %v1132_v58, %s2112_s11  ;;  %v481_v6 = vadd.f32 %v476_v5, %v464_v62  ;;  %vm373_vm4 = vmor %vm371_vm3, %vm372_vm2  ;;  %v583_v62 = vmul.f32 %v582_v29, %v2235_v0 }
  0xde   : > { %v1945_v10 = vpop.eup %1944  ;;  %v368_v11 = vsub.f32 1.0, %v367_v2  ;;  %v495_v32 = vadd.f32 %v490_v54, %v482_v16  ;;  %v1308_v54 = vstv %s2514_s20  ;;  %v1473_v2 = vmul.f32 %v1471_v43, %v2238_v1  ;;  %s2742_s20 = sld [smem:[#allocation6 + $0x3]] }
  0xdf   : > { %v382_v9 = vmul.f32 %v1945_v10, %v2465_v50  ;;  %v494_v37 = vadd.f32 %v491_v3, %v481_v6  ;;  %v2500_v17 = vpop.permute.xlu2 %637  ;;  %vm387_vm5 = vweird.f32 %v1945_v10  ;;  %v614_v50 = vstv %s2503_s18  ;;  %s2710_s18 = sld [smem:[#allocation5 + $0x405]] }
  0xe0   : > { %v369_v18 = vmul.f32 %v1943_v61, %v368_v11  ;;  %vm388_vm8 = vmor %vm386_vm7, %vm387_vm5  ;;  %v615_v58 = vmul.f32 %v614_v50, %v2235_v0  ;;  %v616_v59 = vmul.f32 %v614_v50, %v2238_v1  ;;  %v1309_v63 = vmul.f32 %v1308_v54, %v2235_v0 }
  0xe1   : > { %v383_v20 = vsub.f32 1.0, %v382_v9  ;;  %1166 = vrot.lane.b32.xlu1 %v1165_v14, %s2113_s12  ;;  %v511_v27 = vadd.f32 %v2419_v8, %v494_v37  ;;  %v1335_v6 = vstv %s2527_s16  ;;  %v1310_v12 = vmul.f32 %v1308_v54, %v2238_v1  ;;  %s2786_s16 = sld [smem:[#allocation5 + $0x4]] }
  0xe2   : > { %v370_v23 = vadd.f32 %v1943_v61, %v369_v18  ;;  %1138 = vrot.lane.b32.xlu0 %v1133_v7, %s2112_s11  ;;  %v619_v5 = vrot.slane %v615_v58, 1  ;;  %v620_v57 = vrot.slane %v616_v59, 1  ;;  %v584_v7 = vmul.f32 %v582_v29, %v2238_v1  ;;  %v2630_v58 = vld [vmem:[%s2220_s9 + $0x8] sm:$0xff] }
  0xe3   : > { %v384_v28 = vmul.f32 %v1945_v10, %v383_v20  ;;  %v523_v31 = vpop.permute.xlu1 %522  ;;  %v661_v14 = vstv %s2541_s28  ;;  %v1336_v16 = vmul.f32 %v1335_v6, %v2235_v0  ;;  %v2580_v37 = vmul.f32 %v1335_v6, %v2238_v1  ;;  %s2893_s28 = sld [smem:[#allocation5 + $0x6]] }
  0xe4   : > { %v374_v33 = vsel %vm373_vm4, %v1943_v61, %v370_v23  ;;  %v528_v34 = vadd.f32 %v523_v31, %v511_v27  ;;  %v508_v35 = vpop.permute.xlu0 %507  ;;  %v621_v19 = vsel %vm262_vm0, %v619_v5, %v620_v57  ;;  %v2588_v25 = vmul.f32 %v661_v14, %v2238_v1 }
  0xe5   : > { %v379_v38 = vsel %vm376_vm6, %v378_v24, %v374_v33  ;;  %v385_v8 = vadd.f32 %v1945_v10, %v384_v28  ;;  %1168 = vrot.lane.b32.xlu2 %v1164_v60, %s2113_s12  ;;  %v512_v39 = vadd.f32 %v508_v35, %v495_v32  ;;  %v662_v24 = vmul.f32 %v661_v14, %v2235_v0 }
  0xe6   : > { %v396_v40 = vmul.f32 %v379_v38, %v2414_v4  ;;  %v2524_v42 = vadd.f32 %v531_v21, %v528_v34  ;;  %v1513_v27 = vmul.f32 %v1512_v15, %v2235_v0  ;;  %v2596_v32 = vmul.f32 %v1512_v15, %v2238_v1 }
  0xe7   : > { %v389_v45 = vsel %vm388_vm8, %v1945_v10, %v385_v8  ;;  %v529_v4 = vadd.f32 %v2444_v26, %v512_v39  ;;  %v2535_v46 = vpop.permute.xlu2 %682  ;;  %v1472_v26 = vmul.f32 %v1471_v43, %v2235_v0  ;;  %v1485_v10 = vstv %s2537_s25  ;;  %s2847_s25 = sld [smem:[#allocation5 + $0x185]] }
  0xe8   : > { %v398_v47 = vpack.c.bf16 %v396_v40, %v396_v40  ;;  %v394_v48 = vsel %vm391_vm10, %v393_v41, %v389_v45  ;;  %v1768_v49 = vadd.f32 -1.0, %v2524_v42  ;;  %v1486_v31 = vmul.f32 %v1485_v10, %v2235_v0 }
  0xe9   : > { %v397_v44 = vmul.f32 %v394_v48, %v2426_v13  ;;  %v2544_v51 = vadd.f32 %v531_v21, %v529_v4  ;;  %1301 = vrot.lane.b32.xlu1 %v1296_v22, %s2113_s12  ;;  %v1487_v21 = vmul.f32 %v1485_v10, %v2238_v1  ;;  %v1340_v35 = vrot.slane %v1336_v16, 1 }
  0xea   : > { %401 = vst.msk [vmem:[%s2532_s15] sm:$0xf] %vm400_vm9, %v398_v47  ;;  %v1770_v52 = vmul.f32 -1.442695, %v1768_v49  ;;  %1299 = vrot.lane.b32.xlu0 %v1295_v36, %s2113_s12  ;;  %v1341_v36 = vrot.slane %v2580_v37, 1  ;;  %v1175_v8 = vstv %s2567_s4  ;;  %v667_v39 = vrot.slane %v2588_v25, 2 }
  0xeb   : > { %v399_v55 = vpack.c.bf16 %v397_v44, %v397_v44  ;;  %v1769_v13 = vadd.f32 -1.0, %v2544_v51  ;;  %v594_v56 = vpop.permute.xlu1 %593  ;;  %v1517_v40 = vrot.slane %v1513_v27, 1  ;;  %v1518_v45 = vrot.slane %v2596_v32, 1  ;;  %v2658_v27 = vld [vmem:[%s2220_s9] sm:$0xff]  ;;  %s2676_s9 = sld [smem:[#allocation5 + $0x386]] }
  0xec   : > { %1946 = vpow2.f32 %v1770_v52  ;;  %v592_v60 = vpop.permute.xlu0 %591  ;;  %v598_v22 = vadd.f32 %v594_v56, %v584_v7  ;;  %v1352_v4 = vstv %s2575_s5  ;;  %v1342_v47 = vsel %vm262_vm0, %v1340_v35, %v1341_v36  ;;  %s2900_s4 = sld [smem:[#allocation5 + $0x7]] }
  0xed   : > { %403 = vst.msk [vmem:[%s2532_s15 + $0x4] sm:$0x7] %vm402_vm11, %v399_v55  ;;  %v1771_v61 = vmul.f32 -1.442695, %v1769_v13  ;;  %1476 = vrot.lane.b32.xlu2 %v1472_v26, %s2113_s12  ;;  %v597_v11 = vadd.f32 %v592_v60, %v583_v62  ;;  %v2616_v48 = vmul.f32 %v1175_v8, %v2238_v1  ;;  %v2619_v26 = vmul.f32 %v1175_v8, %v2235_v0  ;;  %s2907_s5 = sld [smem:[#allocation5 + $0x187]] }
  0xee   : > { %v2624_v55 = vmul.f32 %v1352_v4, %v2235_v0  ;;  %v1519_v56 = vsel %vm262_vm0, %v1517_v40, %v1518_v45  ;;  %v2633_v59 = vmul.f32 %v2630_v58, %v1352_v4  ;;  %v1529_v15 = vstv %s2611_s8  ;;  %s2933_s8 = sld [smem:[#allocation5 + $0x307]] }
  0xef   : > { %1948 = vpow2.f32 %v1771_v61  ;;  %v2564_v3 = vpop.permute.xlu2 %701  ;;  %v611_v30 = vadd.f32 %v2473_v53, %v597_v11  ;;  %v666_v53 = vrot.slane %v662_v24, 2  ;;  %v1181_v0 = vrot.slane %v2616_v48, 1 }
  0xf0   : > { %v1180_v6 = vrot.slane %v2619_v26, 1  ;;  %v1357_v11 = vrot.slane %v2624_v55, 1  ;;  %v1358_v14 = vrot.slane %v2633_v59, 1  ;;  %v791_v4 = vstv %s2650_s26  ;;  %s1828_s26 = sld [smem:[#allocation5 + $0x305]] }
  0xf1   : > { %1313 = vrot.lane.b32.xlu1 %v1309_v63, %s2112_s11  ;;  %v624_v41 = vadd.f32 %v621_v19, %v611_v30  ;;  %v668_v29 = vsel %vm310_vm1, %v666_v53, %v667_v39  ;;  %v708_v63 = vstv %s2601_s7  ;;  %s1844_s7 = sld [smem:[#allocation5 + $0x306]] }
  0xf2   : > { %v1947_v9 = vpop.eup %1946  ;;  %1478 = vrot.lane.b32.xlu0 %v1473_v2, %s2113_s12  ;;  %v1359_v48 = vsel %vm262_vm0, %v1357_v11, %v1358_v14 }
  0xf3   : > { %v2582_v18 = vadd.f32 1.0, %v1947_v9  ;;  %v636_v20 = vpop.permute.xlu1 %635 }
  0xf4   : > { %v608_v23 = vpop.permute.xlu0 %607  ;;  %v641_v50 = vadd.f32 %v636_v20, %v624_v41 }
  0xf5   : > { %v1949_v28 = vpop.eup %1948  ;;  %1950 = vrcp.f32 %v2582_v18  ;;  %1315 = vrot.lane.b32.xlu2 %v1310_v12, %s2112_s11  ;;  %v612_v34 = vadd.f32 %v608_v23, %v598_v22  ;;  %v555_v62 = vand.u32 2147483648, %v2582_v18  ;;  %v553_v10 = vand.u32 2147483647, %v2582_v18 }
  0xf6   : > { %v2598_v33 = vadd.f32 1.0, %v1949_v28  ;;  %vm549_vm13 = vweird.f32 %v2582_v18  ;;  %v1530_v28 = vmul.f32 %v2658_v27, %v1529_v15 }
  0xf7   : > { %v2603_v38 = vpop.permute.xlu2 %782  ;;  %v625_v43 = vadd.f32 %v620_v57, %v612_v34  ;;  %v556_v16 = vor.u32 1.1754944e-38, %v555_v62  ;;  %vm554_vm2 = vcmp.eq.f32.partialorder %v553_v10, 8.507059e+37 }
  0xf8   : > { %1952 = vrcp.f32 %v2598_v33  ;;  %v570_v37 = vand.u32 2147483648, %v2598_v33  ;;  %v568_v20 = vand.u32 2147483647, %v2598_v33  ;;  %vm564_vm3 = vweird.f32 %v2598_v33 }
  0xf9   : > { %1492 = vrot.lane.b32.xlu1 %v1487_v21, %s2112_s11  ;;  %v642_v1 = vadd.f32 %v2500_v17, %v625_v43 }
  0xfa   : > { %1490 = vrot.lane.b32.xlu0 %v1486_v31, %s2112_s11  ;;  %v571_v34 = vor.u32 1.1754944e-38, %v570_v37  ;;  %vm569_vm5 = vcmp.eq.f32.partialorder %v568_v20, 8.507059e+37 }
  0xfb   : > { %v1951_v49 = vpop.eup %1950  ;;  %v655_v44 = vpop.permute.xlu1 %654 }
  0xfc   : > { %v545_v52 = vmul.f32 %v1951_v49, %v2582_v18  ;;  %v653_v54 = vpop.permute.xlu0 %652  ;;  %v659_v5 = vadd.f32 %v655_v44, %v642_v1  ;;  %vm550_vm12 = vweird.f32 %v1951_v49 }
  0xfd   : > { %1343 = vrot.lane.b32.xlu2 %v1342_v47, %s2113_s12  ;;  %v658_v13 = vadd.f32 %v653_v54, %v641_v50  ;;  %vm551_vm14 = vmor %vm549_vm13, %vm550_vm12  ;;  %v1205_v54 = vstv %s2661_s27  ;;  %s2951_s27 = sld [smem:[#allocation6 + $0x7]] }
  0xfe   : > { %v1953_v60 = vpop.eup %1952  ;;  %v546_v61 = vsub.f32 1.0, %v545_v52  ;;  %v672_v22 = vadd.f32 %v667_v39, %v659_v5  ;;  %v1182_v39 = vsel %vm262_vm0, %v1180_v6, %v1181_v0  ;;  %v1207_v62 = vmul.f32 %v2630_v58, %v1205_v54 }
  0xff   : > { %v560_v2 = vmul.f32 %v1953_v60, %v2598_v33  ;;  %v671_v17 = vadd.f32 %v668_v29, %v658_v13  ;;  %v2639_v57 = vpop.permute.xlu2 %814  ;;  %vm565_vm15 = vweird.f32 %v1953_v60  ;;  %v792_v29 = vmul.f32 %v2658_v27, %v791_v4 }
 0x100   : > { %v547_v7 = vmul.f32 %v1951_v49, %v546_v61  ;;  %vm566_vm4 = vmor %vm564_vm3, %vm565_vm15  ;;  %v793_v13 = vmul.f32 %v2630_v58, %v791_v4  ;;  %v1206_v61 = vmul.f32 %v2658_v27, %v1205_v54  ;;  %v838_v6 = vstv %s2679_s17 }
 0x101   : > { %v561_v12 = vsub.f32 1.0, %v560_v2  ;;  %1520 = vrot.lane.b32.xlu1 %v1519_v56, %s2113_s12  ;;  %v688_v19 = vadd.f32 %v2535_v46, %v671_v17  ;;  %v796_v2 = vrot.slane %v792_v29, 1  ;;  %v839_v20 = vmul.f32 %v2658_v27, %v838_v6 }
 0x102   : > { %v548_v9 = vadd.f32 %v1951_v49, %v547_v7  ;;  %1345 = vrot.lane.b32.xlu0 %v1341_v36, %s2113_s12  ;;  %v2670_v36 = vmul.f32 %v2630_v58, %v1529_v15  ;;  %v797_v17 = vrot.slane %v793_v13, 1  ;;  %v1559_v7 = vstv %s2687_s10 }
 0x103   : > { %v562_v18 = vmul.f32 %v1953_v60, %v561_v12  ;;  %v700_v21 = vpop.permute.xlu1 %699  ;;  %v1210_v37 = vrot.slane %v1206_v61, 2  ;;  %v1560_v59 = vmul.f32 %v2658_v27, %v1559_v7 }
 0x104   : > { %v552_v23 = vsel %vm551_vm14, %v1951_v49, %v548_v9  ;;  %v705_v24 = vadd.f32 %v700_v21, %v688_v19  ;;  %v685_v25 = vpop.permute.xlu0 %684  ;;  %v1535_v49 = vrot.slane %v2670_v36, 1  ;;  %v2729_v21 = vmul.f32 %v2630_v58, %v838_v6 }
 0x105   : > { %v557_v30 = vsel %vm554_vm2, %v556_v16, %v552_v23  ;;  %v563_v46 = vadd.f32 %v1953_v60, %v562_v18  ;;  %1522 = vrot.lane.b32.xlu2 %v1518_v45, %s2113_s12  ;;  %v689_v31 = vadd.f32 %v685_v25, %v672_v22  ;;  %v1211_v16 = vrot.slane %v1207_v62, 2 }
 0x106   : > { %v574_v32 = vmul.f32 %v557_v30, %v2524_v42  ;;  %v2667_v35 = vadd.f32 %v708_v63, %v705_v24  ;;  %v798_v23 = vsel %vm262_vm0, %v796_v2, %v797_v17  ;;  %v2737_v24 = vmul.f32 %v2630_v58, %v1559_v7 }
 0x107   : > { %v567_v8 = vsel %vm566_vm4, %v1953_v60, %v563_v46  ;;  %v706_v33 = vadd.f32 %v2564_v3, %v689_v31  ;;  %v2673_v53 = vpop.permute.xlu2 %859  ;;  %v759_v3 = vstv %s2644_s21  ;;  %v844_v36 = vrot.slane %v2729_v21, 2  ;;  %s2938_s21 = sld [smem:[#allocation6 + $0x6]] }
 0x108   : > { %v576_v42 = vpack.c.bf16 %v574_v32, %v574_v32  ;;  %v572_v40 = vsel %vm569_vm5, %v571_v34, %v567_v8  ;;  %v1784_v41 = vadd.f32 -1.0, %v2667_v35  ;;  %v760_v1 = vmul.f32 %v2658_v27, %v759_v3 }
 0x109   : > { %v575_v43 = vmul.f32 %v572_v40, %v2544_v51  ;;  %v2682_v45 = vadd.f32 %v708_v63, %v706_v33  ;;  %1185 = vrot.lane.b32.xlu1 %v1181_v0, %s2112_s11  ;;  %v1534_v51 = vrot.slane %v1530_v28, 1  ;;  %v1382_v63 = vstv %s2676_s9  ;;  %s2973_s9 = sld [smem:[#allocation6 + $0x5]] }
 0x10a   : > { %1772 = vst.msk [vmem:[%s2532_s15 + $0x8] sm:$0xf] %vm400_vm9, %v576_v42  ;;  %v1786_v47 = vmul.f32 -1.442695, %v1784_v41  ;;  %1183 = vrot.lane.b32.xlu0 %v1182_v39, %s2112_s11  ;;  %v761_v0 = vmul.f32 %v2630_v58, %v759_v3  ;;  %v1383_v11 = vmul.f32 %v2658_v27, %v1382_v63  ;;  %v2723_v12 = vmul.f32 %v2630_v58, %v1382_v63 }
 0x10b   : > { %v577_v50 = vpack.c.bf16 %v575_v43, %v575_v43  ;;  %v1785_v44 = vadd.f32 -1.0, %v2682_v45  ;;  %v771_v26 = vpop.permute.xlu1 %770  ;;  %v1536_v56 = vsel %vm262_vm0, %v1534_v51, %v1535_v49  ;;  %v1222_v32 = vstv %s2710_s18 }
 0x10c   : > { %1954 = vpow2.f32 %v1786_v47  ;;  %v769_v52 = vpop.permute.xlu0 %768  ;;  %v775_v19 = vadd.f32 %v771_v26, %v761_v0  ;;  %v1387_v30 = vrot.slane %v1383_v11, 2  ;;  %v1388_v46 = vrot.slane %v2723_v12, 2 }
 0x10d   : > { %1773 = vst.msk [vmem:[%s2532_s15 + $0xc] sm:$0x7] %vm402_vm11, %v577_v50  ;;  %v1787_v55 = vmul.f32 -1.442695, %v1785_v44  ;;  %1360 = vrot.lane.b32.xlu2 %v1359_v48, %s2112_s11  ;;  %v774_v5 = vadd.f32 %v769_v52, %v760_v1  ;;  %v843_v34 = vrot.slane %v839_v20, 2  ;;  %v1564_v8 = vrot.slane %v1560_v59, 2 }
 0x10e   : > { %v1565_v42 = vrot.slane %v2737_v24, 2  ;;  %v1399_v40 = vstv %s2716_s19  ;;  %v1389_v41 = vsel %vm310_vm1, %v1387_v30, %v1388_v46  ;;  %v2758_v43 = vmul.f32 %v2630_v58, %v1222_v32 }
 0x10f   : > { %1956 = vpow2.f32 %v1787_v55  ;;  %v2705_v60 = vpop.permute.xlu2 %878  ;;  %v788_v22 = vadd.f32 %v2603_v38, %v774_v5  ;;  %v1212_v38 = vsel %vm310_vm1, %v1210_v37, %v1211_v16  ;;  %v2761_v48 = vmul.f32 %v2658_v27, %v1222_v32 }
 0x110   : > { %v2766_v44 = vmul.f32 %v2658_v27, %v1399_v40  ;;  %v1566_v29 = vsel %vm310_vm1, %v1564_v8, %v1565_v42  ;;  %v2772_v54 = vmul.f32 %v2630_v58, %v1399_v40  ;;  %v1228_v61 = vrot.slane %v2758_v43, 2 }
 0x111   : > { %1537 = vrot.lane.b32.xlu1 %v1536_v56, %s2112_s11  ;;  %v801_v33 = vadd.f32 %v798_v23, %v788_v22  ;;  %v885_v56 = vstv %s2742_s20  ;;  %v1576_v11 = vstv %s2753_s22  ;;  %v936_v40 = vstv %s2786_s16 }
 0x112   : > { %v1955_v10 = vpop.eup %1954  ;;  %1362 = vrot.lane.b32.xlu0 %v1358_v14, %s2112_s11  ;;  %v1404_v6 = vrot.slane %v2766_v44, 2  ;;  %v1577_v22 = vmul.f32 %v2658_v27, %v1576_v11 }
 0x113   : > { %v2725_v15 = vadd.f32 1.0, %v1955_v10  ;;  %v813_v9 = vpop.permute.xlu1 %812  ;;  %v1405_v10 = vrot.slane %v2772_v54, 2 }
 0x114   : > { %v785_v18 = vpop.permute.xlu0 %784  ;;  %v818_v4 = vadd.f32 %v813_v9, %v801_v33  ;;  %v1581_v43 = vrot.slane %v1577_v22, 2 }
 0x115   : > { %v1957_v14 = vpop.eup %1956  ;;  %1958 = vrcp.f32 %v2725_v15  ;;  %1539 = vrot.lane.b32.xlu2 %v1535_v49, %s2112_s11  ;;  %v789_v28 = vadd.f32 %v785_v18, %v775_v19  ;;  %v845_v49 = vsel %vm310_vm1, %v843_v34, %v844_v36  ;;  %v732_v13 = vand.u32 2147483648, %v2725_v15 }
 0x116   : > { %v2739_v25 = vadd.f32 1.0, %v1957_v14  ;;  %vm726_vm7 = vweird.f32 %v2725_v15 }
 0x117   : > { %v2744_v31 = vpop.permute.xlu2 %959  ;;  %v802_v39 = vadd.f32 %v797_v17, %v789_v28  ;;  %v730_v17 = vand.u32 2147483647, %v2725_v15  ;;  %v733_v9 = vor.u32 1.1754944e-38, %v732_v13 }
 0x118   : > { %1960 = vrcp.f32 %v2739_v25  ;;  %vm741_vm13 = vweird.f32 %v2739_v25 }
 0x119   : > { %1215 = vrot.lane.b32.xlu1 %v1211_v16, %s2113_s12  ;;  %v819_v26 = vadd.f32 %v2639_v57, %v802_v39  ;;  %v1227_v57 = vrot.slane %v2761_v48, 2  ;;  %v747_v16 = vand.u32 2147483648, %v2739_v25  ;;  %vm731_vm12 = vcmp.eq.f32.partialorder %v730_v17, 8.507059e+37 }
 0x11a   : > { %1213 = vrot.lane.b32.xlu0 %v1212_v38, %s2113_s12  ;;  %v1578_v38 = vmul.f32 %v2630_v58, %v1576_v11  ;;  %v968_v48 = vstv %s2793_s23 }
 0x11b   : > { %v1959_v3 = vpop.eup %1958  ;;  %v832_v47 = vpop.permute.xlu1 %831  ;;  %v748_v30 = vor.u32 1.1754944e-38, %v747_v16 }
 0x11c   : > { %v722_v51 = vmul.f32 %v1959_v3, %v2725_v15  ;;  %v830_v50 = vpop.permute.xlu0 %829  ;;  %v836_v63 = vadd.f32 %v832_v47, %v819_v26  ;;  %vm727_vm6 = vweird.f32 %v1959_v3  ;;  %v745_v15 = vand.u32 2147483647, %v2739_v25 }
 0x11d   : > { %1390 = vrot.lane.b32.xlu2 %v1389_v41, %s2113_s12  ;;  %v835_v52 = vadd.f32 %v830_v50, %v818_v4  ;;  %vm728_vm8 = vmor %vm726_vm7, %vm727_vm6  ;;  %v1406_v41 = vsel %vm310_vm1, %v1404_v6, %v1405_v10  ;;  %v937_v50 = vmul.f32 %v2658_v27, %v936_v40  ;;  %v969_v26 = vmul.f32 %v2658_v27, %v968_v48 }
 0x11e   : > { %v1961_v55 = vpop.eup %1960  ;;  %v723_v1 = vsub.f32 1.0, %v722_v51  ;;  %v849_v20 = vadd.f32 %v844_v36, %v836_v63  ;;  %vm746_vm15 = vcmp.eq.f32.partialorder %v745_v15, 8.507059e+37 }
 0x11f   : > { %v737_v62 = vmul.f32 %v1961_v55, %v2739_v25  ;;  %v848_v0 = vadd.f32 %v845_v49, %v835_v52  ;;  %v2778_v2 = vpop.permute.xlu2 %991  ;;  %vm742_vm10 = vweird.f32 %v1961_v55  ;;  %v1229_v25 = vsel %vm310_vm1, %v1227_v57, %v1228_v61 }
 0x120   : > { %v724_v5 = vmul.f32 %v1959_v3, %v723_v1  ;;  %vm743_vm14 = vmor %vm741_vm13, %vm742_vm10  ;;  %v970_v52 = vmul.f32 %v2630_v58, %v968_v48 }
 0x121   : > { %v738_v7 = vsub.f32 1.0, %v737_v62  ;;  %1567 = vrot.lane.b32.xlu1 %v1566_v29, %s2113_s12  ;;  %v865_v37 = vadd.f32 %v2673_v53, %v848_v0 }
 0x122   : > { %v725_v12 = vadd.f32 %v1959_v3, %v724_v5  ;;  %1392 = vrot.lane.b32.xlu0 %v1388_v46, %s2113_s12  ;;  %v974_v62 = vrot.slane %v970_v52, 1 }
 0x123   : > { %v739_v19 = vmul.f32 %v1961_v55, %v738_v7  ;;  %v877_v18 = vpop.permute.xlu1 %876 }
 0x124   : > { %v729_v21 = vsel %vm728_vm8, %v1959_v3, %v725_v12  ;;  %v882_v59 = vadd.f32 %v877_v18, %v865_v37  ;;  %v862_v14 = vpop.permute.xlu0 %861  ;;  %v1582_v3 = vrot.slane %v1578_v38, 2 }
 0x125   : > { %v734_v23 = vsel %vm731_vm12, %v733_v9, %v729_v21  ;;  %v740_v24 = vadd.f32 %v1961_v55, %v739_v19  ;;  %1569 = vrot.lane.b32.xlu2 %v1565_v42, %s2113_s12  ;;  %v866_v53 = vadd.f32 %v862_v14, %v849_v20  ;;  %s2813_s12 = sld [smem:[#allocation5 + $0x304]] }
 0x126   : > { %v751_v28 = vmul.f32 %v734_v23, %v2667_v35  ;;  %v2800_v46 = vadd.f32 %v885_v56, %v882_v59  ;;  %v1583_v44 = vsel %vm310_vm1, %v1581_v43, %v1582_v3 }
 0x127   : > { %v744_v32 = vsel %vm743_vm14, %v1961_v55, %v740_v24  ;;  %v883_v34 = vadd.f32 %v2705_v60, %v866_v53  ;;  %v2804_v36 = vpop.permute.xlu2 %1036  ;;  %v938_v55 = vmul.f32 %v2630_v58, %v936_v40 }
 0x128   : > { %v753_v8 = vpack.c.bf16 %v751_v28, %v751_v28  ;;  %v749_v33 = vsel %vm746_vm15, %v748_v30, %v744_v32  ;;  %v1800_v35 = vadd.f32 -1.0, %v2800_v46 }
 0x129   : > { %v752_v39 = vmul.f32 %v749_v33, %v2682_v45  ;;  %v2809_v42 = vadd.f32 %v885_v56, %v883_v34  ;;  %1232 = vrot.lane.b32.xlu1 %v1228_v61, %s2112_s11  ;;  %v973_v61 = vrot.slane %v969_v26, 1 }
 0x12a   : > { %1788 = vst.msk [vmem:[%s2532_s15 + $0x10] sm:$0xf] %vm400_vm9, %v753_v8  ;;  %v1802_v60 = vmul.f32 -1.442695, %v1800_v35  ;;  %1230 = vrot.lane.b32.xlu0 %v1229_v25, %s2112_s11  ;;  %v1062_v35 = vstv %s2845_s24 }
 0x12b   : > { %v754_v45 = vpack.c.bf16 %v752_v39, %v752_v39  ;;  %v1801_v4 = vadd.f32 -1.0, %v2809_v42  ;;  %v948_v47 = vpop.permute.xlu1 %947  ;;  %v1015_v13 = vstv %s2813_s12  ;;  %v975_v54 = vsel %vm262_vm0, %v973_v61, %v974_v62 }
 0x12c   : > { %1962 = vpow2.f32 %v1802_v60  ;;  %v946_v51 = vpop.permute.xlu0 %945  ;;  %v952_v57 = vadd.f32 %v948_v47, %v938_v55  ;;  %v1016_v17 = vmul.f32 %v2658_v27, %v1015_v13  ;;  %v1017_v6 = vmul.f32 %v2630_v58, %v1015_v13 }
 0x12d   : > { %1789 = vst.msk [vmem:[%s2532_s15 + $0x14] sm:$0x7] %vm402_vm11, %v754_v45  ;;  %v1803_v49 = vmul.f32 -1.442695, %v1801_v4  ;;  %1407 = vrot.lane.b32.xlu2 %v1406_v41, %s2112_s11  ;;  %v951_v1 = vadd.f32 %v946_v51, %v937_v50  ;;  %v1145_v39 = vstv %s2847_s25 }
 0x12e   : > { %v1020_v16 = vrot.slane %v1016_v17, 2  ;;  %v1021_v37 = vrot.slane %v1017_v6, 2 }
 0x12f   : > { %1964 = vpow2.f32 %v1803_v49  ;;  %v2830_v29 = vpop.permute.xlu2 %1055  ;;  %v965_v11 = vadd.f32 %v2744_v31, %v951_v1  ;;  %v1146_v1 = vmul.f32 %v2658_v27, %v1145_v39 }
 0x130   : > { %v1022_v59 = vsel %vm310_vm1, %v1020_v16, %v1021_v37 }
 0x131   : > { %1584 = vrot.lane.b32.xlu1 %v1583_v44, %s2112_s11  ;;  %v978_v19 = vadd.f32 %v975_v54, %v965_v11 }
 0x132   : > { %v1963_v56 = vpop.eup %1962  ;;  %1409 = vrot.lane.b32.xlu0 %v1405_v10, %s2112_s11 }
 0x133   : > { %v896_v63 = vadd.f32 1.0, %v1963_v56  ;;  %v990_v0 = vpop.permute.xlu1 %989 }
 0x134   : > { %v962_v5 = vpop.permute.xlu0 %961  ;;  %v995_v20 = vadd.f32 %v990_v0, %v978_v19 }
 0x135   : > { %v1965_v7 = vpop.eup %1964  ;;  %1966 = vrcp.f32 %v896_v63  ;;  %1586 = vrot.lane.b32.xlu2 %v1582_v3, %s2112_s11  ;;  %v966_v10 = vadd.f32 %v962_v5, %v952_v57  ;;  %s2850_s11 = sld [smem:[#allocation5 + $0x5]]  ;;  %v909_v28 = vand.u32 2147483648, %v896_v63  ;;  %v907_v8 = vand.u32 2147483647, %v896_v63 }
 0x136   : > { %v897_v12 = vadd.f32 1.0, %v1965_v7  ;;  %vm903_vm3 = vweird.f32 %v896_v63 }
 0x137   : > { %v2843_v9 = vpop.permute.xlu2 %1136  ;;  %v979_v15 = vadd.f32 %v974_v62, %v966_v10  ;;  %v910_v60 = vor.u32 1.1754944e-38, %v909_v28  ;;  %vm908_vm6 = vcmp.eq.f32.partialorder %v907_v8, 8.507059e+37  ;;  %v1147_v62 = vmul.f32 %v2630_v58, %v1145_v39 }
 0x138   : > { %1968 = vrcp.f32 %v897_v12  ;;  %v922_v3 = vand.u32 2147483647, %v897_v12  ;;  %vm918_vm7 = vweird.f32 %v897_v12 }
 0x139   : > { %v996_v22 = vadd.f32 %v2778_v2, %v979_v15  ;;  %v924_v2 = vand.u32 2147483648, %v897_v12  ;;  %v1151_v54 = vrot.slane %v1147_v62, 1 }
 0x13a   : > { %vm923_vm10 = vcmp.eq.f32.partialorder %v922_v3, 8.507059e+37 }
 0x13b   : > { %v1967_v18 = vpop.eup %1966  ;;  %v1009_v31 = vpop.permute.xlu1 %1008  ;;  %v1113_v49 = vstv %s2850_s11 }
 0x13c   : > { %v899_v21 = vmul.f32 %v1967_v18, %v896_v63  ;;  %v1007_v14 = vpop.permute.xlu0 %1006  ;;  %v1013_v38 = vadd.f32 %v1009_v31, %v996_v22  ;;  %vm904_vm2 = vweird.f32 %v1967_v18  ;;  %v1114_v17 = vmul.f32 %v2658_v27, %v1113_v49 }
 0x13d   : > { %v1012_v23 = vadd.f32 %v1007_v14, %v995_v20  ;;  %vm905_vm4 = vmor %vm903_vm3, %vm904_vm2 }
 0x13e   : > { %v1969_v24 = vpop.eup %1968  ;;  %v900_v53 = vsub.f32 1.0, %v899_v21  ;;  %v1026_v4 = vadd.f32 %v1021_v37, %v1013_v38 }
 0x13f   : > { %v914_v30 = vmul.f32 %v1969_v24, %v897_v12  ;;  %v1025_v32 = vadd.f32 %v1022_v59, %v1012_v23  ;;  %v2853_v34 = vpop.permute.xlu2 %1168  ;;  %vm919_vm5 = vweird.f32 %v1969_v24  ;;  %v1150_v12 = vrot.slane %v1146_v1, 1 }
 0x140   : > { %v901_v25 = vmul.f32 %v1967_v18, %v900_v53  ;;  %vm920_vm8 = vmor %vm918_vm7, %vm919_vm5 }
 0x141   : > { %v915_v33 = vsub.f32 1.0, %v914_v30  ;;  %v1042_v41 = vadd.f32 %v2804_v36, %v1025_v32  ;;  %v925_v36 = vor.u32 1.1754944e-38, %v924_v2  ;;  %v1152_v15 = vsel %vm262_vm0, %v1150_v12, %v1151_v54 }
 0x142   : > { %v902_v40 = vadd.f32 %v1967_v18, %v901_v25 }
 0x143   : > { %v916_v43 = vmul.f32 %v1969_v24, %v915_v33  ;;  %v1054_v45 = vpop.permute.xlu1 %1053 }
 0x144   : > { %v906_v47 = vsel %vm905_vm4, %v1967_v18, %v902_v40  ;;  %v1059_v48 = vadd.f32 %v1054_v45, %v1042_v41  ;;  %v1039_v51 = vpop.permute.xlu0 %1038  ;;  %v1115_v18 = vmul.f32 %v2630_v58, %v1113_v49 }
 0x145   : > { %v911_v50 = vsel %vm908_vm6, %v910_v60, %v906_v47  ;;  %v917_v44 = vadd.f32 %v1969_v24, %v916_v43  ;;  %v1043_v26 = vadd.f32 %v1039_v51, %v1026_v4 }
 0x146   : > { %v928_v52 = vmul.f32 %v911_v50, %v2800_v46  ;;  %v2860_v55 = vadd.f32 %v1062_v35, %v1059_v48 }
 0x147   : > { %v921_v13 = vsel %vm920_vm8, %v1969_v24, %v917_v44  ;;  %v1060_v56 = vadd.f32 %v2830_v29, %v1043_v26  ;;  %v2864_v61 = vpop.permute.xlu2 %1476 }
 0x148   : > { %v930_v63 = vpack.c.bf16 %v928_v52, %v928_v52  ;;  %v926_v0 = vsel %vm923_vm10, %v925_v36, %v921_v13  ;;  %v1816_v46 = vadd.f32 -1.0, %v2860_v55 }
 0x149   : > { %v929_v57 = vmul.f32 %v926_v0, %v2809_v42  ;;  %v2869_v5 = vadd.f32 %v1062_v35, %v1060_v56 }
 0x14a   : > { %1804 = vst.msk [vmem:[%s2532_s15 + $0x18] sm:$0xf] %vm400_vm9, %v930_v63  ;;  %v1818_v6 = vmul.f32 -1.442695, %v1816_v46  ;;  %v1290_v46 = vstv %s2893_s28 }
 0x14b   : > { %v931_v7 = vpack.c.bf16 %v929_v57, %v929_v57  ;;  %v1817_v29 = vadd.f32 -1.0, %v2869_v5  ;;  %v1125_v11 = vpop.permute.xlu1 %1124 }
 0x14c   : > { %1970 = vpow2.f32 %v1818_v6  ;;  %v1123_v10 = vpop.permute.xlu0 %1122  ;;  %v1129_v14 = vadd.f32 %v1125_v11, %v1115_v18  ;;  %v1499_v18 = vstv %s2907_s5 }
 0x14d   : > { %1805 = vst.msk [vmem:[%s2532_s15 + $0x1c] sm:$0x7] %vm402_vm11, %v931_v7  ;;  %v1819_v16 = vmul.f32 -1.442695, %v1817_v29  ;;  %v1128_v37 = vadd.f32 %v1123_v10, %v1114_v17 }
 0x14f   : > { %1972 = vpow2.f32 %v1819_v16  ;;  %v1142_v42 = vadd.f32 %v2843_v9, %v1128_v37  ;;  %v2878_v19 = vpop.permute.xlu2 %1315 }
 0x151   : > { %v1155_v31 = vadd.f32 %v1152_v15, %v1142_v42  ;;  %v1467_v42 = vstv %s2900_s4 }
 0x152   : > { %v1971_v20 = vpop.eup %1970 }
 0x153   : > { %v1073_v21 = vadd.f32 1.0, %v1971_v20  ;;  %v1167_v59 = vpop.permute.xlu1 %1166  ;;  %v1469_v20 = vmul.f32 %v2630_v58, %v1467_v42 }
 0x154   : > { %v2882_v22 = vadd.f32 %v1167_v59, %v1155_v31  ;;  %v1139_v23 = vpop.permute.xlu0 %1138  ;;  %v1369_v31 = vstv %s1844_s7 }
 0x155   : > { %v1973_v24 = vpop.eup %1972  ;;  %1974 = vrcp.f32 %v1073_v21  ;;  %v1143_v28 = vadd.f32 %v1139_v23, %v1129_v14  ;;  %v1086_v40 = vand.u32 2147483648, %v1073_v21  ;;  %v1084_v43 = vand.u32 2147483647, %v1073_v21 }
 0x156   : > { %v1074_v53 = vadd.f32 1.0, %v1973_v24  ;;  %vm1080_vm13 = vweird.f32 %v1073_v21  ;;  %v2927_v14 = vmul.f32 %v2630_v58, %v1499_v18  ;;  %v1370_v23 = vmul.f32 %v2658_v27, %v1369_v31 }
 0x157   : > { %v2884_v30 = vpop.permute.xlu2 %1343  ;;  %v1156_v9 = vadd.f32 %v1151_v54, %v1143_v28  ;;  %v1087_v47 = vor.u32 1.1754944e-38, %v1086_v40  ;;  %vm1085_vm2 = vcmp.eq.f32.partialorder %v1084_v43, 8.507059e+37  ;;  %v2931_v24 = vmul.f32 %v2630_v58, %v1369_v31 }
 0x158   : > { %1976 = vrcp.f32 %v1074_v53  ;;  %v1101_v4 = vand.u32 2147483648, %v1074_v53  ;;  %vm1095_vm3 = vweird.f32 %v1074_v53 }
 0x159   : > { %v2889_v25 = vadd.f32 %v2853_v34, %v1156_v9  ;;  %v1099_v34 = vand.u32 2147483647, %v1074_v53 }
 0x15a   : > { %v1102_v36 = vor.u32 1.1754944e-38, %v1101_v4 }
 0x15b   : > { %v1975_v38 = vpop.eup %1974  ;;  %v2886_v32 = vpop.permute.xlu1 %1301  ;;  %vm1100_vm5 = vcmp.eq.f32.partialorder %v1099_v34, 8.507059e+37 }
 0x15c   : > { %v1076_v8 = vmul.f32 %v1975_v38, %v1073_v21  ;;  %v1300_v33 = vpop.permute.xlu0 %1299  ;;  %vm1081_vm12 = vweird.f32 %v1975_v38 }
 0x15d   : > { %vm1082_vm14 = vmor %vm1080_vm13, %vm1081_vm12 }
 0x15e   : > { %v1977_v35 = vpop.eup %1976  ;;  %v1077_v39 = vsub.f32 1.0, %v1076_v8 }
 0x15f   : > { %v1091_v60 = vmul.f32 %v1977_v35, %v1074_v53  ;;  %v2891_v2 = vpop.permute.xlu2 %1522  ;;  %vm1096_vm15 = vweird.f32 %v1977_v35 }
 0x160   : > { %v1078_v41 = vmul.f32 %v1975_v38, %v1077_v39  ;;  %vm1097_vm4 = vmor %vm1095_vm3, %vm1096_vm15  ;;  %v1375_v39 = vrot.slane %v2931_v24, 2 }
 0x161   : > { %v1092_v3 = vsub.f32 1.0, %v1091_v60 }
 0x162   : > { %v1079_v45 = vadd.f32 %v1975_v38, %v1078_v41 }
 0x163   : > { %v1093_v48 = vmul.f32 %v1977_v35, %v1092_v3  ;;  %v1314_v51 = vpop.permute.xlu1 %1313  ;;  %v1546_v3 = vstv %s2933_s8 }
 0x164   : > { %v1083_v49 = vsel %vm1082_vm14, %v1975_v38, %v1079_v45  ;;  %v1479_v50 = vpop.permute.xlu0 %1478  ;;  %v1505_v38 = vrot.slane %v2927_v14, 1 }
 0x165   : > { %v1088_v44 = vsel %vm1085_vm2, %v1087_v47, %v1083_v49  ;;  %v1094_v26 = vadd.f32 %v1977_v35, %v1093_v48  ;;  %v1483_v53 = vadd.f32 %v1479_v50, %v1469_v20  ;;  %v2948_v47 = vmul.f32 %v2630_v58, %v1546_v3 }
 0x166   : > { %v1105_v52 = vmul.f32 %v1088_v44, %v2860_v55  ;;  %v1322_v55 = vstv %s1841_s30 }
 0x167   : > { %v1098_v1 = vsel %vm1097_vm4, %v1977_v35, %v1094_v26  ;;  %v1361_v13 = vpop.permute.xlu2 %1360  ;;  %v1323_v6 = vmul.f32 %v2658_v27, %v1322_v55  ;;  %v2913_v7 = vmul.f32 %v2630_v58, %v1322_v55  ;;  %v1374_v35 = vrot.slane %v1370_v23, 2 }
 0x168   : > { %v1107_v56 = vpack.c.bf16 %v1105_v52, %v1105_v52  ;;  %v1103_v62 = vsel %vm1100_vm5, %v1102_v36, %v1098_v1  ;;  %v1552_v44 = vrot.slane %v2948_v47, 2 }
 0x169   : > { %v1106_v63 = vmul.f32 %v1103_v62, %v2869_v5  ;;  %v1291_v5 = vmul.f32 %v2658_v27, %v1290_v46  ;;  %v1327_v11 = vrot.slane %v1323_v6, 1  ;;  %v1328_v54 = vrot.slane %v2913_v7, 1 }
 0x16a   : > { %1820 = vst.msk [vmem:[%s2532_s15 + $0x20] sm:$0xf] %vm400_vm9, %v1107_v56  ;;  %v1376_v43 = vsel %vm310_vm1, %v1374_v35, %v1375_v39  ;;  %v1468_v62 = vmul.f32 %v2658_v27, %v1467_v42 }
 0x16b   : > { %v1108_v0 = vpack.c.bf16 %v1106_v63, %v1106_v63  ;;  %v1493_v57 = vpop.permute.xlu1 %1492  ;;  %v1305_v12 = vadd.f32 %v1300_v33, %v1291_v5  ;;  %v1329_v15 = vsel %vm262_vm0, %v1327_v11, %v1328_v54  ;;  %v1292_v63 = vmul.f32 %v2630_v58, %v1290_v46 }
 0x16c   : > { %v2902_v17 = vpop.permute.xlu0 %1490  ;;  %v1497_v8 = vadd.f32 %v1493_v57, %v1483_v53  ;;  %v1482_v42 = vadd.f32 %v2864_v61, %v1468_v62  ;;  %v1547_v53 = vmul.f32 %v2658_v27, %v1546_v3 }
 0x16d   : > { %1821 = vst.msk [vmem:[%s2532_s15 + $0x24] sm:$0x7] %vm402_vm11, %v1108_v0  ;;  %v1319_v16 = vadd.f32 %v1314_v51, %v1305_v12  ;;  %v1416_v51 = vstv %s2938_s21  ;;  %v1500_v0 = vmul.f32 %v2658_v27, %v1499_v18 }
 0x16e   : > { %v1510_v41 = vadd.f32 %v1505_v38, %v1497_v8 }
 0x16f   : > { %v1540_v29 = vpop.permute.xlu2 %1539  ;;  %v1332_v59 = vadd.f32 %v1329_v15, %v1319_v16  ;;  %v1306_v16 = vadd.f32 %v2886_v32, %v1292_v63  ;;  %v1504_v15 = vrot.slane %v1500_v0, 1 }
 0x170   : > { %v1527_v45 = vadd.f32 %v2891_v2, %v1510_v41  ;;  %v1192_v2 = vstv %s1828_s26  ;;  %v1239_v41 = vstv %s2973_s9 }
 0x171   : > { %v1349_v9 = vadd.f32 %v2884_v30, %v1332_v59  ;;  %v1193_v6 = vmul.f32 %v2658_v27, %v1192_v2  ;;  %v1194_v5 = vmul.f32 %v2630_v58, %v1192_v2  ;;  %v1320_v32 = vadd.f32 %v2878_v19, %v1306_v16 }
 0x172   : > { %v1544_v50 = vadd.f32 %v1540_v29, %v1527_v45  ;;  %v1593_v29 = vstv %s2951_s27  ;;  %v1506_v23 = vsel %vm262_vm0, %v1504_v15, %v1505_v38 }
 0x173   : > { %v2916_v10 = vpop.permute.xlu1 %1520  ;;  %v1366_v60 = vadd.f32 %v1361_v13, %v1349_v9  ;;  %v1197_v20 = vrot.slane %v1193_v6, 2  ;;  %v1198_v31 = vrot.slane %v1194_v5, 2 }
 0x174   : > { %v2918_v37 = vpop.permute.xlu0 %1345  ;;  %v1557_v1 = vadd.f32 %v1552_v44, %v1544_v50 }
 0x175   : > { %v1379_v4 = vadd.f32 %v1376_v43, %v1366_v60  ;;  %v1199_v8 = vsel %vm310_vm1, %v1197_v20, %v1198_v31 }
 0x177   : > { %v1391_v21 = vpop.permute.xlu2 %1390 }
 0x178   : > { %v1396_v34 = vadd.f32 %v1391_v21, %v1379_v4  ;;  %v1496_v21 = vadd.f32 %v2902_v17, %v1482_v42 }
 0x17a   : > { %v1509_v17 = vadd.f32 %v1506_v23, %v1496_v21 }
 0x17b   : > { %v1186_v28 = vpop.permute.xlu1 %1185 }
 0x17c   : > { %v1184_v33 = vpop.permute.xlu0 %1183  ;;  %v1190_v58 = vadd.f32 %v1186_v28, %v2889_v25  ;;  %v1333_v25 = vadd.f32 %v1328_v54, %v1320_v32  ;;  %v1551_v28 = vrot.slane %v1547_v53, 2  ;;  %v1526_v38 = vadd.f32 %v2916_v10, %v1509_v17 }
 0x17d   : > { %v1189_v61 = vadd.f32 %v1184_v33, %v2882_v22 }
 0x17e   : > { %v1203_v60 = vadd.f32 %v1198_v31, %v1190_v58  ;;  %v1350_v27 = vadd.f32 %v2918_v37, %v1333_v25 }
 0x17f   : > { %v1570_v40 = vpop.permute.xlu2 %1569  ;;  %v1202_v19 = vadd.f32 %v1199_v8, %v1189_v61 }
 0x180   : > { %v1574_v57 = vadd.f32 %v1570_v40, %v1557_v1 }
 0x183   : > { %v2944_v30 = vpop.permute.xlu1 %1537 }
 0x184   : > { %v1363_v48 = vpop.permute.xlu0 %1362  ;;  %v1543_v3 = vadd.f32 %v2944_v30, %v1526_v38 }
 0x185   : > { %v1367_v47 = vadd.f32 %v1363_v48, %v1350_v27 }
 0x187   : > { %v1408_v49 = vpop.permute.xlu2 %1407  ;;  %v1380_v30 = vadd.f32 %v1375_v39, %v1367_v47 }
 0x188   : > { %v1413_v26 = vadd.f32 %v1408_v49, %v1396_v34  ;;  %v1553_v34 = vsel %vm310_vm1, %v1551_v28, %v1552_v44 }
 0x189   : > { %v1556_v37 = vadd.f32 %v1553_v34, %v1543_v3 }
 0x18a   : > { %v2956_v52 = vadd.f32 %v1416_v51, %v1413_v26 }
 0x18b   : > { %v1216_v36 = vpop.permute.xlu1 %1215 }
 0x18c   : > { %v1848_v13 = vadd.f32 -1.0, %v2956_v52  ;;  %v1214_v56 = vpop.permute.xlu0 %1213  ;;  %v1220_v22 = vadd.f32 %v1216_v36, %v1203_v60 }
 0x18d   : > { %v1219_v33 = vadd.f32 %v1214_v56, %v1202_v19 }
 0x18e   : > { %v1850_v55 = vmul.f32 -1.442695, %v1848_v13 }
 0x18f   : > { %v1587_v11 = vpop.permute.xlu2 %1586 }
 0x190   : > { %1978 = vpow2.f32 %v1850_v55  ;;  %v1591_v12 = vadd.f32 %v1587_v11, %v1574_v57 }
 0x192   : > { %v2971_v46 = vadd.f32 %v1593_v29, %v1591_v12 }
 0x193   : > { %v1568_v18 = vpop.permute.xlu1 %1567 }
 0x194   : > { %v1865_v59 = vadd.f32 -1.0, %v2971_v46  ;;  %v1393_v14 = vpop.permute.xlu0 %1392  ;;  %v1573_v48 = vadd.f32 %v1568_v18, %v1556_v37 }
 0x195   : > { %v1397_v63 = vadd.f32 %v1393_v14, %v1380_v30 }
 0x196   : > { %v1979_v9 = vpop.eup %1978  ;;  %v1867_v35 = vmul.f32 -1.442695, %v1865_v59 }
 0x197   : > { %v1427_v40 = vadd.f32 1.0, %v1979_v9 }
 0x198   : > { %1980 = vpow2.f32 %v1867_v35 }
 0x199   : > { %1982 = vrcp.f32 %v1427_v40  ;;  %v1438_v56 = vand.u32 2147483647, %v1427_v40  ;;  %v1440_v62 = vand.u32 2147483648, %v1427_v40  ;;  %vm1434_vm1 = vweird.f32 %v1427_v40 }
 0x19b   : > { %v1233_v43 = vpop.permute.xlu1 %1232  ;;  %v1441_v16 = vor.u32 1.1754944e-38, %v1440_v62  ;;  %vm1439_vm7 = vcmp.eq.f32.partialorder %v1438_v56, 8.507059e+37 }
 0x19c   : > { %v1237_v45 = vadd.f32 %v1233_v43, %v1220_v22  ;;  %v1231_v4 = vpop.permute.xlu0 %1230 }
 0x19d   : > { %v1236_v7 = vadd.f32 %v1231_v4, %v1219_v33 }
 0x19e   : > { %v1981_v54 = vpop.eup %1980  ;;  %v2990_v49 = vadd.f32 %v1239_v41, %v1237_v45 }
 0x19f   : > { %v1983_v50 = vpop.eup %1982  ;;  %v1605_v26 = vadd.f32 1.0, %v1981_v54  ;;  %v2992_v10 = vadd.f32 %v1239_v41, %v1236_v7 }
 0x1a0   : > { %v1430_v2 = vmul.f32 %v1983_v50, %v1427_v40  ;;  %v1833_v36 = vadd.f32 -1.0, %v2990_v49  ;;  %vm1435_vm0 = vweird.f32 %v1983_v50 }
 0x1a1   : > { %1984 = vrcp.f32 %v1605_v26  ;;  %v1832_v44 = vadd.f32 -1.0, %v2992_v10  ;;  %vm1436_vm6 = vmor %vm1434_vm1, %vm1435_vm0  ;;  %v1630_v32 = vand.u32 2147483647, %v1605_v26  ;;  %v1632_v23 = vand.u32 2147483648, %v1605_v26 }
 0x1a2   : > { %v1431_v1 = vsub.f32 1.0, %v1430_v2  ;;  %v1835_v13 = vmul.f32 -1.442695, %v1833_v36  ;;  %vm1626_vm10 = vweird.f32 %v1605_v26 }
 0x1a3   : > { %v1585_v0 = vpop.permute.xlu1 %1584  ;;  %v1834_v55 = vmul.f32 -1.442695, %v1832_v44  ;;  %vm1631_vm13 = vcmp.eq.f32.partialorder %v1630_v32, 8.507059e+37 }
 0x1a4   : > { %v1432_v57 = vmul.f32 %v1983_v50, %v1431_v1  ;;  %1986 = vpow2.f32 %v1835_v13  ;;  %v1590_v6 = vadd.f32 %v1585_v0, %v1573_v48  ;;  %v1410_v5 = vpop.permute.xlu0 %1409 }
 0x1a5   : > { %v1414_v11 = vadd.f32 %v1410_v5, %v1397_v63  ;;  %1988 = vpow2.f32 %v1834_v55 }
 0x1a6   : > { %v1433_v24 = vadd.f32 %v1983_v50, %v1432_v57  ;;  %v3000_v39 = vadd.f32 %v1593_v29, %v1590_v6 }
 0x1a7   : > { %v1985_v12 = vpop.eup %1984  ;;  %v3005_v15 = vadd.f32 %v1416_v51, %v1414_v11 }
 0x1a8   : > { %v1437_v42 = vsel %vm1436_vm6, %v1983_v50, %v1433_v24  ;;  %v1622_v20 = vmul.f32 %v1985_v12, %v1605_v26  ;;  %v1864_v31 = vadd.f32 -1.0, %v3000_v39  ;;  %vm1627_vm8 = vweird.f32 %v1985_v12 }
 0x1a9   : > { %v1442_v18 = vsel %vm1439_vm7, %v1441_v16, %v1437_v42  ;;  %v1849_v21 = vadd.f32 -1.0, %v3005_v15  ;;  %vm1628_vm12 = vmor %vm1626_vm10, %vm1627_vm8 }
 0x1aa   : > { %v1987_v58 = vpop.eup %1986  ;;  %v1459_v29 = vmul.f32 %v1442_v18, %v2956_v52  ;;  %v1623_v59 = vsub.f32 1.0, %v1622_v20  ;;  %v1866_v14 = vmul.f32 -1.442695, %v1864_v31  ;;  %v1633_v52 = vor.u32 1.1754944e-38, %v1632_v23 }
 0x1ab   : > { %v1251_v61 = vadd.f32 1.0, %v1987_v58  ;;  %v1851_v53 = vmul.f32 -1.442695, %v1849_v21  ;;  %v1989_v51 = vpop.eup %1988 }
 0x1ac   : > { %v1461_v9 = vpack.c.bf16 %v1459_v29, %v1459_v29  ;;  %v1624_v8 = vmul.f32 %v1985_v12, %v1623_v59  ;;  %1990 = vpow2.f32 %v1866_v14  ;;  %v1250_v40 = vadd.f32 1.0, %v1989_v51 }
 0x1ad   : > { %1992 = vrcp.f32 %v1251_v61  ;;  %v1278_v45 = vand.u32 2147483648, %v1251_v61  ;;  %v1276_v34 = vand.u32 2147483647, %v1251_v61  ;;  %vm1272_vm15 = vweird.f32 %v1251_v61 }
 0x1ae   : > { %1852 = vst.msk [vmem:[%s2532_s15 + $0x30] sm:$0xf] %vm400_vm9, %v1461_v9  ;;  %v1625_v35 = vadd.f32 %v1985_v12, %v1624_v8  ;;  %1994 = vpow2.f32 %v1851_v53  ;;  %v1261_v37 = vand.u32 2147483647, %v1250_v40  ;;  %vm1257_vm5 = vweird.f32 %v1250_v40 }
 0x1af   : > { %1996 = vrcp.f32 %v1250_v40  ;;  %v1279_v26 = vor.u32 1.1754944e-38, %v1278_v45  ;;  %vm1277_vm4 = vcmp.eq.f32.partialorder %v1276_v34, 8.507059e+37 }
 0x1b0   : > { %v1629_v17 = vsel %vm1628_vm12, %v1985_v12, %v1625_v35  ;;  %vm1262_vm1 = vcmp.eq.f32.partialorder %v1261_v37, 8.507059e+37 }
 0x1b1   : > { %v1634_v60 = vsel %vm1631_vm13, %v1633_v52, %v1629_v17 }
 0x1b2   : > { %v1991_v25 = vpop.eup %1990  ;;  %v1637_v28 = vmul.f32 %v1634_v60, %v2971_v46  ;;  %v1263_v46 = vand.u32 2147483648, %v1250_v40 }
 0x1b3   : > { %v1993_v19 = vpop.eup %1992  ;;  %v1604_v38 = vadd.f32 1.0, %v1991_v25 }
 0x1b4   : > { %v1995_v22 = vpop.eup %1994  ;;  %v1639_v27 = vpack.c.bf16 %v1637_v28, %v1637_v28  ;;  %v1268_v33 = vmul.f32 %v1993_v19, %v1251_v61  ;;  %vm1273_vm14 = vweird.f32 %v1993_v19  ;;  %v1264_v56 = vor.u32 1.1754944e-38, %v1263_v46 }
 0x1b5   : > { %1998 = vrcp.f32 %v1604_v38  ;;  %v1997_v41 = vpop.eup %1996  ;;  %v1428_v3 = vadd.f32 1.0, %v1995_v22  ;;  %vm1274_vm2 = vmor %vm1272_vm15, %vm1273_vm14  ;;  %v1617_v63 = vand.u32 2147483648, %v1604_v38  ;;  %v1615_v57 = vand.u32 2147483647, %v1604_v38 }
 0x1b6   : > { %1869 = vst.msk [vmem:[%s2532_s15 + $0x3c] sm:$0x7] %vm402_vm11, %v1639_v27  ;;  %v1269_v43 = vsub.f32 1.0, %v1268_v33  ;;  %v1253_v4 = vmul.f32 %v1997_v41, %v1250_v40  ;;  %vm1258_vm3 = vweird.f32 %v1997_v41  ;;  %vm1611_vm7 = vweird.f32 %v1604_v38 }
 0x1b7   : > { %2000 = vrcp.f32 %v1428_v3  ;;  %vm1259_vm0 = vmor %vm1257_vm5, %vm1258_vm3  ;;  %v1455_v42 = vand.u32 2147483648, %v1428_v3  ;;  %v1453_v18 = vand.u32 2147483647, %v1428_v3  ;;  %vm1616_vm12 = vcmp.eq.f32.partialorder %v1615_v57, 8.507059e+37 }
 0x1b8   : > { %v1270_v47 = vmul.f32 %v1993_v19, %v1269_v43  ;;  %v1254_v7 = vsub.f32 1.0, %v1253_v4  ;;  %vm1449_vm13 = vweird.f32 %v1428_v3 }
 0x1b9   : > { %v1456_v59 = vor.u32 1.1754944e-38, %v1455_v42  ;;  %vm1454_vm15 = vcmp.eq.f32.partialorder %v1453_v18, 8.507059e+37 }
 0x1ba   : > { %v1271_v54 = vadd.f32 %v1993_v19, %v1270_v47  ;;  %v1255_v2 = vmul.f32 %v1997_v41, %v1254_v7 }
 0x1bb   : > { %v1999_v50 = vpop.eup %1998 }
 0x1bc   : > { %v1275_v36 = vsel %vm1274_vm2, %v1993_v19, %v1271_v54  ;;  %v1607_v30 = vmul.f32 %v1999_v50, %v1604_v38  ;;  %v1256_v48 = vadd.f32 %v1997_v41, %v1255_v2  ;;  %vm1612_vm6 = vweird.f32 %v1999_v50 }
 0x1bd   : > { %v1280_v1 = vsel %vm1277_vm4, %v1279_v26, %v1275_v36  ;;  %v2001_v13 = vpop.eup %2000  ;;  %vm1613_vm8 = vmor %vm1611_vm7, %vm1612_vm6 }
 0x1be   : > { %v1283_v44 = vmul.f32 %v1280_v1, %v2990_v49  ;;  %v1608_v62 = vsub.f32 1.0, %v1607_v30  ;;  %v1260_v0 = vsel %vm1259_vm0, %v1997_v41, %v1256_v48  ;;  %v1445_v55 = vmul.f32 %v2001_v13, %v1428_v3 }
 0x1bf   : > { %v1265_v5 = vsel %vm1262_vm1, %v1264_v56, %v1260_v0  ;;  %v1618_v49 = vor.u32 1.1754944e-38, %v1617_v63  ;;  %vm1450_vm10 = vweird.f32 %v2001_v13 }
 0x1c0   : > { %v1285_v6 = vpack.c.bf16 %v1283_v44, %v1283_v44  ;;  %v1609_v11 = vmul.f32 %v1999_v50, %v1608_v62  ;;  %v1282_v24 = vmul.f32 %v1265_v5, %v2992_v10  ;;  %v1446_v12 = vsub.f32 1.0, %v1445_v55  ;;  %vm1451_vm14 = vmor %vm1449_vm13, %vm1450_vm10 }
 0x1c2   : > { %1837 = vst.msk [vmem:[%s2532_s15 + $0x2c] sm:$0x7] %vm402_vm11, %v1285_v6  ;;  %v1610_v16 = vadd.f32 %v1999_v50, %v1609_v11  ;;  %v1284_v20 = vpack.c.bf16 %v1282_v24, %v1282_v24  ;;  %v1447_v31 = vmul.f32 %v2001_v13, %v1446_v12 }
 0x1c4   : > { %v1614_v21 = vsel %vm1613_vm8, %v1999_v50, %v1610_v16  ;;  %1836 = vst.msk [vmem:[%s2532_s15 + $0x28] sm:$0xf] %vm400_vm9, %v1284_v20  ;;  %v1448_v10 = vadd.f32 %v2001_v13, %v1447_v31 }
 0x1c5   : > { %v1619_v58 = vsel %vm1616_vm12, %v1618_v49, %v1614_v21 }
 0x1c6   : > { %v1636_v29 = vmul.f32 %v1619_v58, %v3000_v39  ;;  %v1452_v14 = vsel %vm1451_vm14, %v2001_v13, %v1448_v10 }
 0x1c7   : > { %v1457_v23 = vsel %vm1454_vm15, %v1456_v59, %v1452_v14 }
 0x1c8   : > { %v1638_v32 = vpack.c.bf16 %v1636_v29, %v1636_v29  ;;  %v1460_v61 = vmul.f32 %v1457_v23, %v3005_v15 }
 0x1ca   : > { %1868 = vst.msk [vmem:[%s2532_s15 + $0x38] sm:$0xf] %vm400_vm9, %v1638_v32  ;;  %v1462_v53 = vpack.c.bf16 %v1460_v61, %v1460_v61 }
 0x1cc   : > { %1853 = vst.msk [vmem:[%s2532_s15 + $0x34] sm:$0x7] %vm402_vm11, %v1462_v53 }
 0x1cd PF: > { %p15_p4 = scmp.ge.s32.totalorder %s2183_s29, 4   ;;  %s3047_s12 = smov %s2098_s13 }
 0x1ce   : > { %s3048_s13 = smov %s2102_s14  ;;  %s3049_s14 = smov %s2193_s6 }
 0x1cf   : > { %s3050_s15 = smov %s2183_s29  ;;  %17 = sbr.rel (!%p15_p4) target bundleno = 5 (0x5), region = 88 }
 0x1d4   :  { %1664 = vsyncpa [#allocation3], 1 }
 0x1d5   :  { %1666 = vsyncpa [#allocation3 + $0x1], 1 }
 0x1d6   :  { %1667 = vsyncpa [#allocation4], 1 }
 0x1d7   :  { %1669 = vsyncpa [#allocation4 + $0x1], 1 }
 0x1d8   :  { %1670 = vsyncpa [#allocation7], 1 }

// kernel: conv2d_subsampling_forward.5
= control target key start
LH: loop header
LB: loop body
LE: loop exit
PB: predicated region body
PF: predicated region fallthrough
CT: control target
= control target key end

     0   :  { %vm106_vm0 = vcmask 1043456   ;;  %vm90_vm1 = vcmask 588800   ;;  %vm364_vm7 = vcmask 257024   ;;  %s767_s1 = inlined_call_operand.vmem [shape: bf16[72,32], index: 1, kind: input, shape index: {}]   ;;  %s768_s2 = inlined_call_operand.vmem [shape: f32[1,32], index: 2, kind: input, shape index: {}]   ;;  %s769_s0 = inlined_call_operand.vmem [shape: bf16[80,72], index: 0, kind: input, shape index: {}]   ;;  %s770_s3 = inlined_call_operand.vmem [shape: bf16[80,32], index: 3, kind: output, shape index: {}]  }
   0x1   :  { %v33_v0 = vld [vmem:[%s767_s1 + $0x20] sm:$0xf]  ;;  %v448_v4 = vld [vmem:[%s767_s1 + $0x18] sm:$0xff]  ;;  %v447_v5 = vld [vmem:[%s767_s1 + $0x10] sm:$0xff] }
   0x2   :  { %v80_v1 = vunpack.c.l.b16 %v33_v0  ;;  %v446_v6 = vld [vmem:[%s767_s1 + $0x8] sm:$0xff]  ;;  %v445_v7 = vld [vmem:[%s767_s1] sm:$0xff]  ;;  %v442_v10 = vld [vmem:[%s769_s0 + $0x10] sm:$0xff] }
   0x3   :  { %v440_v8 = vld [vmem:[%s769_s0] sm:$0xff]  ;;  %v441_v9 = vld [vmem:[%s769_s0 + $0x8] sm:$0xff]  ;;  %v443_v11 = vld [vmem:[%s769_s0 + $0x18] sm:$0xff] }
   0x4   :  { %v85_v2 = vpack.c.b16 %v80_v1, %v80_v1  ;;  %v444_v12 = vld [vmem:[%s769_s0 + $0x20] sm:$0xff] }
   0x5   :  { %v558_v13 = vld [vmem:[%s768_s2] ss:$0 sm:$0xff] }
   0x6   :  { %v108_v3 = vsel %vm106_vm0, %v85_v2, 0 }
   0x7   :  { %113 = vmatpush.bf16.msra.mxu0 %v108_v3  ;;  %449 = vmatpush.bf16.msra.mxu1 %v108_v3 }
   0x8   :  { %450 = vmatpush.bf16.msra.mxu2 %v108_v3  ;;  %451 = vmatpush.bf16.msra.mxu3 %v108_v3 }
   0xb   :  { %114 = vmatpush.bf16.msra.mxu0 %v448_v4  ;;  %452 = vmatpush.bf16.msra.mxu1 %v448_v4 }
   0xc   :  { %453 = vmatpush.bf16.msra.mxu2 %v448_v4  ;;  %454 = vmatpush.bf16.msra.mxu3 %v448_v4 }
   0xf   :  { %115 = vmatpush.bf16.msra.mxu0 %v447_v5  ;;  %455 = vmatpush.bf16.msra.mxu1 %v447_v5 }
  0x10   :  { %456 = vmatpush.bf16.msra.mxu2 %v447_v5  ;;  %457 = vmatpush.bf16.msra.mxu3 %v447_v5 }
  0x13   :  { %116 = vmatpush.bf16.msra.mxu0 %v446_v6  ;;  %458 = vmatpush.bf16.msra.mxu1 %v446_v6 }
  0x14   :  { %459 = vmatpush.bf16.msra.mxu2 %v446_v6  ;;  %460 = vmatpush.bf16.msra.mxu3 %v446_v6 }
  0x17   :  { %117 = vmatpush.bf16.msra.mxu0 %v445_v7  ;;  %461 = vmatpush.bf16.msra.mxu1 %v445_v7 }
  0x18   :  { %462 = vmatpush.bf16.msra.mxu2 %v445_v7  ;;  %463 = vmatpush.bf16.msra.mxu3 %v445_v7 }
  0x1a   :  { %415 = vmatmul.msk.bf16.vlgmr.msra.gmra.mxu0 %vm90_vm1, %v440_v8  ;;  %416 = vmatmul.msk.bf16.vlgmr.msra.gmra.mxu1 %vm90_vm1, %v441_v9 }
  0x1b   :  { %417 = vmatmul.msk.bf16.vlgmr.msra.gmra.mxu2 %vm90_vm1, %v442_v10  ;;  %418 = vmatmul.msk.bf16.vlgmr.msra.gmra.mxu3 %vm90_vm1, %v443_v11 }
  0x2b   :  { %419 = vmatmul.msk.bf16.gmra.mxu3 %vm90_vm1, %v444_v12 }
  0x97   :  { %v119_v14 = vpop.f32.mrf.mxu0  ;;  %v124_v15 = vpop.f32.mrf.mxu1 }
  0x98   :  { %v561_v16 = vadd.f32 %v558_v13, %v119_v14  ;;  %v564_v17 = vadd.f32 %v558_v13, %v124_v15 }
  0x9a   :  { %v420_v18 = vadd.f32 -1.0, %v561_v16  ;;  %v422_v19 = vadd.f32 -1.0, %v564_v17 }
  0x9c   :  { %v430_v20 = vmul.f32 -1.442695, %v420_v18  ;;  %v432_v21 = vmul.f32 -1.442695, %v422_v19 }
  0x9e   :  { %465 = vpow2.f32 %v430_v20  ;;  %v129_v22 = vpop.f32.mrf.mxu2  ;;  %v134_v23 = vpop.f32.mrf.mxu3 }
  0x9f   :  { %467 = vpow2.f32 %v432_v21  ;;  %v569_v24 = vadd.f32 %v558_v13, %v129_v22  ;;  %v572_v25 = vadd.f32 %v558_v13, %v134_v23  ;;  %v121_v26 = vpop.f32.mrf.mxu0  ;;  %v126_v27 = vpop.f32.mrf.mxu1 }
  0xa0   :  { %v575_v28 = vadd.f32 %v558_v13, %v121_v26  ;;  %v578_v29 = vadd.f32 %v558_v13, %v126_v27 }
  0xa1   :  { %v424_v30 = vadd.f32 -1.0, %v569_v24  ;;  %v426_v31 = vadd.f32 -1.0, %v572_v25 }
  0xa2   :  { %v421_v32 = vadd.f32 -1.0, %v575_v28  ;;  %v423_v33 = vadd.f32 -1.0, %v578_v29 }
  0xa3   :  { %v434_v34 = vmul.f32 -1.442695, %v424_v30  ;;  %v436_v35 = vmul.f32 -1.442695, %v426_v31 }
  0xa4   :  { %v466_v36 = vpop.eup %465  ;;  %v431_v39 = vmul.f32 -1.442695, %v421_v32  ;;  %v433_v41 = vmul.f32 -1.442695, %v423_v33 }
  0xa5   :  { %v468_v37 = vpop.eup %467  ;;  %v184_v38 = vadd.f32 1.0, %v466_v36  ;;  %469 = vpow2.f32 %v434_v34 }
  0xa6   :  { %v186_v40 = vadd.f32 1.0, %v468_v37  ;;  %471 = vpow2.f32 %v436_v35  ;;  %v131_v42 = vpop.f32.mrf.mxu2  ;;  %v136_v49 = vpop.f32.mrf.mxu3 }
  0xa7   :  { %473 = vrcp.f32 %v184_v38  ;;  %v585_v43 = vadd.f32 %v558_v13, %v131_v42  ;;  %v203_v44 = vand.u32 2147483647, %v184_v38  ;;  %v205_v46 = vand.u32 2147483648, %v184_v38 }
  0xa8   :  { %475 = vrcp.f32 %v186_v40  ;;  %v233_v47 = vand.u32 2147483647, %v186_v40  ;;  %vm199_vm2 = vweird.f32 %v184_v38  ;;  %vm229_vm3 = vweird.f32 %v186_v40 }
  0xa9   :  { %477 = vpow2.f32 %v431_v39  ;;  %v425_v48 = vadd.f32 -1.0, %v585_v43  ;;  %v235_v53 = vand.u32 2147483648, %v186_v40  ;;  %vm592_vm4 = vcmp.eq.f32.partialorder %v203_v44, 8.507059e+37 }
  0xaa   :  { %479 = vpow2.f32 %v433_v41  ;;  %v598_v58 = vadd.f32 %v558_v13, %v136_v49  ;;  %v206_v60 = vor.u32 1.1754944e-38, %v205_v46  ;;  %vm600_vm5 = vcmp.eq.f32.partialorder %v233_v47, 8.507059e+37 }
  0xab   :  { %v470_v45 = vpop.eup %469  ;;  %v435_v63 = vmul.f32 -1.442695, %v425_v48  ;;  %v236_v12 = vor.u32 1.1754944e-38, %v235_v53 }
  0xac   :  { %v472_v50 = vpop.eup %471  ;;  %v588_v51 = vadd.f32 1.0, %v470_v45  ;;  %v427_v9 = vadd.f32 -1.0, %v598_v58 }
  0xad   :  { %v474_v52 = vpop.eup %473  ;;  %v590_v54 = vadd.f32 1.0, %v472_v50 }
  0xae   :  { %v476_v55 = vpop.eup %475  ;;  %v195_v56 = vmul.f32 %v474_v52, %v184_v38  ;;  %481 = vrcp.f32 %v588_v51  ;;  %vm200_vm6 = vweird.f32 %v474_v52  ;;  %v263_v2 = vand.u32 2147483647, %v588_v51  ;;  %v139_v27 = vpop.f32.mrf.mxu3 }
  0xaf   :  { %v478_v59 = vpop.eup %477  ;;  %v225_v61 = vmul.f32 %v476_v55, %v186_v40  ;;  %483 = vrcp.f32 %v590_v54  ;;  %vm230_vm8 = vweird.f32 %v476_v55  ;;  %v265_v4 = vand.u32 2147483648, %v588_v51  ;;  %vm614_vm9 = vmor %vm199_vm2, %vm200_vm6 }
  0xb0   :  { %v480_v0 = vpop.eup %479  ;;  %v196_v1 = vsub.f32 1.0, %v195_v56  ;;  %v295_v5 = vand.u32 2147483648, %v590_v54  ;;  %v608_v7 = vadd.f32 1.0, %v478_v59  ;;  %v293_v14 = vand.u32 2147483647, %v590_v54  ;;  %vm620_vm10 = vmor %vm229_vm3, %vm230_vm8 }
  0xb1   :  { %v226_v3 = vsub.f32 1.0, %v225_v61  ;;  %v610_v8 = vadd.f32 1.0, %v480_v0  ;;  %485 = vpow2.f32 %v435_v63  ;;  %vm259_vm11 = vweird.f32 %v588_v51 }
  0xb2   :  { %v197_v6 = vmul.f32 %v474_v52, %v196_v1  ;;  %vm625_vm12 = vcmp.eq.f32.partialorder %v263_v2, 8.507059e+37  ;;  %487 = vrcp.f32 %v608_v7  ;;  %v266_v23 = vor.u32 1.1754944e-38, %v265_v4 }
  0xb3   :  { %v227_v11 = vmul.f32 %v476_v55, %v226_v3  ;;  %vm289_vm13 = vweird.f32 %v590_v54  ;;  %v296_v26 = vor.u32 1.1754944e-38, %v295_v5  ;;  %489 = vrcp.f32 %v610_v8 }
  0xb4   :  { %v482_v15 = vpop.eup %481  ;;  %v198_v18 = vadd.f32 %v474_v52, %v197_v6  ;;  %v437_v32 = vmul.f32 -1.442695, %v427_v9  ;;  %vm640_vm15 = vcmp.eq.f32.partialorder %v293_v14, 8.507059e+37  ;;  %vm214_vm0 = vweird.f32 %v608_v7 }
  0xb5   :  { %v228_v21 = vadd.f32 %v476_v55, %v227_v11  ;;  %v255_v22 = vmul.f32 %v482_v15, %v588_v51  ;;  %v484_v30 = vpop.eup %483  ;;  %vm260_vm14 = vweird.f32 %v482_v15  ;;  %v218_v40 = vand.u32 2147483647, %v608_v7 }
  0xb6   :  { %v202_v31 = vsel %vm614_vm9, %v474_v52, %v198_v18  ;;  %v285_v36 = vmul.f32 %v484_v30, %v590_v54  ;;  %v220_v46 = vand.u32 2147483648, %v608_v7  ;;  %vm654_vm1 = vmor %vm259_vm11, %vm260_vm14  ;;  %vm290_vm2 = vweird.f32 %v484_v30  ;;  %v141_v4 = vpop.f32.mrf.mxu3 }
  0xb7   :  { %v207_v33 = vsel %vm592_vm4, %v206_v60, %v202_v31  ;;  %v232_v34 = vsel %vm620_vm10, %v476_v55, %v228_v21  ;;  %v256_v35 = vsub.f32 1.0, %v255_v22  ;;  %v486_v41 = vpop.eup %485  ;;  %491 = vpow2.f32 %v437_v32 }
  0xb8   :  { %v344_v38 = vmul.f32 %v207_v33, %v561_v16  ;;  %v237_v39 = vsel %vm600_vm5, %v236_v12, %v232_v34  ;;  %v286_v45 = vsub.f32 1.0, %v285_v36  ;;  %v488_v47 = vpop.eup %487  ;;  %v658_v49 = vadd.f32 1.0, %v486_v41  ;;  %vm291_vm5 = vmor %vm289_vm13, %vm290_vm2 }
  0xb9   :  { %v346_v42 = vmul.f32 %v237_v39, %v564_v17  ;;  %v257_v44 = vmul.f32 %v482_v15, %v256_v35  ;;  %v210_v53 = vmul.f32 %v488_v47, %v608_v7  ;;  %v490_v55 = vpop.eup %489  ;;  %vm215_vm3 = vweird.f32 %v488_v47 }
  0xba   :  { %v354_v48 = vpack.c.bf16 %v344_v38, %v344_v38  ;;  %v287_v17 = vmul.f32 %v484_v30, %v286_v45  ;;  %vm665_vm4 = vcmp.eq.f32.partialorder %v218_v40, 8.507059e+37  ;;  %v248_v56 = vand.u32 2147483647, %v610_v8  ;;  %vm691_vm9 = vmor %vm214_vm0, %vm215_vm3 }
  0xbb   :  { %v356_v50 = vpack.c.bf16 %v346_v42, %v346_v42  ;;  %v258_v52 = vadd.f32 %v482_v15, %v257_v44  ;;  %493 = vrcp.f32 %v658_v49  ;;  %v211_v60 = vsub.f32 1.0, %v210_v53 }
  0xbc   :  { %365 = vst.msk [vmem:[%s770_s3] sm:$0xf] %vm364_vm7, %v354_v48  ;;  %v288_v59 = vadd.f32 %v484_v30, %v287_v17  ;;  %v240_v61 = vmul.f32 %v490_v55, %v610_v8  ;;  %vm244_vm6 = vweird.f32 %v610_v8  ;;  %vm245_vm8 = vweird.f32 %v490_v55 }
  0xbd   :  { %367 = vst.msk [vmem:[%s770_s3 + $0x8] sm:$0xf] %vm364_vm7, %v356_v50  ;;  %v262_v57 = vsel %vm654_vm1, %v482_v15, %v258_v52  ;;  %v250_v63 = vand.u32 2147483648, %v610_v8  ;;  %v212_v2 = vmul.f32 %v488_v47, %v211_v60  ;;  %v492_v5 = vpop.eup %491  ;;  %v221_v9 = vor.u32 1.1754944e-38, %v220_v46  ;;  %vm706_vm11 = vmor %vm244_vm6, %vm245_vm8 }
  0xbe   :  { %v267_v62 = vsel %vm625_vm12, %v266_v23, %v262_v57  ;;  %v292_v1 = vsel %vm291_vm5, %v484_v30, %v288_v59  ;;  %v241_v3 = vsub.f32 1.0, %v240_v61  ;;  %vm695_vm10 = vcmp.eq.f32.partialorder %v248_v56, 8.507059e+37 }
  0xbf   :  { %v348_v0 = vmul.f32 %v267_v62, %v569_v24  ;;  %v297_v6 = vsel %vm640_vm15, %v296_v26, %v292_v1  ;;  %v700_v24 = vadd.f32 %v558_v13, %v139_v27  ;;  %v213_v14 = vadd.f32 %v488_v47, %v212_v2 }
  0xc0   :  { %v350_v12 = vmul.f32 %v297_v6, %v572_v25  ;;  %v242_v15 = vmul.f32 %v490_v55, %v241_v3  ;;  %v251_v19 = vor.u32 1.1754944e-38, %v250_v63  ;;  %v191_v20 = vadd.f32 1.0, %v492_v5 }
  0xc1   :  { %v358_v11 = vpack.c.bf16 %v348_v0, %v348_v0  ;;  %v494_v18 = vpop.eup %493  ;;  %v428_v21 = vadd.f32 -1.0, %v700_v24  ;;  %v712_v22 = vadd.f32 %v558_v13, %v141_v4  ;;  %v217_v8 = vsel %vm691_vm9, %v488_v47, %v213_v14 }
  0xc2   :  { %v360_v25 = vpack.c.bf16 %v350_v12, %v350_v12  ;;  %v243_v23 = vadd.f32 %v490_v55, %v242_v15  ;;  %v270_v26 = vmul.f32 %v494_v18, %v658_v49  ;;  %v222_v27 = vsel %vm665_vm4, %v221_v9, %v217_v8 }
  0xc3   :  { %369 = vst.msk [vmem:[%s770_s3 + $0x10] sm:$0xf] %vm364_vm7, %v358_v11  ;;  %vm274_vm12 = vweird.f32 %v658_v49  ;;  %495 = vrcp.f32 %v191_v20  ;;  %v345_v13 = vmul.f32 %v222_v27, %v575_v28  ;;  %v278_v32 = vand.u32 2147483647, %v658_v49 }
  0xc4   :  { %371 = vst.msk [vmem:[%s770_s3 + $0x18] sm:$0xf] %vm364_vm7, %v360_v25  ;;  %v247_v30 = vsel %vm706_vm11, %v490_v55, %v243_v23  ;;  %v271_v31 = vsub.f32 1.0, %v270_v26  ;;  %v280_v34 = vand.u32 2147483648, %v658_v49  ;;  %v438_v35 = vmul.f32 -1.442695, %v428_v21 }
  0xc5   :  { %v252_v33 = vsel %vm695_vm10, %v251_v19, %v247_v30  ;;  %v429_v36 = vadd.f32 -1.0, %v712_v22  ;;  %v355_v37 = vpack.c.bf16 %v345_v13, %v345_v13  ;;  %vm275_vm13 = vweird.f32 %v494_v18 }
  0xc6   :  { %v347_v38 = vmul.f32 %v252_v33, %v578_v29  ;;  %v272_v39 = vmul.f32 %v494_v18, %v271_v31  ;;  %497 = vpow2.f32 %v438_v35  ;;  %vm276_vm14 = vmor %vm274_vm12, %vm275_vm13  ;;  %v281_v44 = vor.u32 1.1754944e-38, %v280_v34 }
  0xc7   :  { %v439_v28 = vmul.f32 -1.442695, %v429_v36  ;;  %366 = vst.msk [vmem:[%s770_s3 + $0x4] sm:$0xf] %vm364_vm7, %v355_v37  ;;  %vm279_vm15 = vcmp.eq.f32.partialorder %v278_v32, 8.507059e+37  ;;  %v310_v52 = vand.u32 2147483648, %v191_v20  ;;  %vm304_vm1 = vweird.f32 %v191_v20 }
  0xc8   :  { %v357_v40 = vpack.c.bf16 %v347_v38, %v347_v38  ;;  %v273_v41 = vadd.f32 %v494_v18, %v272_v39  ;;  %v308_v50 = vand.u32 2147483647, %v191_v20 }
  0xc9   :  { %v496_v42 = vpop.eup %495  ;;  %499 = vpow2.f32 %v439_v28  ;;  %v311_v56 = vor.u32 1.1754944e-38, %v310_v52 }
  0xca   :  { %368 = vst.msk [vmem:[%s770_s3 + $0xc] sm:$0xf] %vm364_vm7, %v357_v40  ;;  %v277_v29 = vsel %vm276_vm14, %v494_v18, %v273_v41  ;;  %v300_v45 = vmul.f32 %v496_v42, %v191_v20  ;;  %vm305_vm0 = vweird.f32 %v496_v42  ;;  %vm309_vm3 = vcmp.eq.f32.partialorder %v308_v50, 8.507059e+37 }
  0xcb   :  { %v282_v46 = vsel %vm279_vm15, %v281_v44, %v277_v29  ;;  %vm306_vm2 = vmor %vm304_vm1, %vm305_vm0 }
  0xcc   :  { %v349_v47 = vmul.f32 %v282_v46, %v585_v43  ;;  %v301_v48 = vsub.f32 1.0, %v300_v45  ;;  %v498_v16 = vpop.eup %497 }
  0xcd   :  { %v192_v53 = vadd.f32 1.0, %v498_v16 }
  0xce   :  { %v359_v17 = vpack.c.bf16 %v349_v47, %v349_v47  ;;  %v302_v49 = vmul.f32 %v496_v42, %v301_v48 }
  0xcf   :  { %v500_v55 = vpop.eup %499  ;;  %501 = vrcp.f32 %v192_v53  ;;  %v325_v2 = vand.u32 2147483648, %v192_v53  ;;  %v323_v5 = vand.u32 2147483647, %v192_v53  ;;  %vm319_vm5 = vweird.f32 %v192_v53 }
  0xd0   :  { %370 = vst.msk [vmem:[%s770_s3 + $0x14] sm:$0xf] %vm364_vm7, %v359_v17  ;;  %v303_v51 = vadd.f32 %v496_v42, %v302_v49  ;;  %v193_v43 = vadd.f32 1.0, %v500_v55 }
  0xd1   :  { %vm324_vm9 = vcmp.eq.f32.partialorder %v323_v5, 8.507059e+37 }
  0xd2   :  { %v307_v57 = vsel %vm306_vm2, %v496_v42, %v303_v51  ;;  %503 = vrcp.f32 %v193_v43  ;;  %v340_v9 = vand.u32 2147483648, %v193_v43  ;;  %v338_v11 = vand.u32 2147483647, %v193_v43 }
  0xd3   :  { %v312_v59 = vsel %vm309_vm3, %v311_v56, %v307_v57  ;;  %vm334_vm10 = vweird.f32 %v193_v43 }
  0xd4   :  { %v351_v60 = vmul.f32 %v312_v59, %v598_v58  ;;  %v326_v58 = vor.u32 1.1754944e-38, %v325_v2  ;;  %v341_v7 = vor.u32 1.1754944e-38, %v340_v9  ;;  %vm339_vm12 = vcmp.eq.f32.partialorder %v338_v11, 8.507059e+37 }
  0xd5   :  { %v502_v61 = vpop.eup %501 }
  0xd6   :  { %v361_v62 = vpack.c.bf16 %v351_v60, %v351_v60  ;;  %v315_v63 = vmul.f32 %v502_v61, %v192_v53  ;;  %vm320_vm4 = vweird.f32 %v502_v61 }
  0xd7   :  { %vm321_vm6 = vmor %vm319_vm5, %vm320_vm4 }
  0xd8   :  { %372 = vst.msk [vmem:[%s770_s3 + $0x1c] sm:$0xf] %vm364_vm7, %v361_v62  ;;  %v504_v0 = vpop.eup %503  ;;  %v316_v1 = vsub.f32 1.0, %v315_v63 }
  0xd9   :  { %v330_v3 = vmul.f32 %v504_v0, %v193_v43  ;;  %vm335_vm8 = vweird.f32 %v504_v0 }
  0xda   :  { %v317_v4 = vmul.f32 %v502_v61, %v316_v1  ;;  %vm336_vm11 = vmor %vm334_vm10, %vm335_vm8 }
  0xdb   :  { %v331_v6 = vsub.f32 1.0, %v330_v3 }
  0xdc   :  { %v318_v54 = vadd.f32 %v502_v61, %v317_v4 }
  0xdd   :  { %v332_v10 = vmul.f32 %v504_v0, %v331_v6 }
  0xde   :  { %v322_v12 = vsel %vm321_vm6, %v502_v61, %v318_v54 }
  0xdf   :  { %v327_v14 = vsel %vm324_vm9, %v326_v58, %v322_v12  ;;  %v333_v15 = vadd.f32 %v504_v0, %v332_v10 }
  0xe0   :  { %v352_v18 = vmul.f32 %v327_v14, %v700_v24 }
  0xe1   :  { %v337_v19 = vsel %vm336_vm11, %v504_v0, %v333_v15 }
  0xe2   :  { %v362_v20 = vpack.c.bf16 %v352_v18, %v352_v18  ;;  %v342_v21 = vsel %vm339_vm12, %v341_v7, %v337_v19 }
  0xe3   :  { %v353_v25 = vmul.f32 %v342_v21, %v712_v22 }
  0xe4   :  { %373 = vst.msk [vmem:[%s770_s3 + $0x20] sm:$0xf] %vm364_vm7, %v362_v20 }
  0xe5   :  { %v363_v8 = vpack.c.bf16 %v353_v25, %v353_v25 }
  0xe7   :  { %374 = vst.msk [vmem:[%s770_s3 + $0x24] sm:$0xf] %vm364_vm7, %v363_v8 }

// kernel: conv2d_subsampling_forward.6
= control target key start
LH: loop header
LB: loop body
LE: loop exit
PB: predicated region body
PF: predicated region fallthrough
CT: control target
= control target key end

     0   :  { %vm182_vm0 = vcmask 261120   ;;  %s500_s1 = inlined_call_operand.vmem [shape: bf16[288,128], index: 1, kind: input, shape index: {}]   ;;  %s501_s0 = inlined_call_operand.vmem [shape: bf16[16,288], index: 0, kind: input, shape index: {}]   ;;  %s502_s2 = inlined_call_operand.vmem [shape: f32[1,128], index: 2, kind: input, shape index: {}]   ;;  %s503_s3 = inlined_call_operand.vmem [shape: bf16[16,128], index: 3, kind: output, shape index: {}]  }
   0x1   :  { %v377_v0 = vld [vmem:[%s500_s1 + $0x38] sm:$0xff]  ;;  %v376_v2 = vld [vmem:[%s500_s1 + $0x30] sm:$0xff]  ;;  %v387_v4 = vld [vmem:[%s500_s1 + $0x88] sm:$0xff] }
   0x2   :  { %v385_v1 = vld [vmem:[%s500_s1 + $0x78] sm:$0xff]  ;;  %186 = vmatpush.bf16.msra.mxu0 %v377_v0  ;;  %v384_v3 = vld [vmem:[%s500_s1 + $0x70] sm:$0xff]  ;;  %220 = vmatpush.bf16.msra.mxu2 %v387_v4  ;;  %v386_v5 = vld [vmem:[%s500_s1 + $0x80] sm:$0xff] }
   0x3   :  { %200 = vmatpush.bf16.msra.mxu1 %v385_v1  ;;  %v288_v6 = vld [vmem:[%s501_s0 + $0x8] sm:$0xf]  ;;  %v369_v7 = vld [vmem:[%s501_s0 + $0x10] sm:$0xf0]  ;;  %v374_v11 = vld [vmem:[%s500_s1 + $0x20] sm:$0xff] }
   0x4   :  { %v375_v8 = vld [vmem:[%s500_s1 + $0x28] sm:$0xff]  ;;  %v289_v10 = vor.u32 %v369_v7, %v288_v6  ;;  %v382_v12 = vld [vmem:[%s500_s1 + $0x60] sm:$0xff]  ;;  %v373_v13 = vld [vmem:[%s500_s1 + $0x18] sm:$0xff] }
   0x5   :  { %v383_v9 = vld [vmem:[%s500_s1 + $0x68] sm:$0xff]  ;;  %v381_v14 = vld [vmem:[%s500_s1 + $0x58] sm:$0xff]  ;;  %v372_v15 = vld [vmem:[%s500_s1 + $0x10] sm:$0xff] }
   0x6   :  { %187 = vmatpush.bf16.msra.mxu0 %v376_v2  ;;  %221 = vmatpush.bf16.msra.mxu2 %v386_v5  ;;  %v380_v16 = vld [vmem:[%s500_s1 + $0x50] sm:$0xff]  ;;  %v371_v17 = vld [vmem:[%s500_s1 + $0x8] sm:$0xff]  ;;  %v370_v19 = vld [vmem:[%s500_s1] sm:$0xff] }
   0x7   :  { %201 = vmatpush.bf16.msra.mxu1 %v384_v3  ;;  %v379_v18 = vld [vmem:[%s500_s1 + $0x48] sm:$0xff]  ;;  %v378_v20 = vld [vmem:[%s500_s1 + $0x40] sm:$0xff]  ;;  %v282_v24 = vld [vmem:[%s501_s0 + $0xc] sm:$0xf0] }
   0x8   :  { %v280_v21 = vld [vmem:[%s501_s0] sm:$0xf]  ;;  %v368_v22 = vld [vmem:[%s501_s0 + $0x8] sm:$0xf0]  ;;  %v367_v23 = vld [vmem:[%s501_s0 + $0x4] sm:$0xf] }
   0x9   :  { %362 = vmatmul.msk.bf16.vlgmr.msra.gmra.mxu2 %vm182_vm0, %v289_v10  ;;  %v281_v25 = vor.u32 %v368_v22, %v280_v21  ;;  %v285_v26 = vor.u32 %v367_v23, %v282_v24  ;;  %v393_v27 = vld [vmem:[%s502_s2] ss:$0 sm:$0xff] }
   0xa   :  { %188 = vmatpush.bf16.msra.mxu0 %v375_v8 }
   0xb   :  { %202 = vmatpush.bf16.msra.mxu1 %v383_v9 }
   0xe   :  { %189 = vmatpush.bf16.msra.mxu0 %v374_v11 }
   0xf   :  { %203 = vmatpush.bf16.msra.mxu1 %v382_v12 }
  0x12   :  { %190 = vmatpush.bf16.msra.mxu0 %v373_v13 }
  0x13   :  { %204 = vmatpush.bf16.msra.mxu1 %v381_v14 }
  0x16   :  { %191 = vmatpush.bf16.msra.mxu0 %v372_v15 }
  0x17   :  { %205 = vmatpush.bf16.msra.mxu1 %v380_v16 }
  0x1a   :  { %192 = vmatpush.bf16.msra.mxu0 %v371_v17 }
  0x1b   :  { %206 = vmatpush.bf16.msra.mxu1 %v379_v18 }
  0x1e   :  { %193 = vmatpush.bf16.msra.mxu0 %v370_v19 }
  0x1f   :  { %207 = vmatpush.bf16.msra.mxu1 %v378_v20 }
  0x21   :  { %194 = vmatmul.bf16.vlgmr.msra.gmra.mxu0 %v281_v25 }
  0x22   :  { %208 = vmatmul.bf16.vlgmr.msra.gmra.mxu1 %v285_v26 }
  0x8c   :  { %v223_v31 = vpop.f32.mrf.mxu2 }
  0x94   :  { %v225_v40 = vpop.f32.mrf.mxu2 }
  0x9e   :  { %v195_v28 = vpop.f32.mrf.mxu0 }
  0x9f   :  { %v209_v29 = vpop.f32.mrf.mxu1  ;;  %v196_v30 = vadd.f32 %v393_v27, %v195_v28 }
  0xa1   :  { %v210_v32 = vadd.f32 %v209_v29, %v196_v30 }
  0xa3   :  { %v224_v33 = vadd.f32 %v223_v31, %v210_v32 }
  0xa5   :  { %v363_v34 = vadd.f32 -1.0, %v224_v33 }
  0xa6   :  { %v197_v35 = vpop.f32.mrf.mxu0 }
  0xa7   :  { %v365_v36 = vmul.f32 -1.442695, %v363_v34  ;;  %v198_v37 = vadd.f32 %v393_v27, %v197_v35  ;;  %v211_v38 = vpop.f32.mrf.mxu1 }
  0xa9   :  { %394 = vpow2.f32 %v365_v36  ;;  %v212_v39 = vadd.f32 %v211_v38, %v198_v37 }
  0xab   :  { %v226_v41 = vadd.f32 %v225_v40, %v212_v39 }
  0xad   :  { %v364_v42 = vadd.f32 -1.0, %v226_v41 }
  0xaf   :  { %v395_v43 = vpop.eup %394  ;;  %v366_v44 = vmul.f32 -1.442695, %v364_v42 }
  0xb0   :  { %v236_v45 = vadd.f32 1.0, %v395_v43 }
  0xb1   :  { %396 = vpow2.f32 %v366_v44 }
  0xb2   :  { %398 = vrcp.f32 %v236_v45  ;;  %v249_v55 = vand.u32 2147483648, %v236_v45  ;;  %vm243_vm2 = vweird.f32 %v236_v45  ;;  %v247_v56 = vand.u32 2147483647, %v236_v45 }
  0xb4   :  { %v250_v62 = vor.u32 1.1754944e-38, %v249_v55  ;;  %vm248_vm5 = vcmp.eq.f32.partialorder %v247_v56, 8.507059e+37 }
  0xb7   :  { %v397_v46 = vpop.eup %396 }
  0xb8   :  { %v399_v47 = vpop.eup %398  ;;  %v237_v48 = vadd.f32 1.0, %v397_v46 }
  0xb9   :  { %v239_v49 = vmul.f32 %v399_v47, %v236_v45  ;;  %vm244_vm1 = vweird.f32 %v399_v47 }
  0xba   :  { %400 = vrcp.f32 %v237_v48  ;;  %vm245_vm3 = vmor %vm243_vm2, %vm244_vm1  ;;  %v264_v58 = vand.u32 2147483648, %v237_v48  ;;  %v262_v61 = vand.u32 2147483647, %v237_v48  ;;  %vm258_vm6 = vweird.f32 %v237_v48 }
  0xbb   :  { %v240_v50 = vsub.f32 1.0, %v239_v49 }
  0xbc   :  { %v265_v1 = vor.u32 1.1754944e-38, %v264_v58  ;;  %vm263_vm8 = vcmp.eq.f32.partialorder %v262_v61, 8.507059e+37 }
  0xbd   :  { %v241_v51 = vmul.f32 %v399_v47, %v240_v50 }
  0xbf   :  { %v242_v53 = vadd.f32 %v399_v47, %v241_v51 }
  0xc0   :  { %v401_v52 = vpop.eup %400 }
  0xc1   :  { %v254_v54 = vmul.f32 %v401_v52, %v237_v48  ;;  %v246_v59 = vsel %vm245_vm3, %v399_v47, %v242_v53  ;;  %vm259_vm4 = vweird.f32 %v401_v52 }
  0xc2   :  { %v251_v0 = vsel %vm248_vm5, %v250_v62, %v246_v59  ;;  %vm260_vm7 = vmor %vm258_vm6, %vm259_vm4 }
  0xc3   :  { %v255_v57 = vsub.f32 1.0, %v254_v54  ;;  %v268_v4 = vmul.f32 %v251_v0, %v224_v33 }
  0xc5   :  { %v256_v60 = vmul.f32 %v401_v52, %v255_v57 }
  0xc7   :  { %v257_v63 = vadd.f32 %v401_v52, %v256_v60 }
  0xc9   :  { %v261_v2 = vsel %vm260_vm7, %v401_v52, %v257_v63 }
  0xca   :  { %v266_v3 = vsel %vm263_vm8, %v265_v1, %v261_v2 }
  0xcb   :  { %v269_v5 = vmul.f32 %v266_v3, %v226_v41 }
  0xcd   :  { %v391_v6 = vpack.c.bf16 %v269_v5, %v268_v4 }
  0xcf   :  { %392 = vst [vmem:[%s503_s3] sm:$0xff] %v391_v6  }

// kernel: conv2d_subsampling_forward.7
= control target key start
LH: loop header
LB: loop body
LE: loop exit
PB: predicated region body
PF: predicated region fallthrough
CT: control target
= control target key end

     0   :  { %vm188_vm0 = vcmask 261120   ;;  %v332_v35 = vmov 32.0   ;;  %s426_s1 = inlined_call_operand.vmem [shape: bf16[256,32], index: 1, kind: input, shape index: {}]   ;;  %s427_s2 = inlined_call_operand.vmem [shape: f32[1,32], index: 2, kind: input, shape index: {}]   ;;  %s428_s0 = inlined_call_operand.vmem [shape: bf16[16,256], index: 0, kind: input, shape index: {}]   ;;  %s429_s3 = inlined_call_operand.vmem [shape: f32[16,32], index: 3, kind: output, shape index: {}]  }
   0x1   :  { %v315_v0 = vld [vmem:[%s426_s1 + $0x38] sm:$0xff]  ;;  %v314_v2 = vld [vmem:[%s426_s1 + $0x30] sm:$0xff]  ;;  %v313_v4 = vld [vmem:[%s426_s1 + $0x28] sm:$0xff]  ;;  %326 = vrcp.f32 %v332_v35 }
   0x2   :  { %v323_v1 = vld [vmem:[%s426_s1 + $0x78] sm:$0xff]  ;;  %158 = vmatpush.bf16.msra.mxu0 %v315_v0  ;;  %v322_v3 = vld [vmem:[%s426_s1 + $0x70] sm:$0xff]  ;;  %v321_v5 = vld [vmem:[%s426_s1 + $0x68] sm:$0xff] }
   0x3   :  { %172 = vmatpush.bf16.msra.mxu1 %v323_v1  ;;  %v312_v6 = vld [vmem:[%s426_s1 + $0x20] sm:$0xff]  ;;  %v311_v8 = vld [vmem:[%s426_s1 + $0x18] sm:$0xff]  ;;  %v310_v10 = vld [vmem:[%s426_s1 + $0x10] sm:$0xff] }
   0x4   :  { %v320_v7 = vld [vmem:[%s426_s1 + $0x60] sm:$0xff]  ;;  %v319_v9 = vld [vmem:[%s426_s1 + $0x58] sm:$0xff]  ;;  %v318_v11 = vld [vmem:[%s426_s1 + $0x50] sm:$0xff] }
   0x5   :  { %v309_v12 = vld [vmem:[%s426_s1 + $0x8] sm:$0xff]  ;;  %v308_v14 = vld [vmem:[%s426_s1] sm:$0xff] }
   0x6   :  { %159 = vmatpush.bf16.msra.mxu0 %v314_v2  ;;  %v317_v13 = vld [vmem:[%s426_s1 + $0x48] sm:$0xff]  ;;  %v316_v15 = vld [vmem:[%s426_s1 + $0x40] sm:$0xff] }
   0x7   :  { %173 = vmatpush.bf16.msra.mxu1 %v322_v3  ;;  %v236_v16 = vld [vmem:[%s428_s0] sm:$0xf]  ;;  %v307_v17 = vld [vmem:[%s428_s0 + $0x4] sm:$0xf0]  ;;  %v306_v18 = vld [vmem:[%s428_s0 + $0x4] sm:$0xf]  ;;  %v327_v36 = vpop.eup %326 }
   0x8   :  { %v238_v19 = vld [vmem:[%s428_s0 + $0x8] sm:$0xf0]  ;;  %v237_v20 = vor.u32 %v307_v17, %v236_v16  ;;  %v325_v22 = vld [vmem:[%s427_s2] ss:$0 sm:$0xff]  ;;  %v196_v37 = vmul.f32 32.0, %v327_v36  ;;  %vm200_vm1 = vweird.f32 %v327_v36 }
   0x9   :  { %v241_v21 = vor.u32 %v306_v18, %v238_v19 }
   0xa   :  { %160 = vmatpush.bf16.msra.mxu0 %v313_v4  ;;  %v197_v38 = vsub.f32 1.0, %v196_v37 }
   0xb   :  { %174 = vmatpush.bf16.msra.mxu1 %v321_v5 }
   0xc   :  { %v198_v39 = vmul.f32 %v327_v36, %v197_v38 }
   0xe   :  { %161 = vmatpush.bf16.msra.mxu0 %v312_v6  ;;  %v199_v40 = vadd.f32 %v327_v36, %v198_v39 }
   0xf   :  { %175 = vmatpush.bf16.msra.mxu1 %v320_v7 }
  0x10   :  { %v201_v41 = vsel %vm200_vm1, %v327_v36, %v199_v40 }
  0x12   :  { %162 = vmatpush.bf16.msra.mxu0 %v311_v8 }
  0x13   :  { %176 = vmatpush.bf16.msra.mxu1 %v319_v9 }
  0x16   :  { %163 = vmatpush.bf16.msra.mxu0 %v310_v10 }
  0x17   :  { %177 = vmatpush.bf16.msra.mxu1 %v318_v11 }
  0x1a   :  { %164 = vmatpush.bf16.msra.mxu0 %v309_v12 }
  0x1b   :  { %178 = vmatpush.bf16.msra.mxu1 %v317_v13 }
  0x1e   :  { %165 = vmatpush.bf16.msra.mxu0 %v308_v14 }
  0x1f   :  { %179 = vmatpush.bf16.msra.mxu1 %v316_v15 }
  0x21   :  { %166 = vmatmul.bf16.vlgmr.msra.gmra.mxu0 %v237_v20 }
  0x22   :  { %180 = vmatmul.bf16.vlgmr.msra.gmra.mxu1 %v241_v21 }
  0x9e   :  { %v167_v23 = vpop.f32.mrf.mxu0 }
  0x9f   :  { %v181_v24 = vpop.f32.mrf.mxu1  ;;  %v168_v25 = vadd.f32 %v325_v22, %v167_v23 }
  0xa1   :  { %v182_v26 = vadd.f32 %v181_v24, %v168_v25 }
  0xa3   :  { %v186_v27 = vmul.f32 %v182_v26, %v182_v26 }
  0xa5   :  { %v189_v28 = vsel %vm188_vm0, %v186_v27, 0.0 }
  0xa6   :  { %v169_v29 = vpop.f32.mrf.mxu0  ;;  %190 = vadd.xlane.f32.xlu0 %v189_v28 }
  0xa7   :  { %v170_v30 = vadd.f32 %v325_v22, %v169_v29  ;;  %v183_v31 = vpop.f32.mrf.mxu1 }
  0xa9   :  { %v184_v32 = vadd.f32 %v183_v31, %v170_v30 }
  0xab   :  { %v187_v33 = vmul.f32 %v184_v32, %v184_v32 }
  0xad   :  { %v192_v34 = vsel %vm188_vm0, %v187_v33, 0.0 }
  0xae   :  { %193 = vadd.xlane.f32.xlu0 %v192_v34 }
 0x119   :  { %v191_v42 = vpop.xlane.xlu0 %190 }
 0x11a   :  { %v202_v43 = vmul.f32 %v201_v41, %v191_v42 }
 0x11c   :  { %v204_v44 = vadd.f32 0.25, %v202_v43 }
 0x11e   :  { %328 = vrsqrt.f32 %v204_v44  ;;  %vm212_vm3 = vweird.f32 %v204_v44 }
 0x121   :  { %v194_v45 = vpop.xlane.xlu0 %193 }
 0x122   :  { %v203_v46 = vmul.f32 %v201_v41, %v194_v45 }
 0x124   :  { %v329_v47 = vpop.eup %328  ;;  %v205_v48 = vadd.f32 0.25, %v203_v46 }
 0x125   :  { %v207_v49 = vmul.f32 %v329_v47, %v204_v44  ;;  %vm213_vm2 = vweird.f32 %v329_v47 }
 0x126   :  { %330 = vrsqrt.f32 %v205_v48  ;;  %vm214_vm4 = vmor %vm212_vm3, %vm213_vm2  ;;  %vm222_vm6 = vweird.f32 %v205_v48 }
 0x127   :  { %v208_v50 = vmul.f32 %v329_v47, %v207_v49 }
 0x129   :  { %v209_v51 = vmul.f32 0.5, %v208_v50 }
 0x12b   :  { %v210_v52 = vsub.f32 1.5, %v209_v51 }
 0x12c   :  { %v331_v53 = vpop.eup %330 }
 0x12d   :  { %v211_v54 = vmul.f32 %v329_v47, %v210_v52  ;;  %v217_v55 = vmul.f32 %v331_v53, %v205_v48  ;;  %vm223_vm5 = vweird.f32 %v331_v53 }
 0x12e   :  { %vm224_vm7 = vmor %vm222_vm6, %vm223_vm5 }
 0x12f   :  { %v215_v56 = vsel %vm214_vm4, %v329_v47, %v211_v54  ;;  %v218_v57 = vmul.f32 %v331_v53, %v217_v55 }
 0x130   :  { %v226_v58 = vmul.f32 %v215_v56, %v182_v26 }
 0x131   :  { %v219_v59 = vmul.f32 0.5, %v218_v57 }
 0x132   :  { %228 = vst.msk [vmem:[%s429_s3] sm:$0xff] %vm188_vm0, %v226_v58 }
 0x133   :  { %v220_v60 = vsub.f32 1.5, %v219_v59 }
 0x135   :  { %v221_v61 = vmul.f32 %v331_v53, %v220_v60 }
 0x137   :  { %v225_v62 = vsel %vm224_vm7, %v331_v53, %v221_v61 }
 0x138   :  { %v227_v63 = vmul.f32 %v225_v62, %v184_v32 }
 0x13a   :  { %229 = vst.msk [vmem:[%s429_s3 + $0x8] sm:$0xff] %vm188_vm0, %v227_v63 }

</bundles_post_ra>
